<compile_context>
chip_gen: v7x
topology: tpu7x:2x2x1
jax: 0.10.0
libtpu: 0.0.40
codegen_flags: <defaults>
</compile_context>

<pallas_src>
import functools
import math

import jax
import jax.numpy as jnp
from jax.experimental import pallas as pl
from jax.experimental.pallas import tpu as pltpu


# ---------------------------------------------------------------------------
# Pallas kernel: Bt batch elements per grid step, full GNNCell (x `step`)
# ---------------------------------------------------------------------------
def _gnn_kernel(a_ref, oh_ref, w_ref, b_ref, out_ref, *, step, Bt, S, H):
    # a_ref : (Bt, S, 2S)  oh_ref : (Bt, S, H)  w_ref : (H, 16H)  b_ref : (1, 12H)
    M = Bt * S

    A = a_ref[...]                       # (Bt, S, 2S)
    A_in = A[:, :, :S]                   # (Bt, S, S)
    A_out = A[:, :, S:]                  # (Bt, S, S)
    o_hidden = oh_ref[...].reshape(M, H)  # (M, H) -- leading-dim merge, S==8

    # Loop-invariant weight / bias slices (static lane offsets, sliced once).
    W_h = w_ref[:, 0:5 * H]              # [edge_in | edge_out | w_hh]   (H, 5H)
    W_o = w_ref[:, 5 * H:9 * H]          # [w_oh | w_linear_o]           (H, 4H)
    W_iin = w_ref[:, 9 * H:12 * H]       # w_ih (input_in part)          (H, 3H)
    W_iout = w_ref[:, 12 * H:15 * H]     # w_ih (input_out part)         (H, 3H)
    W_lg = w_ref[:, 15 * H:16 * H]       # w_linear (gnn_h part)         (H, H)
    b_h = b_ref[:, 0:5 * H]              # [ein_b | eout_b | b_hh]
    b_o = b_ref[:, 5 * H:9 * H]          # [b_oh | b_linear]
    b_gi = b_ref[:, 9 * H:12 * H]        # b_ih + b_iah@Wih_in + b_oah@Wih_out

    # Hoisted o_hidden-only terms (invariant across GNN steps).
    og = jnp.dot(o_hidden, W_o, preferred_element_type=jnp.float32) + b_o
    o_r = og[:, 0:H]
    o_i = og[:, H:2 * H]
    o_n = og[:, 2 * H:3 * H]
    lin_o = og[:, 3 * H:4 * H]           # o_hidden @ w_linear_o + b_linear

    hidden = o_hidden
    # TODO(synk): for very large `step`, switch to lax.fori_loop over a VMEM
    # scratch to bound vreg pressure; for small static step the unroll is fine.
    for _ in range(step):
        # Fused: eh_in | eh_out | gh in one (M,H)x(H,5H) matmul.
        hg = jnp.dot(hidden, W_h, preferred_element_type=jnp.float32) + b_h
        eh_in = hg[:, 0:H].reshape(Bt, S, H)
        eh_out = hg[:, H:2 * H].reshape(Bt, S, H)
        h_r = hg[:, 2 * H:3 * H]
        h_i = hg[:, 3 * H:4 * H]
        h_n = hg[:, 4 * H:5 * H]

        # Per-example graph propagation: batched A @ x on the MXU.
        inp_in = jnp.einsum("bij,bjh->bih", A_in, eh_in,
                            preferred_element_type=jnp.float32).reshape(M, H)
        inp_out = jnp.einsum("bij,bjh->bih", A_out, eh_out,
                             preferred_element_type=jnp.float32).reshape(M, H)

        # gi = cat([input_in, input_out]) @ w_ih.T + b_ih  (concat eliminated)
        gi = (jnp.dot(inp_in, W_iin, preferred_element_type=jnp.float32)
              + jnp.dot(inp_out, W_iout, preferred_element_type=jnp.float32)
              + b_gi)
        i_r = gi[:, 0:H]
        i_i = gi[:, H:2 * H]
        i_n = gi[:, 2 * H:3 * H]

        resetgate = jax.nn.sigmoid(i_r + o_r + h_r)
        inputgate = jax.nn.sigmoid(i_i + o_i + h_i)
        newgate = jnp.tanh(i_n + o_n + resetgate * h_n)
        gnn_h = newgate + inputgate * (hidden - newgate)

        # output = cat([gnn_h, o_hidden]) @ w_linear.T + b_linear
        #        = gnn_h @ W_lg + (o_hidden @ W_lin_o + b_linear)   (hoisted)
        hidden = jnp.dot(gnn_h, W_lg, preferred_element_type=jnp.float32) + lin_o

    out_ref[...] = hidden.reshape(Bt, S, H).astype(out_ref.dtype)


# ---------------------------------------------------------------------------
# Wrapper
# ---------------------------------------------------------------------------
def _pick_bt(B, S):
    """Pick Bt so Bt*S ~ 128-256 rows, keeping >=2 grid steps when possible."""
    bt = max(1, 256 // max(S, 1))
    while bt > 1 and -(-B // bt) < 2 and bt * S > 128:
        bt //= 2
    return max(1, min(bt, B))


def session_graph_forward(inputs, A, params, *, step=1):
    """SessionGraph.forward: embedding lookup (glue) + GNN (Pallas kernel)."""
    emb = params["embedding"]
    o_hidden = emb[inputs].astype(jnp.float32)     # (B, S, H) -- glue gather
    B, S, H = o_hidden.shape
    assert A.shape == (B, S, 2 * S)
    A = A.astype(jnp.float32)

    # ---- wrapper-side weight packing (transposes / concats stay out of the
    # kernel; all weights become x @ W with W of shape (in, out)) ------------
    ein_wT = params["ein_w"].T            # (H, H)
    eout_wT = params["eout_w"].T          # (H, H)
    w_hhT = params["w_hh"].T              # (H, 3H)
    w_ohT = params["w_oh"].T              # (H, 3H)
    w_ihT = params["w_ih"].T              # (2H, 3H)
    w_linT = params["w_linear"].T         # (2H, H)

    w_slab = jnp.concatenate([
        ein_wT, eout_wT, w_hhT,           # [0  , 5H )  LHS = hidden
        w_ohT, w_linT[H:, :],             # [5H , 9H )  LHS = o_hidden (hoisted)
        w_ihT[:H, :],                     # [9H , 12H)  LHS = input_in
        w_ihT[H:, :],                     # [12H, 15H)  LHS = input_out
        w_linT[:H, :],                    # [15H, 16H)  LHS = gnn_h
    ], axis=1).astype(jnp.float32)        # (H, 16H)

    # Fold b_iah / b_oah / b_ih into one effective gi bias (exact identity):
    # (x + b_iah) @ Wih_in + (y + b_oah) @ Wih_out + b_ih
    #   = x @ Wih_in + y @ Wih_out + (b_iah @ Wih_in + b_oah @ Wih_out + b_ih)
    b_gi_eff = (params["b_ih"]
                + params["b_iah"] @ w_ihT[:H, :]
                + params["b_oah"] @ w_ihT[H:, :])
    b_slab = jnp.concatenate([
        params["ein_b"], params["eout_b"], params["b_hh"],   # [0 , 5H)
        params["b_oh"], params["b_linear"],                  # [5H, 9H)
        b_gi_eff,                                            # [9H, 12H)
    ]).reshape(1, 12 * H).astype(jnp.float32)

    # ---- batch tiling -------------------------------------------------------
    Bt = _pick_bt(B, S)
    Bpad = -(-B // Bt) * Bt
    if Bpad != B:
        pad = Bpad - B
        A = jnp.pad(A, ((0, pad), (0, 0), (0, 0)))
        o_hidden = jnp.pad(o_hidden, ((0, pad), (0, 0), (0, 0)))
    grid = (Bpad // Bt,)

    grid_spec = pltpu.PrefetchScalarGridSpec(
        num_scalar_prefetch=0,
        grid=grid,
        in_specs=[
            pl.BlockSpec((Bt, S, 2 * S), lambda b: (b, 0, 0)),   # A
            pl.BlockSpec((Bt, S, H), lambda b: (b, 0, 0)),       # o_hidden
            pl.BlockSpec((H, 16 * H), lambda b: (0, 0)),         # weight slab
            pl.BlockSpec((1, 12 * H), lambda b: (0, 0)),         # bias slab
        ],
        out_specs=pl.BlockSpec((Bt, S, H), lambda b: (b, 0, 0)),
    )

    out = pl.pallas_call(
        functools.partial(_gnn_kernel, step=step, Bt=Bt, S=S, H=H),
        out_shape=jax.ShapeDtypeStruct((Bpad, S, H), jnp.float32),
        grid_spec=grid_spec,
        compiler_params=pltpu.CompilerParams(
            dimension_semantics=("parallel",)),
    )(A, o_hidden, w_slab, b_slab)
    return out[:B]


# ---------------------------------------------------------------------------
# Plain-JAX reference (mirrors the PyTorch GNNCell exactly)
# ---------------------------------------------------------------------------
def reference_forward(inputs, A, params, *, step=1):
    emb = params["embedding"]
    o_hidden = emb[inputs].astype(jnp.float32)
    S = A.shape[1]
    H = o_hidden.shape[-1]
    hidden = o_hidden
    for _ in range(step):
        eh_in = hidden @ params["ein_w"].T + params["ein_b"]
        eh_out = hidden @ params["eout_w"].T + params["eout_b"]
        input_in = jnp.einsum("bij,bjh->bih", A[:, :, :S], eh_in) + params["b_iah"]
        input_out = jnp.einsum("bij,bjh->bih", A[:, :, S:2 * S], eh_out) + params["b_oah"]
        inputs_cat = jnp.concatenate([input_in, input_out], axis=2)
        gi = inputs_cat @ params["w_ih"].T + params["b_ih"]
        gh = hidden @ params["w_hh"].T + params["b_hh"]
        go = o_hidden @ params["w_oh"].T + params["b_oh"]
        i_r, i_i, i_n = gi[..., :H], gi[..., H:2 * H], gi[..., 2 * H:]
        h_r, h_i, h_n = gh[..., :H], gh[..., H:2 * H], gh[..., 2 * H:]
        o_r, o_i, o_n = go[..., :H], go[..., H:2 * H], go[..., 2 * H:]
        resetgate = jax.nn.sigmoid(i_r + o_r + h_r)
        inputgate = jax.nn.sigmoid(i_i + o_i + h_i)
        newgate = jnp.tanh(i_n + o_n + resetgate * h_n)
        gnn_h = newgate + inputgate * (hidden - newgate)
        hidden = (jnp.concatenate([gnn_h, o_hidden], axis=2)
                  @ params["w_linear"].T + params["b_linear"])
    return hidden


# ---------------------------------------------------------------------------
# Deterministic parameter init (uniform(-stdv, stdv), stdv = 1/sqrt(H))
# ---------------------------------------------------------------------------
def init_params(key, n_node, hidden_size):
    H = hidden_size
    stdv = 1.0 / math.sqrt(H)
    shapes = {
        "embedding": (n_node, H),
        "w_ih": (3 * H, 2 * H), "w_hh": (3 * H, H), "w_oh": (3 * H, H),
        "b_ih": (3 * H,), "b_hh": (3 * H,), "b_oh": (3 * H,),
        "b_iah": (H,), "b_oah": (H,),
        "ein_w": (H, H), "ein_b": (H,),
        "eout_w": (H, H), "eout_b": (H,),
        "w_linear": (H, 2 * H), "b_linear": (H,),
        # linear_edge_f exists in the module but is unused in forward().
    }
    params = {}
    for name, shp in sorted(shapes.items()):
        key, sub = jax.random.split(key)
        params[name] = jax.random.uniform(
            sub, shp, dtype=jnp.float32, minval=-stdv, maxval=stdv)
    return params


if __name__ == "__main__":
    B, S, H = 32, 8, 32
    n_node = 64
    step = 2

    key = jax.random.PRNGKey(0)
    k_par, k_inp, k_adj = jax.random.split(key, 3)

    params = init_params(k_par, n_node, H)

    inputs = jax.random.randint(k_inp, (B, S), 0, n_node, dtype=jnp.int32)
    # Simple normalized adjacency-like matrix (in | out), values in [0, 1).
    A = jax.random.uniform(k_adj, (B, S, 2 * S), dtype=jnp.float32)

    out = session_graph_forward(inputs, A, params, step=step)
    out = jax.block_until_ready(out)

    ref = reference_forward(inputs, A, params, step=step)
    assert out.shape == (B, S, H)
    assert jnp.allclose(out, ref, rtol=2e-4, atol=2e-4), "mismatch vs reference"

    print("KERNEL_OK")
</pallas_src>

<mosaic_0001>
module attributes {stable_mosaic.version = 11 : i64} {
  func.func @_gnn_kernel(%arg0: i32, %arg1: memref<16x8x16xf32, #tpu.memory_space<vmem>>, %arg2: memref<16x8x32xf32, #tpu.memory_space<vmem>>, %arg3: memref<32x512xf32, #tpu.memory_space<vmem>>, %arg4: memref<1x384xf32, #tpu.memory_space<vmem>>, %arg5: memref<16x8x32xf32, #tpu.memory_space<vmem>>) attributes {dimension_semantics = [#tpu.dimension_semantics<parallel>], iteration_bounds = array<i64: 2>, scalar_prefetch = 0 : i64, scratch_operands = 0 : i64, tpu.core_type = #tpu.core_type<tc>, window_params = [{transform_indices = @transform_0, window_bounds = array<i64: 16, 8, 16>}, {transform_indices = @transform_1, window_bounds = array<i64: 16, 8, 32>}, {pipeline_mode = #tpu.pipeline_mode<synchronous>, transform_indices = @transform_2, window_bounds = array<i64: 32, 512>}, {pipeline_mode = #tpu.pipeline_mode<synchronous>, transform_indices = @transform_3, window_bounds = array<i64: 1, 384>}, {transform_indices = @transform_4, window_bounds = array<i64: 16, 8, 32>}]} {
    %c0 = arith.constant 0 : index
    %c0_0 = arith.constant 0 : index
    %c0_1 = arith.constant 0 : index
    %0 = vector.load %arg1[%c0, %c0_0, %c0_1] : memref<16x8x16xf32, #tpu.memory_space<vmem>>, vector<16x8x16xf32>
    %1 = vector.extract_strided_slice %0 {offsets = [0, 0, 0], sizes = [16, 8, 8], strides = [1, 1, 1]} : vector<16x8x16xf32> to vector<16x8x8xf32>
    %2 = vector.extract_strided_slice %0 {offsets = [0, 0, 8], sizes = [16, 8, 8], strides = [1, 1, 1]} : vector<16x8x16xf32> to vector<16x8x8xf32>
    %c0_2 = arith.constant 0 : index
    %c0_3 = arith.constant 0 : index
    %c0_4 = arith.constant 0 : index
    %3 = vector.load %arg2[%c0_2, %c0_3, %c0_4] : memref<16x8x32xf32, #tpu.memory_space<vmem>>, vector<16x8x32xf32>
    %4 = vector.shape_cast %3 : vector<16x8x32xf32> to vector<128x32xf32>
    %c0_5 = arith.constant 0 : index
    %c0_6 = arith.constant 0 : index
    %5 = vector.load %arg3[%c0_5, %c0_6] : memref<32x512xf32, #tpu.memory_space<vmem>>, vector<32x160xf32>
    %c0_7 = arith.constant 0 : index
    %c160 = arith.constant 160 : index
    %6 = vector.load %arg3[%c0_7, %c160] : memref<32x512xf32, #tpu.memory_space<vmem>>, vector<32x128xf32>
    %c0_8 = arith.constant 0 : index
    %c288 = arith.constant 288 : index
    %7 = vector.load %arg3[%c0_8, %c288] : memref<32x512xf32, #tpu.memory_space<vmem>>, vector<32x96xf32>
    %c0_9 = arith.constant 0 : index
    %c384 = arith.constant 384 : index
    %8 = vector.load %arg3[%c0_9, %c384] : memref<32x512xf32, #tpu.memory_space<vmem>>, vector<32x96xf32>
    %c0_10 = arith.constant 0 : index
    %c480 = arith.constant 480 : index
    %9 = vector.load %arg3[%c0_10, %c480] : memref<32x512xf32, #tpu.memory_space<vmem>>, vector<32x32xf32>
    %c0_11 = arith.constant 0 : index
    %c0_12 = arith.constant 0 : index
    %10 = vector.load %arg4[%c0_11, %c0_12] : memref<1x384xf32, #tpu.memory_space<vmem>>, vector<1x160xf32>
    %c0_13 = arith.constant 0 : index
    %c160_14 = arith.constant 160 : index
    %11 = vector.load %arg4[%c0_13, %c160_14] : memref<1x384xf32, #tpu.memory_space<vmem>>, vector<1x128xf32>
    %c0_15 = arith.constant 0 : index
    %c288_16 = arith.constant 288 : index
    %12 = vector.load %arg4[%c0_15, %c288_16] : memref<1x384xf32, #tpu.memory_space<vmem>>, vector<1x96xf32>
    %cst = arith.constant dense<0.000000e+00> : vector<128x128xf32>
    %13 = tpu.matmul %4, %6, %cst {dimension_numbers = #tpu.dot_dimension_numbers<[1], [0], [0], [1], [0, 0, 1, 1], [], []>} : vector<128x32xf32>, vector<32x128xf32>, vector<128x128xf32> -> vector<128x128xf32>
    %14 = vector.broadcast %11 : vector<1x128xf32> to vector<128x128xf32>
    %15 = arith.addf %13, %14 : vector<128x128xf32>
    %16 = vector.extract_strided_slice %15 {offsets = [0, 0], sizes = [128, 32], strides = [1, 1]} : vector<128x128xf32> to vector<128x32xf32>
    %17 = vector.extract_strided_slice %15 {offsets = [0, 32], sizes = [128, 32], strides = [1, 1]} : vector<128x128xf32> to vector<128x32xf32>
    %18 = vector.extract_strided_slice %15 {offsets = [0, 64], sizes = [128, 32], strides = [1, 1]} : vector<128x128xf32> to vector<128x32xf32>
    %19 = vector.extract_strided_slice %15 {offsets = [0, 96], sizes = [128, 32], strides = [1, 1]} : vector<128x128xf32> to vector<128x32xf32>
    %cst_17 = arith.constant dense<0.000000e+00> : vector<128x160xf32>
    %20 = tpu.matmul %4, %5, %cst_17 {dimension_numbers = #tpu.dot_dimension_numbers<[1], [0], [0], [1], [0, 0, 1, 1], [], []>} : vector<128x32xf32>, vector<32x160xf32>, vector<128x160xf32> -> vector<128x160xf32>
    %21 = vector.broadcast %10 : vector<1x160xf32> to vector<128x160xf32>
    %22 = arith.addf %20, %21 : vector<128x160xf32>
    %23 = vector.extract_strided_slice %22 {offsets = [0, 0], sizes = [128, 32], strides = [1, 1]} : vector<128x160xf32> to vector<128x32xf32>
    %24 = vector.shape_cast %23 : vector<128x32xf32> to vector<16x8x32xf32>
    %25 = vector.extract_strided_slice %22 {offsets = [0, 32], sizes = [128, 32], strides = [1, 1]} : vector<128x160xf32> to vector<128x32xf32>
    %26 = vector.shape_cast %25 : vector<128x32xf32> to vector<16x8x32xf32>
    %27 = vector.extract_strided_slice %22 {offsets = [0, 64], sizes = [128, 32], strides = [1, 1]} : vector<128x160xf32> to vector<128x32xf32>
    %28 = vector.extract_strided_slice %22 {offsets = [0, 96], sizes = [128, 32], strides = [1, 1]} : vector<128x160xf32> to vector<128x32xf32>
    %29 = vector.extract_strided_slice %22 {offsets = [0, 128], sizes = [128, 32], strides = [1, 1]} : vector<128x160xf32> to vector<128x32xf32>
    "tpu.trace_start"() <{level = 10 : i32, message = "bij,bjh->bih"}> : () -> ()
    %cst_18 = arith.constant dense<0.000000e+00> : vector<16x8x32xf32>
    %30 = tpu.matmul %1, %24, %cst_18 {dimension_numbers = #tpu.dot_dimension_numbers<[2], [1], [1], [2], [0, 0, 0, 1, 1, 2], [0], [0]>} : vector<16x8x8xf32>, vector<16x8x32xf32>, vector<16x8x32xf32> -> vector<16x8x32xf32>
    "tpu.trace_stop"() : () -> ()
    %31 = vector.shape_cast %30 : vector<16x8x32xf32> to vector<128x32xf32>
    "tpu.trace_start"() <{level = 10 : i32, message = "bij,bjh->bih"}> : () -> ()
    %cst_19 = arith.constant dense<0.000000e+00> : vector<16x8x32xf32>
    %32 = tpu.matmul %2, %26, %cst_19 {dimension_numbers = #tpu.dot_dimension_numbers<[2], [1], [1], [2], [0, 0, 0, 1, 1, 2], [0], [0]>} : vector<16x8x8xf32>, vector<16x8x32xf32>, vector<16x8x32xf32> -> vector<16x8x32xf32>
    "tpu.trace_stop"() : () -> ()
    %33 = vector.shape_cast %32 : vector<16x8x32xf32> to vector<128x32xf32>
    %cst_20 = arith.constant dense<0.000000e+00> : vector<128x96xf32>
    %34 = tpu.matmul %31, %7, %cst_20 {dimension_numbers = #tpu.dot_dimension_numbers<[1], [0], [0], [1], [0, 0, 1, 1], [], []>} : vector<128x32xf32>, vector<32x96xf32>, vector<128x96xf32> -> vector<128x96xf32>
    %cst_21 = arith.constant dense<0.000000e+00> : vector<128x96xf32>
    %35 = tpu.matmul %33, %8, %cst_21 {dimension_numbers = #tpu.dot_dimension_numbers<[1], [0], [0], [1], [0, 0, 1, 1], [], []>} : vector<128x32xf32>, vector<32x96xf32>, vector<128x96xf32> -> vector<128x96xf32>
    %36 = arith.addf %34, %35 : vector<128x96xf32>
    %37 = vector.broadcast %12 : vector<1x96xf32> to vector<128x96xf32>
    %38 = arith.addf %36, %37 : vector<128x96xf32>
    %39 = vector.extract_strided_slice %38 {offsets = [0, 0], sizes = [128, 32], strides = [1, 1]} : vector<128x96xf32> to vector<128x32xf32>
    %40 = vector.extract_strided_slice %38 {offsets = [0, 32], sizes = [128, 32], strides = [1, 1]} : vector<128x96xf32> to vector<128x32xf32>
    %41 = vector.extract_strided_slice %38 {offsets = [0, 64], sizes = [128, 32], strides = [1, 1]} : vector<128x96xf32> to vector<128x32xf32>
    %42 = arith.addf %39, %16 : vector<128x32xf32>
    %43 = arith.addf %42, %27 : vector<128x32xf32>
    %44 = arith.negf %43 : vector<128x32xf32>
    %45 = math.exp %44 : vector<128x32xf32>
    %cst_22 = arith.constant 1.000000e+00 : f32
    %46 = vector.broadcast %cst_22 : f32 to vector<128x32xf32>
    %47 = arith.addf %46, %45 : vector<128x32xf32>
    %48 = arith.divf %46, %47 : vector<128x32xf32>
    %49 = arith.addf %40, %17 : vector<128x32xf32>
    %50 = arith.addf %49, %28 : vector<128x32xf32>
    %51 = arith.negf %50 : vector<128x32xf32>
    %52 = math.exp %51 : vector<128x32xf32>
    %cst_23 = arith.constant 1.000000e+00 : f32
    %53 = vector.broadcast %cst_23 : f32 to vector<128x32xf32>
    %54 = arith.addf %53, %52 : vector<128x32xf32>
    %55 = arith.divf %53, %54 : vector<128x32xf32>
    %56 = arith.addf %41, %18 : vector<128x32xf32>
    %57 = arith.mulf %48, %29 : vector<128x32xf32>
    %58 = arith.addf %56, %57 : vector<128x32xf32>
    %59 = math.tanh %58 : vector<128x32xf32>
    %60 = arith.subf %4, %59 : vector<128x32xf32>
    %61 = arith.mulf %55, %60 : vector<128x32xf32>
    %62 = arith.addf %59, %61 : vector<128x32xf32>
    %cst_24 = arith.constant dense<0.000000e+00> : vector<128x32xf32>
    %63 = tpu.matmul %62, %9, %cst_24 {dimension_numbers = #tpu.dot_dimension_numbers<[1], [0], [0], [1], [0, 0, 1, 1], [], []>} : vector<128x32xf32>, vector<32x32xf32>, vector<128x32xf32> -> vector<128x32xf32>
    %64 = arith.addf %63, %19 : vector<128x32xf32>
    %cst_25 = arith.constant dense<0.000000e+00> : vector<128x160xf32>
    %65 = tpu.matmul %64, %5, %cst_25 {dimension_numbers = #tpu.dot_dimension_numbers<[1], [0], [0], [1], [0, 0, 1, 1], [], []>} : vector<128x32xf32>, vector<32x160xf32>, vector<128x160xf32> -> vector<128x160xf32>
    %66 = vector.broadcast %10 : vector<1x160xf32> to vector<128x160xf32>
    %67 = arith.addf %65, %66 : vector<128x160xf32>
    %68 = vector.extract_strided_slice %67 {offsets = [0, 0], sizes = [128, 32], strides = [1, 1]} : vector<128x160xf32> to vector<128x32xf32>
    %69 = vector.shape_cast %68 : vector<128x32xf32> to vector<16x8x32xf32>
    %70 = vector.extract_strided_slice %67 {offsets = [0, 32], sizes = [128, 32], strides = [1, 1]} : vector<128x160xf32> to vector<128x32xf32>
    %71 = vector.shape_cast %70 : vector<128x32xf32> to vector<16x8x32xf32>
    %72 = vector.extract_strided_slice %67 {offsets = [0, 64], sizes = [128, 32], strides = [1, 1]} : vector<128x160xf32> to vector<128x32xf32>
    %73 = vector.extract_strided_slice %67 {offsets = [0, 96], sizes = [128, 32], strides = [1, 1]} : vector<128x160xf32> to vector<128x32xf32>
    %74 = vector.extract_strided_slice %67 {offsets = [0, 128], sizes = [128, 32], strides = [1, 1]} : vector<128x160xf32> to vector<128x32xf32>
    "tpu.trace_start"() <{level = 10 : i32, message = "bij,bjh->bih"}> : () -> ()
    %cst_26 = arith.constant dense<0.000000e+00> : vector<16x8x32xf32>
    %75 = tpu.matmul %1, %69, %cst_26 {dimension_numbers = #tpu.dot_dimension_numbers<[2], [1], [1], [2], [0, 0, 0, 1, 1, 2], [0], [0]>} : vector<16x8x8xf32>, vector<16x8x32xf32>, vector<16x8x32xf32> -> vector<16x8x32xf32>
    "tpu.trace_stop"() : () -> ()
    %76 = vector.shape_cast %75 : vector<16x8x32xf32> to vector<128x32xf32>
    "tpu.trace_start"() <{level = 10 : i32, message = "bij,bjh->bih"}> : () -> ()
    %cst_27 = arith.constant dense<0.000000e+00> : vector<16x8x32xf32>
    %77 = tpu.matmul %2, %71, %cst_27 {dimension_numbers = #tpu.dot_dimension_numbers<[2], [1], [1], [2], [0, 0, 0, 1, 1, 2], [0], [0]>} : vector<16x8x8xf32>, vector<16x8x32xf32>, vector<16x8x32xf32> -> vector<16x8x32xf32>
    "tpu.trace_stop"() : () -> ()
    %78 = vector.shape_cast %77 : vector<16x8x32xf32> to vector<128x32xf32>
    %cst_28 = arith.constant dense<0.000000e+00> : vector<128x96xf32>
    %79 = tpu.matmul %76, %7, %cst_28 {dimension_numbers = #tpu.dot_dimension_numbers<[1], [0], [0], [1], [0, 0, 1, 1], [], []>} : vector<128x32xf32>, vector<32x96xf32>, vector<128x96xf32> -> vector<128x96xf32>
    %cst_29 = arith.constant dense<0.000000e+00> : vector<128x96xf32>
    %80 = tpu.matmul %78, %8, %cst_29 {dimension_numbers = #tpu.dot_dimension_numbers<[1], [0], [0], [1], [0, 0, 1, 1], [], []>} : vector<128x32xf32>, vector<32x96xf32>, vector<128x96xf32> -> vector<128x96xf32>
    %81 = arith.addf %79, %80 : vector<128x96xf32>
    %82 = vector.broadcast %12 : vector<1x96xf32> to vector<128x96xf32>
    %83 = arith.addf %81, %82 : vector<128x96xf32>
    %84 = vector.extract_strided_slice %83 {offsets = [0, 0], sizes = [128, 32], strides = [1, 1]} : vector<128x96xf32> to vector<128x32xf32>
    %85 = vector.extract_strided_slice %83 {offsets = [0, 32], sizes = [128, 32], strides = [1, 1]} : vector<128x96xf32> to vector<128x32xf32>
    %86 = vector.extract_strided_slice %83 {offsets = [0, 64], sizes = [128, 32], strides = [1, 1]} : vector<128x96xf32> to vector<128x32xf32>
    %87 = arith.addf %84, %16 : vector<128x32xf32>
    %88 = arith.addf %87, %72 : vector<128x32xf32>
    %89 = arith.negf %88 : vector<128x32xf32>
    %90 = math.exp %89 : vector<128x32xf32>
    %cst_30 = arith.constant 1.000000e+00 : f32
    %91 = vector.broadcast %cst_30 : f32 to vector<128x32xf32>
    %92 = arith.addf %91, %90 : vector<128x32xf32>
    %93 = arith.divf %91, %92 : vector<128x32xf32>
    %94 = arith.addf %85, %17 : vector<128x32xf32>
    %95 = arith.addf %94, %73 : vector<128x32xf32>
    %96 = arith.negf %95 : vector<128x32xf32>
    %97 = math.exp %96 : vector<128x32xf32>
    %cst_31 = arith.constant 1.000000e+00 : f32
    %98 = vector.broadcast %cst_31 : f32 to vector<128x32xf32>
    %99 = arith.addf %98, %97 : vector<128x32xf32>
    %100 = arith.divf %98, %99 : vector<128x32xf32>
    %101 = arith.addf %86, %18 : vector<128x32xf32>
    %102 = arith.mulf %93, %74 : vector<128x32xf32>
    %103 = arith.addf %101, %102 : vector<128x32xf32>
    %104 = math.tanh %103 : vector<128x32xf32>
    %105 = arith.subf %64, %104 : vector<128x32xf32>
    %106 = arith.mulf %100, %105 : vector<128x32xf32>
    %107 = arith.addf %104, %106 : vector<128x32xf32>
    %cst_32 = arith.constant dense<0.000000e+00> : vector<128x32xf32>
    %108 = tpu.matmul %107, %9, %cst_32 {dimension_numbers = #tpu.dot_dimension_numbers<[1], [0], [0], [1], [0, 0, 1, 1], [], []>} : vector<128x32xf32>, vector<32x32xf32>, vector<128x32xf32> -> vector<128x32xf32>
    %109 = arith.addf %108, %19 : vector<128x32xf32>
    %110 = vector.shape_cast %109 : vector<128x32xf32> to vector<16x8x32xf32>
    %c0_33 = arith.constant 0 : index
    %c0_34 = arith.constant 0 : index
    %c0_35 = arith.constant 0 : index
    %111 = vector.load %arg5[%c0_33, %c0_34, %c0_35] : memref<16x8x32xf32, #tpu.memory_space<vmem>>, vector<16x8x32xf32>
    tpu.vector_store %arg5[%c0_33, %c0_34, %c0_35], %110 {strides = array<i32>} : memref<16x8x32xf32, #tpu.memory_space<vmem>>, vector<16x8x32xf32>,
    return
  }
  func.func @transform_0(%arg0: i32) -> (i32, i32, i32) {
    %c0_i32 = arith.constant 0 : i32
    %c0_i32_0 = arith.constant 0 : i32
    %c0_i32_1 = arith.constant 0 : i32
    return %arg0, %c0_i32, %c0_i32_0 : i32, i32, i32
  }
  func.func @transform_1(%arg0: i32) -> (i32, i32, i32) {
    %c0_i32 = arith.constant 0 : i32
    %c0_i32_0 = arith.constant 0 : i32
    %c0_i32_1 = arith.constant 0 : i32
    return %arg0, %c0_i32, %c0_i32_0 : i32, i32, i32
  }
  func.func @transform_2(%arg0: i32) -> (i32, i32) {
    %c0_i32 = arith.constant 0 : i32
    %c0_i32_0 = arith.constant 0 : i32
    %c0_i32_1 = arith.constant 0 : i32
    return %c0_i32, %c0_i32_0 : i32, i32
  }
  func.func @transform_3(%arg0: i32) -> (i32, i32) {
    %c0_i32 = arith.constant 0 : i32
    %c0_i32_0 = arith.constant 0 : i32
    %c0_i32_1 = arith.constant 0 : i32
    return %c0_i32, %c0_i32_0 : i32, i32
  }
  func.func @transform_4(%arg0: i32) -> (i32, i32, i32) {
    %c0_i32 = arith.constant 0 : i32
    %c0_i32_0 = arith.constant 0 : i32
    %c0_i32_1 = arith.constant 0 : i32
    return %arg0, %c0_i32, %c0_i32_0 : i32, i32, i32
  }
}

</mosaic_0001>

<bundles_post_ra>
// kernel: tpu_custom_call.1
= control target key start
LH: loop header
LB: loop body
LE: loop exit
PB: predicated region body
PF: predicated region fallthrough
CT: control target
= control target key end

     0   :  { %9 = vsyncpa [#allocation3], 0  ;;  %s11919_s0 = inlined_call_operand.vmem [shape: f32[32,8,16], index: 0, kind: input, shape index: {}]   ;;  %s11920_s1 = inlined_call_operand.vmem [shape: f32[32,8,32], index: 1, kind: input, shape index: {}]   ;;  %s11921_s2 = inlined_call_operand.vmem [shape: f32[32,512], index: 2, kind: input, shape index: {}]   ;;  %s11922_s3 = inlined_call_operand.vmem [shape: f32[1,384], index: 3, kind: input, shape index: {}]   ;;  %s11923_s4 = inlined_call_operand.hbm [shape: f32[32,8,32], index: 4, kind: output, shape index: {}]  }
   0x1   :  { %11 = vsyncpa [#allocation3 + $0x1], 0  ;;  %s9701_s15 = smov 0   ;;  %s9703_s16 = smov 0  }
   0x2   :  { %s9705_s17 = smov 0   ;;  %s9707_s18 = smov 0  }
   0x3 LB: > { %s9722_s19 = sadd.s32 4294967295, %s9665_s18   ;;  %s8122_s20 = sadd.s32 4294967294, %s9665_s18   ;;  %s9665_s18 = sphi %s9707_s18, %s12107_s18   ;;  %s9661_s17 = sphi %s9705_s17, %s12106_s17   ;;  %s9657_s16 = sphi %s9703_s16, %s12105_s16   ;;  %s9653_s15 = sphi %s9701_s15, %s12104_s15  }
   0x4   : > { %s9726_s21 = sadd.s32 1, %s9665_s18   ;;  %s118_s22 = sadd.s32 1, %s9661_s17 }
   0x5   : > { %s115_s23 = ssub.s32 %s9665_s18, %s9726_s21  ;;  %p128_p0 = scmp.ne.s32.totalorder %s9661_s17, %s9657_s16 }
   0x6   : > { %p116_p1 = scmp.eq.s32.totalorder %s115_s23, 0  ;;  %p129_p2 = scmp.eq.s32.totalorder %s9722_s19, 1 }
   0x7   : > { %p134_p3 = scmp.ne.s32.totalorder %s9657_s16, %s9653_s15  ;;  %p135_p4 = scmp.eq.s32.totalorder %s8122_s20, 1 }
   0x8   : > { %s9737_s24 = scalar_select %p116_p1, %s9661_s17, %s118_s22  }
   0x9   : > { %p9739_p5 = por %p129_p2, %p128_p0  ;;  %p9743_p6 = por %p135_p4, %p134_p3 }
   0xa   : > { %p8125_p7 = scmp.ge.s32.totalorder %s9665_s18, 1  ;;  %p177_p8 = scmp.lt.s32.totalorder %s9665_s18, 3 }
   0xc   : > { %p178_p9 = pnand %p8125_p7, %p177_p8 }
   0xe   : > { %181 = sbr.rel (%p178_p9) target bundleno = 3545 (0xdd9), region = 36 }
  0x15   : > { %v258_v0 = vld [vmem:[%s11921_s2 + $0x48] sm:$0xff]  ;;  %v263_v2 = vld [vmem:[%s11921_s2 + $0x50] sm:$0xff]  ;;  %s8127_s7 = sshll.u32 %s9722_s19, 4  ;;  %s9667_s27 = smov 96   ;;  %vm320_vm0 = vcmask 261120   ;;  %vm305_vm1 = vcmask 785408  }
  0x16   : > { %v260_v1 = vld [vmem:[%s11921_s2 + $0x68] sm:$0xff]  ;;  %v9355_v3 = vpack.i.bf16 %v263_v2, %v258_v0  ;;  %v261_v7 = vld [vmem:[%s11921_s2 + $0x10] sm:$0xff]  ;;  %p209_p10 = scmp.lt.s32.totalorder %s8127_s7, 31  ;;  %s9668_s9 = smov 120   ;;  %v253_v48 = vld [vmem:[%s11921_s2] sm:$0xff]  ;;  %v11924_v56 = vmov 0.0  }
  0x17   : > { %v9759_v4 = vpack.c.bf16 %v260_v1, %v258_v0  ;;  %v254_v5 = vld [vmem:[%s11921_s2 + $0x8] sm:$0xff]  ;;  %v264_v10 = vld [vmem:[%s11921_s2 + $0x70] sm:$0xff]  ;;  %v255_v49 = vld [vmem:[%s11921_s2 + $0x20] sm:$0xff]  ;;  %vm9670_vm2 = vmmov 0   ;;  %vm686_vm3 = vcmask 64512   ;;  %s9672_s29 = smov 32  }
  0x18   : > { %v256_v6 = vld [vmem:[%s11921_s2 + $0x28] sm:$0xff]  ;;  %v9345_v8 = vpack.i.bf16 %v261_v7, %v254_v5  ;;  %v262_v11 = vld [vmem:[%s11921_s2 + $0x30] sm:$0xff]  ;;  %9356 = vrot.lane.b32.xlu1 %v9355_v3, %s9667_s27  ;;  %v9360_v12 = vpack.i.bf16 %v264_v10, %v260_v1  ;;  %s12109_s7 = smov (!%p209_p10, %s8127_s7), 31  ;;  %v9880_v52 = vpack.c.bf16 %v255_v49, %v253_v48  ;;  %v257_v54 = vld [vmem:[%s11921_s2 + $0x40] sm:$0xff]  ;;  %v273_v10 = vlaneseq  ;;  %s8377_s14 = sshll.u32 %s9722_s19, 11 }
  0x19   : > { %11992 = vst [vmem:[#allocation5_spill] sm:$0xff] %v9759_v4  ;;  %v9770_v9 = vpack.c.bf16 %v256_v6, %v254_v5  ;;  %v9350_v13 = vpack.i.bf16 %v262_v11, %v256_v6  ;;  %s8128_s28 = sshll.u32 %s12109_s7, 3  ;;  %v259_v55 = vld [vmem:[%s11921_s2 + $0x60] sm:$0xff]  ;;  %s9671_s7 = smov 64  }
  0x1a   : > { %9346 = vrot.lane.b32.xlu0 %v9345_v8, %s9667_s27  ;;  %s9783_s5 = scalar_lea.vmem %s11920_s1, %s8128_s28  ;;  %s9800_s8 = scalar_lea.vmem %s11919_s0, %s8128_s28  ;;  %11995 = vst [vmem:[#allocation8_spill] sm:$0xff] %v9880_v52  ;;  %v9899_v59 = vpack.c.bf16 %v259_v55, %v257_v54 }
  0x1b   : > { %v9787_v14 = vld [vmem:[%s9783_s5 + $0x40] sm:$0xff]  ;;  %v9808_v17 = vld [vmem:[%s9800_s8 + $0x8] sm:$0xff]  ;;  %v9813_v18 = vld [vmem:[%s9800_s8 + $0x10] sm:$0xff]  ;;  %s11867_s28 = scalar_lea.hbm %s11923_s4, %s8377_s14 }
  0x1c   : > { %9361 = vrot.lane.b32.xlu1 %v9360_v12, %s9667_s27  ;;  %8666 = vmatprep.mubr.msk.f32.mxu1 %vm320_vm0, %v9787_v14  ;;  %v9793_v15 = vld [vmem:[%s9783_s5] sm:$0xff]  ;;  %v9818_v19 = vld [vmem:[%s9800_s8 + $0x18] sm:$0xff]  ;;  %v9828_v21 = vld [vmem:[%s9800_s8 + $0x28] sm:$0xff]  ;;  %11996 = vst [vmem:[#allocation9_spill] sm:$0xff] %v9899_v59  ;;  %v9972_v12 = vshrl.u32 %v273_v10, 7 }
  0x1d   : > { %8654 = vmatprep.mubr.msk.f32.mxu0 %vm320_vm0, %v9793_v15  ;;  %v9803_v16 = vld [vmem:[%s9800_s8] sm:$0xff]  ;;  %v9833_v22 = vld [vmem:[%s9800_s8 + $0x30] sm:$0xff]  ;;  %v9838_v23 = vld [vmem:[%s9800_s8 + $0x38] sm:$0xff] }
  0x1e   : > { %9351 = vrot.lane.b32.xlu0 %v9350_v13, %s9667_s27  ;;  %v9823_v20 = vld [vmem:[%s9800_s8 + $0x20] sm:$0xff]  ;;  %v9848_v27 = vld [vmem:[%s9800_s8 + $0x48] sm:$0xff]  ;;  %v9853_v38 = vld [vmem:[%s9800_s8 + $0x50] sm:$0xff]  ;;  %v279_v13 = vsub.s32 1, %v9972_v12 }
  0x1f   : > { %v9843_v24 = vld [vmem:[%s9800_s8 + $0x40] sm:$0xff]  ;;  %v9866_v47 = vld [vmem:[%s9800_s8 + $0x58] sm:$0xff]  ;;  %v246_v51 = vld [vmem:[%s9783_s5 + $0x48] sm:$0xff] }
  0x20   : > { %1855 = vrot.lane.b32.xlu1 %v9803_v16, %s9668_s9  ;;  %v9877_v50 = vld [vmem:[%s9800_s8 + $0x60] sm:$0xff]  ;;  %v247_v53 = vld [vmem:[%s9783_s5 + $0x50] sm:$0xff]  ;;  %v238_v57 = vld [vmem:[%s9783_s5 + $0x8] sm:$0xff] }
  0x21   : > { %v248_v58 = vld [vmem:[%s9783_s5 + $0x58] sm:$0xff]  ;;  %v239_v60 = vld [vmem:[%s9783_s5 + $0x10] sm:$0xff]  ;;  %v249_v61 = vld [vmem:[%s9783_s5 + $0x60] sm:$0xff] }
  0x22   : > { %v240_v62 = vld [vmem:[%s9783_s5 + $0x18] sm:$0xff]  ;;  %v250_v63 = vld [vmem:[%s9783_s5 + $0x68] sm:$0xff]  ;;  %v241_v0 = vld [vmem:[%s9783_s5 + $0x20] sm:$0xff] }
  0x23   : > { %v251_v1 = vld [vmem:[%s9783_s5 + $0x70] sm:$0xff]  ;;  %v242_v2 = vld [vmem:[%s9783_s5 + $0x28] sm:$0xff]  ;;  %v252_v5 = vld [vmem:[%s9783_s5 + $0x78] sm:$0xff] }
  0x24   : > { %1933 = vrot.lane.b32.xlu1 %v9808_v17, %s9668_s9  ;;  %v243_v3 = vld [vmem:[%s9783_s5 + $0x30] sm:$0xff]  ;;  %v244_v6 = vld [vmem:[%s9783_s5 + $0x38] sm:$0xff]  ;;  %v9960_v7 = vld [vmem:[%s9800_s8 + $0x68] sm:$0xff] }
  0x25   : > { %v9965_v8 = vld [vmem:[%s9800_s8 + $0x70] sm:$0xff]  ;;  %v9970_v11 = vld [vmem:[%s9800_s8 + $0x78] sm:$0xff] }
  0x28   : > { %2011 = vrot.lane.b32.xlu1 %v9813_v18, %s9668_s9 }
  0x2c   : > { %2089 = vrot.lane.b32.xlu1 %v9818_v19, %s9668_s9 }
  0x30   : > { %2167 = vrot.lane.b32.xlu1 %v9823_v20, %s9668_s9 }
  0x34   : > { %2245 = vrot.lane.b32.xlu1 %v9828_v21, %s9668_s9 }
  0x38   : > { %2323 = vrot.lane.b32.xlu1 %v9833_v22, %s9668_s9 }
  0x3c   : > { %2401 = vrot.lane.b32.xlu1 %v9838_v23, %s9668_s9 }
  0x40   : > { %2479 = vrot.lane.b32.xlu1 %v9843_v24, %s9668_s9 }
  0x44   : > { %2557 = vrot.lane.b32.xlu1 %v9848_v27, %s9668_s9 }
  0x48   : > { %2635 = vrot.lane.b32.xlu1 %v9853_v38, %s9668_s9 }
  0x4c   : > { %2713 = vrot.lane.b32.xlu1 %v9866_v47, %s9668_s9 }
  0x50   : > { %2791 = vrot.lane.b32.xlu1 %v9877_v50, %s9668_s9 }
  0x54   : > { %2869 = vrot.lane.b32.xlu1 %v9960_v7, %s9668_s9 }
  0x58   : > { %2947 = vrot.lane.b32.xlu1 %v9965_v8, %s9668_s9 }
  0x5c   : > { %3025 = vrot.lane.b32.xlu1 %v9970_v11, %s9668_s9 }
  0x8a   : > { %v9357_v25 = vpop.permute.xlu1 %9356 }
  0x8b   : > { %v9359_v28 = vunpack.i.h.bf16 %v9357_v25  ;;  %v9358_v29 = vunpack.i.l.bf16 %v9357_v25 }
  0x8c   : > { %v9347_v26 = vpop.permute.xlu0 %9346 }
  0x8d   : > { %v9349_v30 = vunpack.i.h.bf16 %v9347_v26  ;;  %v9348_v31 = vunpack.i.l.bf16 %v9347_v26  ;;  %v308_v39 = vsel %vm305_vm1, %v9358_v29, %v9359_v28 }
  0x8e   : > { %v9362_v32 = vpop.permute.xlu1 %9361 }
  0x8f   : > { %v9364_v33 = vunpack.i.h.bf16 %v9362_v32  ;;  %v9363_v34 = vunpack.i.l.bf16 %v9362_v32  ;;  %v306_v41 = vsel %vm305_vm1, %v9348_v31, %v9349_v30 }
  0x90   : > { %v9352_v35 = vpop.permute.xlu0 %9351 }
  0x91   : > { %v9354_v36 = vunpack.i.h.bf16 %v9352_v35  ;;  %v9353_v37 = vunpack.i.l.bf16 %v9352_v35  ;;  %v9856_v40 = vpack.c.bf16 %v9364_v33, %v9359_v28  ;;  %v309_v42 = vsel %vm305_vm1, %v9363_v34, %v9364_v33 }
  0x92   : > { %v9194_v46 = vpack.c.bf16 %v309_v42, %v308_v39  ;;  %v275_v34 = vsub.s32 0, %v9972_v12 }
  0x93   : > { %11993 = vst [vmem:[#allocation6_spill] sm:$0xff] %v9856_v40  ;;  %v307_v43 = vsel %vm305_vm1, %v9353_v37, %v9354_v36  ;;  %v9861_v44 = vpack.c.bf16 %v9354_v36, %v9349_v30 }
  0x94   : > { %v9190_v45 = vpack.c.bf16 %v307_v43, %v306_v41 }
  0x95   : > { %11994 = vst [vmem:[#allocation7_spill] sm:$0xff] %v9861_v44 }
  0x96   : > { %9191 = vmatprep.subr.bf16.mxu0 %v9190_v45  ;;  %9262 = vmatprep.subr.bf16.mxu1 %v9190_v45 }
  0x97   : > { %9193 = vmatpush3.bf16.msra.mxu0 %v9190_v45  ;;  %9264 = vmatpush3.bf16.msra.mxu1 %v9190_v45 }
  0x98   : > { %9195 = vmatprep.subr.bf16.mxu0 %v9194_v46  ;;  %9263 = vmatprep.subr.bf16.mxu1 %v9194_v46 }
  0x9b   : > { %9197 = vmatpush3.bf16.msra.mxu0 %v9194_v46  ;;  %9265 = vmatpush3.bf16.msra.mxu1 %v9194_v46 }
  0x9c   : > { %9199 = vmatprep.subr.bf16.mxu1 %v9770_v9  ;;  %8678 = vmatprep.subr.mxu0 %v11924_v56 }
  0x9e   : > { %8667 = vmatmul.mubr.msk.f32.vlgmr.msra.gmra.mrb[0].mxu1 %vm320_vm0, %v246_v51  ;;  %8655 = vmatmul.mubr.msk.f32.vlgmr.msra.gmra.mrb[0].mxu0 %vm320_vm0, %v238_v57 }
  0x9f   : > { %8669 = vmatprep.mubr.msk.f32.mxu1 %vm320_vm0, %v247_v53  ;;  %9201 = vmatpush1.bf16.msra.mxu1 %v9880_v52 }
  0xa0   : > { %9203 = vmatprep.subr.bf16.mxu1 %v9759_v4  ;;  %8657 = vmatprep.mubr.msk.f32.mxu0 %vm320_vm0, %v239_v60 }
  0xa2   : > { %8670 = vmatmul.mubr.msk.f32.gmra.mrb[2].mxu1 %vm320_vm0, %v248_v58  ;;  %8658 = vmatmul.mubr.msk.f32.gmra.mrb[2].mxu0 %vm320_vm0, %v240_v62 }
  0xa3   : > { %8672 = vmatprep.mubr.msk.f32.mxu1 %vm320_vm0, %v249_v61  ;;  %9205 = vmatpush1.bf16.msra.mxu1 %v9899_v59 }
  0xa4   : > { %8660 = vmatprep.mubr.msk.f32.mxu0 %vm320_vm0, %v241_v0  ;;  %8723 = vmatprep.subr.mxu1 %v11924_v56 }
  0xa6   : > { %8673 = vmatmul.mubr.msk.f32.gmra.mrb[4].mxu1 %vm320_vm0, %v250_v63  ;;  %8661 = vmatmul.mubr.msk.f32.gmra.mrb[4].mxu0 %vm320_vm0, %v242_v2 }
  0xa7   : > { %8675 = vmatprep.mubr.msk.f32.mxu1 %vm320_vm0, %v251_v1  ;;  %8663 = vmatprep.mubr.msk.f32.mxu0 %vm320_vm0, %v243_v3 }
  0xaa   : > { %8676 = vmatmul.mubr.msk.f32.gmra.mrb[6].mxu1 %vm320_vm0, %v252_v5  ;;  %8664 = vmatmul.mubr.msk.f32.gmra.mrb[6].mxu0 %vm320_vm0, %v244_v6 }
  0xab   : > { %589 = vmatprep.mubr.f32.mxu1 %v11924_v56  ;;  %8680 = vmatprep.mubr.msk.f32.mxu0 %vm9670_vm2, %v11924_v56 }
  0xae   : > { %8147 = vmatmul.mubr.msk.f32.vlgmr.msra.gmra.mrb[8].mxu1 %vm320_vm0, %v9793_v15  ;;  %v269_v15 = vld [vmem:[%s11922_s3] sm:$0x3] }
  0xaf   : > { %595 = vmatprep.mubr.f32.mxu1 %v11924_v56  ;;  %v9986_v26 = vrot.slane %v269_v15, %v279_v13  ;;  %v10012_v37 = vrot.slane %v269_v15, %v275_v34 }
  0xb1   : > { %11997 = vst [vmem:[#allocation10_spill] sm:$0xff] %v10012_v37 }
  0xb2   : > { %8148 = vmatmul.mubr.msk.f32.gmra.mrb[10].mxu1 %vm320_vm0, %v238_v57 }
  0xb3   : > { %601 = vmatprep.mubr.f32.mxu1 %v11924_v56 }
  0xb6   : > { %8149 = vmatmul.mubr.msk.f32.gmra.mrb[12].mxu1 %vm320_vm0, %v239_v60 }
  0xb7   : > { %607 = vmatprep.mubr.f32.mxu1 %v11924_v56 }
  0xba   : > { %8150 = vmatmul.mubr.msk.f32.gmra.mrb[14].mxu1 %vm320_vm0, %v240_v62 }
  0xbb   : > { %613 = vmatprep.mubr.f32.mxu1 %v11924_v56 }
  0xbe   : > { %8151 = vmatmul.mubr.msk.f32.gmra.mrb[16].mxu1 %vm320_vm0, %v241_v0 }
  0xbf   : > { %619 = vmatprep.mubr.f32.mxu1 %v11924_v56 }
  0xc2   : > { %8152 = vmatmul.mubr.msk.f32.gmra.mrb[18].mxu1 %vm320_vm0, %v242_v2 }
  0xc3   : > { %625 = vmatprep.mubr.f32.mxu1 %v11924_v56 }
  0xc6   : > { %8153 = vmatmul.mubr.msk.f32.gmra.mrb[20].mxu1 %vm320_vm0, %v243_v3 }
  0xc7   : > { %631 = vmatprep.mubr.f32.mxu1 %v11924_v56 }
  0xca   : > { %8154 = vmatmul.mubr.msk.f32.gmra.mrb[22].mxu1 %vm320_vm0, %v244_v6 }
  0xcb   : > { %637 = vmatprep.mubr.f32.mxu1 %v11924_v56 }
  0xce   : > { %8155 = vmatmul.mubr.msk.f32.gmra.mrb[24].mxu1 %vm320_vm0, %v9787_v14  ;;  %v9980_v14 = vld [vmem:[%s11922_s3 + $0x1] sm:$0x3] }
  0xcf   : > { %643 = vmatprep.mubr.f32.mxu1 %v11924_v56  ;;  %v280_v25 = vrot.slane %v9980_v14, %v279_v13 }
  0xd1   : > { %316 = vrot.lane.b32.xlu1 %v280_v25, %s9667_s27 }
  0xd2   : > { %8156 = vmatmul.mubr.msk.f32.gmra.mrb[26].mxu1 %vm320_vm0, %v246_v51 }
  0xd3   : > { %649 = vmatprep.mubr.f32.mxu1 %v11924_v56 }
  0xd6   : > { %8157 = vmatmul.mubr.msk.f32.gmra.mrb[28].mxu1 %vm320_vm0, %v247_v53 }
  0xd7   : > { %655 = vmatprep.mubr.f32.mxu1 %v11924_v56 }
  0xda   : > { %8158 = vmatmul.mubr.msk.f32.gmra.mrb[30].mxu1 %vm320_vm0, %v248_v58 }
  0xdb   : > { %661 = vmatprep.mubr.f32.mxu1 %v11924_v56 }
  0xde   : > { %8159 = vmatmul.mubr.msk.f32.gmra.mrb[32].mxu1 %vm320_vm0, %v249_v61 }
  0xdf   : > { %667 = vmatprep.mubr.f32.mxu1 %v11924_v56 }
  0xe2   : > { %8160 = vmatmul.mubr.msk.f32.gmra.mrb[34].mxu1 %vm320_vm0, %v250_v63 }
  0xe3   : > { %673 = vmatprep.mubr.f32.mxu1 %v11924_v56 }
  0xe6   : > { %8161 = vmatmul.mubr.msk.f32.gmra.mrb[36].mxu1 %vm320_vm0, %v251_v1 }
  0xe7   : > { %679 = vmatprep.mubr.f32.mxu1 %v11924_v56 }
  0xea   : > { %8162 = vmatmul.mubr.msk.f32.gmra.mrb[38].mxu1 %vm320_vm0, %v252_v5 }
  0xeb   : > { %8725 = vmatprep.mubr.msk.f32.mxu1 %vm9670_vm2, %v11924_v56 }
 0x171   : > { %v9993_v28 = vpop.f32.mrb[0].mxu1  ;;  %v10204_v12 = vpop.f32.mrb[0].mxu0 }
 0x172   : > { %v9995_v29 = vpop.f32.mrb[1].mxu1 }
 0x175   : > { %v9997_v30 = vpop.f32.mrb[2].mxu1 }
 0x176   : > { %v9999_v31 = vpop.f32.mrb[3].mxu1 }
 0x179   : > { %v10001_v32 = vpop.f32.mrb[4].mxu1 }
 0x17a   : > { %v10003_v33 = vpop.f32.mrb[5].mxu1 }
 0x17d   : > { %v10006_v35 = vpop.f32.mrb[6].mxu1 }
 0x17e   : > { %v10008_v36 = vpop.f32.mrb[7].mxu1 }
 0x181   : > { %v591_v39 = vpop.f32.mrb[8].mxu1 }
 0x182   : > { %v592_v41 = vadd.f32 %v591_v39, %v10012_v37  ;;  %v10015_v42 = vpop.f32.mrb[9].mxu1 }
 0x184   : > { %1858 = vrot.lane.b32.xlu0 %v592_v41, %s9667_s27  ;;  %8679 = vmatpush3.msra.mxu0 %v592_v41 }
 0x185   : > { %3533 = vrot.lane.b32.xlu1 %v592_v41, %s9671_s7  ;;  %v597_v43 = vpop.f32.mrb[10].mxu1  ;;  %8683 = vmatprep.subr.mxu0 %v11924_v56 }
 0x186   : > { %v10021_v45 = vadd.f32 %v597_v43, %v10012_v37  ;;  %v10023_v46 = vpop.f32.mrb[11].mxu1  ;;  %8681 = vmatmul.mubr.msk.f32.vlgmr.msra.gmra.mrb[8].mxu0 %vm686_vm3, %v9803_v16 }
 0x187   : > { %8685 = vmatprep.mubr.msk.f32.mxu0 %vm9670_vm2, %v11924_v56 }
 0x188   : > { %1936 = vrot.lane.b32.xlu0 %v10021_v45, %s9667_s27  ;;  %8684 = vmatpush3.msra.mxu0 %v10021_v45 }
 0x189   : > { %v603_v48 = vpop.f32.mrb[12].mxu1  ;;  %8688 = vmatprep.subr.mxu0 %v11924_v56 }
 0x18a   : > { %v604_v49 = vadd.f32 %v603_v48, %v10012_v37  ;;  %v10034_v51 = vpop.f32.mrb[13].mxu1  ;;  %8686 = vmatmul.mubr.msk.f32.vlgmr.msra.gmra.mrb[10].mxu0 %vm686_vm3, %v9808_v17 }
 0x18b   : > { %8690 = vmatprep.mubr.msk.f32.mxu0 %vm9670_vm2, %v11924_v56 }
 0x18c   : > { %2014 = vrot.lane.b32.xlu0 %v604_v49, %s9667_s27  ;;  %3537 = vrot.lane.b32.xlu1 %v604_v49, %s9671_s7 }
 0x18d   : > { %8689 = vmatpush3.msra.mxu0 %v604_v49  ;;  %v609_v16 = vpop.f32.mrb[14].mxu1 }
 0x18e   : > { %v10043_v53 = vadd.f32 %v609_v16, %v10012_v37  ;;  %v10045_v54 = vpop.f32.mrb[15].mxu1  ;;  %8693 = vmatprep.subr.mxu0 %v11924_v56  ;;  %8691 = vmatmul.mubr.msk.f32.vlgmr.msra.gmra.mrb[12].mxu0 %vm686_vm3, %v9813_v18 }
 0x18f   : > { %8695 = vmatprep.mubr.msk.f32.mxu0 %vm9670_vm2, %v11924_v56 }
 0x190   : > { %2092 = vrot.lane.b32.xlu0 %v10043_v53, %s9667_s27  ;;  %8694 = vmatpush3.msra.mxu0 %v10043_v53 }
 0x191   : > { %v615_v17 = vpop.f32.mrb[16].mxu1  ;;  %8698 = vmatprep.subr.mxu0 %v11924_v56 }
 0x192   : > { %v616_v55 = vadd.f32 %v615_v17, %v10012_v37  ;;  %v10057_v57 = vpop.f32.mrb[17].mxu1  ;;  %8696 = vmatmul.mubr.msk.f32.vlgmr.msra.gmra.mrb[14].mxu0 %vm686_vm3, %v9818_v19 }
 0x193   : > { %8700 = vmatprep.mubr.msk.f32.mxu0 %vm9670_vm2, %v11924_v56 }
 0x194   : > { %2170 = vrot.lane.b32.xlu0 %v616_v55, %s9667_s27  ;;  %3541 = vrot.lane.b32.xlu1 %v616_v55, %s9671_s7 }
 0x195   : > { %8699 = vmatpush3.msra.mxu0 %v616_v55  ;;  %v621_v18 = vpop.f32.mrb[18].mxu1 }
 0x196   : > { %v10066_v58 = vadd.f32 %v621_v18, %v10012_v37  ;;  %v10068_v60 = vpop.f32.mrb[19].mxu1  ;;  %8703 = vmatprep.subr.mxu0 %v11924_v56  ;;  %8701 = vmatmul.mubr.msk.f32.vlgmr.msra.gmra.mrb[16].mxu0 %vm686_vm3, %v9823_v20 }
 0x197   : > { %8705 = vmatprep.mubr.msk.f32.mxu0 %vm9670_vm2, %v11924_v56 }
 0x198   : > { %2248 = vrot.lane.b32.xlu0 %v10066_v58, %s9667_s27  ;;  %8704 = vmatpush3.msra.mxu0 %v10066_v58 }
 0x199   : > { %v627_v19 = vpop.f32.mrb[20].mxu1  ;;  %8708 = vmatprep.subr.mxu0 %v11924_v56 }
 0x19a   : > { %v628_v61 = vadd.f32 %v627_v19, %v10012_v37  ;;  %v10080_v62 = vpop.f32.mrb[21].mxu1  ;;  %8706 = vmatmul.mubr.msk.f32.vlgmr.msra.gmra.mrb[18].mxu0 %vm686_vm3, %v9828_v21 }
 0x19b   : > { %8710 = vmatprep.mubr.msk.f32.mxu0 %vm9670_vm2, %v11924_v56 }
 0x19c   : > { %2326 = vrot.lane.b32.xlu0 %v628_v61, %s9667_s27  ;;  %3545 = vrot.lane.b32.xlu1 %v628_v61, %s9671_s7 }
 0x19d   : > { %8709 = vmatpush3.msra.mxu0 %v628_v61  ;;  %v633_v20 = vpop.f32.mrb[22].mxu1 }
 0x19e   : > { %v10089_v63 = vadd.f32 %v633_v20, %v10012_v37  ;;  %v10091_v0 = vpop.f32.mrb[23].mxu1  ;;  %8713 = vmatprep.subr.mxu0 %v11924_v56  ;;  %8711 = vmatmul.mubr.msk.f32.vlgmr.msra.gmra.mrb[20].mxu0 %vm686_vm3, %v9833_v22 }
 0x19f   : > { %8715 = vmatprep.mubr.msk.f32.mxu0 %vm9670_vm2, %v11924_v56 }
 0x1a0   : > { %2404 = vrot.lane.b32.xlu0 %v10089_v63, %s9667_s27  ;;  %8714 = vmatpush3.msra.mxu0 %v10089_v63 }
 0x1a1   : > { %v639_v21 = vpop.f32.mrb[24].mxu1  ;;  %8718 = vmatprep.subr.mxu0 %v11924_v56 }
 0x1a2   : > { %v640_v1 = vadd.f32 %v639_v21, %v10012_v37  ;;  %v10103_v2 = vpop.f32.mrb[25].mxu1  ;;  %8716 = vmatmul.mubr.msk.f32.vlgmr.msra.gmra.mrb[22].mxu0 %vm686_vm3, %v9838_v23 }
 0x1a3   : > { %8720 = vmatprep.mubr.msk.f32.mxu0 %vm9670_vm2, %v11924_v56 }
 0x1a4   : > { %2482 = vrot.lane.b32.xlu0 %v640_v1, %s9667_s27  ;;  %3549 = vrot.lane.b32.xlu1 %v640_v1, %s9671_s7 }
 0x1a5   : > { %8719 = vmatpush3.msra.mxu0 %v640_v1  ;;  %v645_v22 = vpop.f32.mrb[26].mxu1 }
 0x1a6   : > { %v10112_v3 = vadd.f32 %v645_v22, %v10012_v37  ;;  %v10114_v5 = vpop.f32.mrb[27].mxu1  ;;  %8728 = vmatprep.subr.mxu0 %v11924_v56  ;;  %8721 = vmatmul.mubr.msk.f32.vlgmr.msra.gmra.mrb[24].mxu0 %vm686_vm3, %v9843_v24 }
 0x1a7   : > { %8730 = vmatprep.mubr.msk.f32.mxu0 %vm9670_vm2, %v11924_v56 }
 0x1a8   : > { %8724 = vmatpush3.msra.mxu1 %v10112_v3  ;;  %2560 = vrot.lane.b32.xlu0 %v10112_v3, %s9667_s27 }
 0x1a9   : > { %v651_v23 = vpop.f32.mrb[28].mxu1  ;;  %8733 = vmatprep.subr.mxu1 %v11924_v56  ;;  %8726 = vmatmul.mubr.msk.f32.vlgmr.msra.gmra.mrb[40].mxu1 %vm686_vm3, %v9848_v27 }
 0x1aa   : > { %v652_v6 = vadd.f32 %v651_v23, %v10012_v37  ;;  %v10128_v10 = vpop.f32.mrb[29].mxu1  ;;  %8735 = vmatprep.mubr.msk.f32.mxu1 %vm9670_vm2, %v11924_v56 }
 0x1ac   : > { %2638 = vrot.lane.b32.xlu0 %v652_v6, %s9667_s27  ;;  %3553 = vrot.lane.b32.xlu1 %v652_v6, %s9671_s7 }
 0x1ad   : > { %8729 = vmatpush3.msra.mxu0 %v652_v6  ;;  %v657_v24 = vpop.f32.mrb[30].mxu1 }
 0x1ae   : > { %v658_v13 = vadd.f32 %v657_v24, %v10012_v37  ;;  %v10135_v15 = vpop.f32.mrb[31].mxu1  ;;  %8738 = vmatprep.subr.mxu0 %v11924_v56  ;;  %8731 = vmatmul.mubr.msk.f32.vlgmr.msra.gmra.mrb[26].mxu0 %vm686_vm3, %v9853_v38 }
 0x1af   : > { %8740 = vmatprep.mubr.msk.f32.mxu0 %vm9670_vm2, %v11924_v56 }
 0x1b0   : > { %2716 = vrot.lane.b32.xlu0 %v658_v13, %s9667_s27  ;;  %8734 = vmatpush3.msra.mxu1 %v658_v13 }
 0x1b1   : > { %v663_v27 = vpop.f32.mrb[32].mxu1  ;;  %8743 = vmatprep.subr.mxu1 %v11924_v56  ;;  %8736 = vmatmul.mubr.msk.f32.vlgmr.msra.gmra.mrb[42].mxu1 %vm686_vm3, %v9866_v47 }
 0x1b2   : > { %v664_v25 = vadd.f32 %v663_v27, %v10012_v37  ;;  %v10147_v39 = vpop.f32.mrb[33].mxu1  ;;  %8745 = vmatprep.mubr.msk.f32.mxu1 %vm9670_vm2, %v11924_v56 }
 0x1b4   : > { %2794 = vrot.lane.b32.xlu0 %v664_v25, %s9667_s27  ;;  %3557 = vrot.lane.b32.xlu1 %v664_v25, %s9671_s7 }
 0x1b5   : > { %8739 = vmatpush3.msra.mxu0 %v664_v25  ;;  %v669_v38 = vpop.f32.mrb[34].mxu1 }
 0x1b6   : > { %v670_v41 = vadd.f32 %v669_v38, %v10012_v37  ;;  %v10154_v43 = vpop.f32.mrb[35].mxu1  ;;  %8748 = vmatprep.subr.mxu0 %v11924_v56  ;;  %8741 = vmatmul.mubr.msk.f32.vlgmr.msra.gmra.mrb[28].mxu0 %vm686_vm3, %v9877_v50 }
 0x1b7   : > { %8750 = vmatprep.mubr.msk.f32.mxu0 %vm9670_vm2, %v11924_v56 }
 0x1b8   : > { %2872 = vrot.lane.b32.xlu0 %v670_v41, %s9667_s27  ;;  %8744 = vmatpush3.msra.mxu1 %v670_v41 }
 0x1b9   : > { %v675_v47 = vpop.f32.mrb[36].mxu1  ;;  %8753 = vmatprep.subr.mxu1 %v11924_v56  ;;  %8746 = vmatmul.mubr.msk.f32.vlgmr.msra.gmra.mrb[44].mxu1 %vm686_vm3, %v9960_v7  ;;  %v276_v7 = vrot.slane %v9980_v14, %v275_v34  ;;  %v10206_v14 = vpop.f32.mrb[1].mxu0 }
 0x1ba   : > { %v676_v48 = vadd.f32 %v675_v47, %v10012_v37  ;;  %v10166_v49 = vpop.f32.mrb[37].mxu1  ;;  %8755 = vmatprep.mubr.msk.f32.mxu1 %vm9670_vm2, %v11924_v56  ;;  %v10210_v34 = vpop.f32.mrb[2].mxu0 }
 0x1bc   : > { %2950 = vrot.lane.b32.xlu0 %v676_v48, %s9667_s27  ;;  %3561 = vrot.lane.b32.xlu1 %v676_v48, %s9671_s7 }
 0x1bd   : > { %8749 = vmatpush3.msra.mxu0 %v676_v48  ;;  %v681_v50 = vpop.f32.mrb[38].mxu1 }
 0x1be   : > { %v682_v16 = vadd.f32 %v681_v50, %v10012_v37  ;;  %v10173_v17 = vpop.f32.mrb[39].mxu1  ;;  %8751 = vmatmul.mubr.msk.f32.vlgmr.msra.gmra.mrb[30].mxu0 %vm686_vm3, %v9965_v8  ;;  %8758 = vmatprep.subr.mxu0 %v11924_v56  ;;  %v8227_v8 = vld [vmem:[%s11922_s3 + $0x2] ss:$0 sm:$0xff] }
 0x1bf   : > { %8760 = vmatprep.mubr.msk.f32.mxu0 %vm9670_vm2, %v11924_v56 }
 0x1c0   : > { %3028 = vrot.lane.b32.xlu0 %v682_v16, %s9667_s27  ;;  %8754 = vmatpush3.msra.mxu1 %v682_v16 }
 0x1c1   : > { %8756 = vmatmul.mubr.msk.f32.vlgmr.msra.gmra.mrb[46].mxu1 %vm686_vm3, %v9970_v11  ;;  %8763 = vmatprep.subr.mxu1 %v11924_v56  ;;  %v10202_v11 = vpop.permute.xlu1 %1855 }
 0x1c2   : > { %8765 = vmatprep.mubr.msk.f32.mxu1 %vm9670_vm2, %v11924_v56  ;;  %11998 = vst [vmem:[#allocation11_spill] sm:$0xff] %v10202_v11 }
 0x1c4   : > { %314 = vrot.lane.b32.xlu0 %v276_v7, %s9667_s27 }
 0x1c5   : > { %v10216_v55 = vpop.permute.xlu1 %1933 }
 0x1c6   : > { %11999 = vst [vmem:[#allocation12_spill] sm:$0xff] %v10216_v55 }
 0x1c8   : > { %3498 = vrot.lane.b32.xlu0 %v8227_v8, %s9667_s27 }
 0x1c9   : > { %v10226_v61 = vpop.permute.xlu1 %2011 }
 0x1ca   : > { %12000 = vst [vmem:[#allocation13_spill] sm:$0xff] %v10226_v61 }
 0x1cc   : > { %3535 = vrot.lane.b32.xlu0 %v10021_v45, %s9671_s7  ;;  %v10212_v45 = vpop.f32.mrb[3].mxu0 }
 0x1cd   : > { %v10229_v20 = vpop.permute.xlu1 %2089 }
 0x1ce   : > { %12001 = vst [vmem:[#allocation14_spill] sm:$0xff] %v10229_v20 }
 0x1d0   : > { %3539 = vrot.lane.b32.xlu0 %v10043_v53, %s9671_s7  ;;  %v10214_v53 = vpop.f32.mrb[4].mxu0 }
 0x1d1   : > { %v10218_v18 = vpop.f32.mrb[5].mxu0 }
 0x1d4   : > { %3543 = vrot.lane.b32.xlu0 %v10066_v58, %s9671_s7  ;;  %v10221_v58 = vpop.f32.mrb[6].mxu0 }
 0x1d5   : > { %v10223_v19 = vpop.f32.mrb[7].mxu0 }
 0x1d8   : > { %3547 = vrot.lane.b32.xlu0 %v10089_v63, %s9671_s7  ;;  %v10231_v63 = vpop.permute.xlu1 %2167 }
 0x1d9   : > { %12002 = vst [vmem:[#allocation15_spill] sm:$0xff] %v10231_v63 }
 0x1dc   : > { %3551 = vrot.lane.b32.xlu0 %v10112_v3, %s9671_s7  ;;  %v10233_v1 = vpop.permute.xlu1 %2245 }
 0x1dd   : > { %12003 = vst [vmem:[#allocation16_spill] sm:$0xff] %v10233_v1 }
 0x1e0   : > { %3555 = vrot.lane.b32.xlu0 %v658_v13, %s9671_s7  ;;  %v10243_v3 = vpop.permute.xlu1 %2323 }
 0x1e1   : > { %12004 = vst [vmem:[#allocation17_spill] sm:$0xff] %v10243_v3 }
 0x1e4   : > { %3559 = vrot.lane.b32.xlu0 %v670_v41, %s9671_s7  ;;  %v10252_v24 = vpop.permute.xlu1 %2401 }
 0x1e5   : > { %12005 = vst [vmem:[#allocation18_spill] sm:$0xff] %v10252_v24 }
 0x1e8   : > { %3563 = vrot.lane.b32.xlu0 %v682_v16, %s9671_s7  ;;  %v10262_v27 = vpop.permute.xlu1 %2479 }
 0x1e9   : > { %12006 = vst [vmem:[#allocation19_spill] sm:$0xff] %v10262_v27 }
 0x1ec   : > { %v10271_v41 = vpop.permute.xlu1 %2557 }
 0x1ed   : > { %12007 = vst [vmem:[#allocation20_spill] sm:$0xff] %v10271_v41 }
 0x1f0   : > { %v10281_v48 = vpop.permute.xlu1 %2635 }
 0x1f1   : > { %12008 = vst [vmem:[#allocation21_spill] sm:$0xff] %v10281_v48 }
 0x1f4   : > { %v10290_v7 = vpop.permute.xlu1 %2713 }
 0x1f5   : > { %12009 = vst [vmem:[#allocation22_spill] sm:$0xff] %v10290_v7 }
 0x1f6   : > { %v1859_v21 = vpop.permute.xlu0 %1858 }
 0x1f7   : > { %8759 = vmatpush3.msra.mxu0 %v1859_v21 }
 0x1f8   : > { %8761 = vmatmul.mubr.msk.f32.vlgmr.msra.gmra.mrb[32].mxu0 %vm686_vm3, %v10202_v11  ;;  %8768 = vmatprep.subr.mxu0 %v11924_v56  ;;  %v10300_v21 = vpop.permute.xlu1 %2791 }
 0x1f9   : > { %8770 = vmatprep.mubr.msk.f32.mxu0 %vm9670_vm2, %v11924_v56  ;;  %12010 = vst [vmem:[#allocation23_spill] sm:$0xff] %v10300_v21 }
 0x1fa   : > { %v1937_v22 = vpop.permute.xlu0 %1936 }
 0x1fb   : > { %8764 = vmatpush3.msra.mxu1 %v1937_v22 }
 0x1fc   : > { %8766 = vmatmul.mubr.msk.f32.vlgmr.msra.gmra.mrb[48].mxu1 %vm686_vm3, %v10216_v55  ;;  %8773 = vmatprep.subr.mxu1 %v11924_v56 }
 0x1fd   : > { %8775 = vmatprep.mubr.msk.f32.mxu1 %vm9670_vm2, %v11924_v56 }
 0x1fe   : > { %v2015_v23 = vpop.permute.xlu0 %2014 }
 0x1ff   : > { %8769 = vmatpush3.msra.mxu0 %v2015_v23 }
 0x200   : > { %8771 = vmatmul.mubr.msk.f32.vlgmr.msra.gmra.mrb[34].mxu0 %vm686_vm3, %v10226_v61  ;;  %8778 = vmatprep.subr.mxu0 %v11924_v56 }
 0x201   : > { %8780 = vmatprep.mubr.msk.f32.mxu0 %vm9670_vm2, %v11924_v56 }
 0x202   : > { %v2093_v6 = vpop.permute.xlu0 %2092 }
 0x203   : > { %8774 = vmatpush3.msra.mxu1 %v2093_v6  ;;  %v10309_v6 = vpop.permute.xlu1 %2869 }
 0x204   : > { %8776 = vmatmul.mubr.msk.f32.vlgmr.msra.gmra.mrb[50].mxu1 %vm686_vm3, %v10229_v20  ;;  %8783 = vmatprep.subr.mxu1 %v11924_v56  ;;  %12011 = vst [vmem:[#allocation24_spill] sm:$0xff] %v10309_v6 }
 0x205   : > { %8785 = vmatprep.mubr.msk.f32.mxu1 %vm9670_vm2, %v11924_v56 }
 0x206   : > { %v2171_v13 = vpop.permute.xlu0 %2170 }
 0x207   : > { %8779 = vmatpush3.msra.mxu0 %v2171_v13  ;;  %v265_v13 = vld [vmem:[%s11921_s2 + $0x18] sm:$0xff] }
 0x208   : > { %8781 = vmatmul.mubr.msk.f32.vlgmr.msra.gmra.mrb[36].mxu0 %vm686_vm3, %v10231_v63  ;;  %8788 = vmatprep.subr.mxu0 %v11924_v56 }
 0x209   : > { %8790 = vmatprep.mubr.msk.f32.mxu0 %vm9670_vm2, %v11924_v56 }
 0x20a   : > { %v2249_v25 = vpop.permute.xlu0 %2248 }
 0x20b   : > { %8784 = vmatpush3.msra.mxu1 %v2249_v25  ;;  %v266_v25 = vld [vmem:[%s11921_s2 + $0x38] sm:$0xff] }
 0x20c   : > { %8786 = vmatmul.mubr.msk.f32.vlgmr.msra.gmra.mrb[52].mxu1 %vm686_vm3, %v10233_v1  ;;  %8793 = vmatprep.subr.mxu1 %v11924_v56 }
 0x20d   : > { %8795 = vmatprep.mubr.msk.f32.mxu1 %vm9670_vm2, %v11924_v56 }
 0x20e   : > { %v2327_v38 = vpop.permute.xlu0 %2326 }
 0x20f   : > { %8789 = vmatpush3.msra.mxu0 %v2327_v38 }
 0x210   : > { %8791 = vmatmul.mubr.msk.f32.vlgmr.msra.gmra.mrb[38].mxu0 %vm686_vm3, %v10243_v3  ;;  %8798 = vmatprep.subr.mxu0 %v11924_v56 }
 0x211   : > { %8800 = vmatprep.mubr.msk.f32.mxu0 %vm9670_vm2, %v11924_v56 }
 0x212   : > { %v2405_v47 = vpop.permute.xlu0 %2404 }
 0x213   : > { %8794 = vmatpush3.msra.mxu1 %v2405_v47  ;;  %v267_v47 = vld [vmem:[%s11921_s2 + $0x58] sm:$0xff] }
 0x214   : > { %8796 = vmatmul.mubr.msk.f32.vlgmr.msra.gmra.mrb[54].mxu1 %vm686_vm3, %v10252_v24  ;;  %8803 = vmatprep.subr.mxu1 %v11924_v56 }
 0x215   : > { %8805 = vmatprep.mubr.msk.f32.mxu1 %vm9670_vm2, %v11924_v56 }
 0x216   : > { %v2483_v50 = vpop.permute.xlu0 %2482 }
 0x217   : > { %8799 = vmatpush3.msra.mxu0 %v2483_v50  ;;  %v268_v50 = vld [vmem:[%s11921_s2 + $0x78] sm:$0xff] }
 0x218   : > { %8801 = vmatmul.mubr.msk.f32.vlgmr.msra.gmra.mrb[40].mxu0 %vm686_vm3, %v10262_v27  ;;  %8808 = vmatprep.subr.mxu0 %v11924_v56 }
 0x219   : > { %8810 = vmatprep.mubr.msk.f32.mxu0 %vm9670_vm2, %v11924_v56 }
 0x21a   : > { %v2561_v16 = vpop.permute.xlu0 %2560 }
 0x21b   : > { %8804 = vmatpush3.msra.mxu1 %v2561_v16  ;;  %v10330_v16 = vpack.c.bf16 %v266_v25, %v265_v13 }
 0x21c   : > { %8806 = vmatmul.mubr.msk.f32.vlgmr.msra.gmra.mrb[56].mxu1 %vm686_vm3, %v10271_v41  ;;  %8813 = vmatprep.subr.mxu1 %v11924_v56 }
 0x21d   : > { %8815 = vmatprep.mubr.msk.f32.mxu1 %vm9670_vm2, %v11924_v56  ;;  %12012 = vst [vmem:[#allocation25_spill] sm:$0xff] %v10330_v16 }
 0x21e   : > { %v2639_v8 = vpop.permute.xlu0 %2638 }
 0x21f   : > { %8809 = vmatpush3.msra.mxu0 %v2639_v8  ;;  %v10333_v8 = vpop.permute.xlu1 %2947 }
 0x220   : > { %8811 = vmatmul.mubr.msk.f32.vlgmr.msra.gmra.mrb[42].mxu0 %vm686_vm3, %v10281_v48  ;;  %8818 = vmatprep.subr.mxu0 %v11924_v56  ;;  %12013 = vst [vmem:[#allocation26_spill] sm:$0xff] %v10333_v8 }
 0x221   : > { %8820 = vmatprep.mubr.msk.f32.mxu0 %vm9670_vm2, %v11924_v56 }
 0x222   : > { %v2717_v22 = vpop.permute.xlu0 %2716 }
 0x223   : > { %8814 = vmatpush3.msra.mxu1 %v2717_v22  ;;  %v10344_v25 = vpop.permute.xlu1 %3025 }
 0x224   : > { %8816 = vmatmul.mubr.msk.f32.vlgmr.msra.gmra.mrb[58].mxu1 %vm686_vm3, %v10290_v7  ;;  %8823 = vmatprep.subr.mxu1 %v11924_v56  ;;  %12015 = vst [vmem:[#allocation28_spill] sm:$0xff] %v10344_v25 }
 0x225   : > { %8825 = vmatprep.mubr.msk.f32.mxu1 %vm9670_vm2, %v11924_v56 }
 0x226   : > { %v2795_v23 = vpop.permute.xlu0 %2794 }
 0x227   : > { %8819 = vmatpush3.msra.mxu0 %v2795_v23  ;;  %v10337_v23 = vpack.c.bf16 %v268_v50, %v267_v47 }
 0x228   : > { %8821 = vmatmul.mubr.msk.f32.vlgmr.msra.gmra.mrb[44].mxu0 %vm686_vm3, %v10300_v21  ;;  %8828 = vmatprep.subr.mxu0 %v11924_v56 }
 0x229   : > { %8830 = vmatprep.mubr.msk.f32.mxu0 %vm9670_vm2, %v11924_v56  ;;  %12014 = vst [vmem:[#allocation27_spill] sm:$0xff] %v10337_v23 }
 0x22a   : > { %v2873_v38 = vpop.permute.xlu0 %2872 }
 0x22b   : > { %8824 = vmatpush3.msra.mxu1 %v2873_v38 }
 0x22c   : > { %8826 = vmatmul.mubr.msk.f32.vlgmr.msra.gmra.mrb[60].mxu1 %vm686_vm3, %v10309_v6  ;;  %8833 = vmatprep.subr.mxu1 %v11924_v56 }
 0x22d   : > { %8835 = vmatprep.mubr.msk.f32.mxu1 %vm9670_vm2, %v11924_v56 }
 0x22e   : > { %v2951_v22 = vpop.permute.xlu0 %2950 }
 0x22f   : > { %8829 = vmatpush3.msra.mxu0 %v2951_v22 }
 0x230   : > { %8831 = vmatmul.mubr.msk.f32.vlgmr.msra.gmra.mrb[46].mxu0 %vm686_vm3, %v10333_v8  ;;  %9207 = vmatprep.subr.bf16.mxu0 %v10330_v16 }
 0x231   : > { %9209 = vmatpush3.bf16.msra.mxu0 %v10330_v16 }
 0x232   : > { %v3029_v13 = vpop.permute.xlu0 %3028  ;;  %9211 = vmatprep.subr.bf16.mxu0 %v10337_v23 }
 0x233   : > { %8834 = vmatpush3.msra.mxu1 %v3029_v13 }
 0x234   : > { %8836 = vmatmul.mubr.msk.f32.vlgmr.msra.gmra.mrb[62].mxu1 %vm686_vm3, %v10344_v25 }
 0x235   : > { %9213 = vmatpush3.bf16.msra.mxu0 %v10337_v23 }
 0x236   : > { %9215 = vmatprep.subr.bf16.mxu0 %v9861_v44 }
 0x259   : > { %v10350_v38 = vpop.f32.mrb[8].mxu0 }
 0x25a   : > { %v8682_v47 = vpop.f32.mrb[9].mxu0 }
 0x25d   : > { %v10352_v50 = vpop.f32.mrb[10].mxu0 }
 0x25e   : > { %v8687_v22 = vpop.f32.mrb[11].mxu0 }
 0x261   : > { %v10354_v56 = vpop.f32.mrb[12].mxu0 }
 0x262   : > { %v8692_v16 = vpop.f32.mrb[13].mxu0 }
 0x265   : > { %v10356_v8 = vpop.f32.mrb[14].mxu0 }
 0x266   : > { %v8697_v6 = vpop.f32.mrb[15].mxu0 }
 0x269   : > { %v10358_v13 = vpop.f32.mrb[16].mxu0 }
 0x26a   : > { %v8702_v21 = vpop.f32.mrb[17].mxu0 }
 0x26d   : > { %v10360_v25 = vpop.f32.mrb[18].mxu0 }
 0x26e   : > { %v8707_v23 = vpop.f32.mrb[19].mxu0 }
 0x271   : > { %v10362_v7 = vpop.f32.mrb[20].mxu0 }
 0x272   : > { %v8712_v48 = vpop.f32.mrb[21].mxu0 }
 0x275   : > { %v10364_v41 = vpop.f32.mrb[22].mxu0 }
 0x276   : > { %v8717_v47 = vpop.f32.mrb[23].mxu0 }
 0x279   : > { %v10366_v27 = vpop.f32.mrb[24].mxu0 }
 0x27a   : > { %v8722_v22 = vpop.f32.mrb[25].mxu0 }
 0x27c   : > { %v10368_v24 = vpop.f32.mrb[40].mxu1 }
 0x27d   : > { %v8727_v16 = vpop.f32.mrb[41].mxu1 }
 0x281   : > { %v10370_v3 = vpop.f32.mrb[26].mxu0 }
 0x282   : > { %v8732_v6 = vpop.f32.mrb[27].mxu0 }
 0x284   : > { %v10372_v1 = vpop.f32.mrb[42].mxu1 }
 0x285   : > { %v8737_v21 = vpop.f32.mrb[43].mxu1 }
 0x289   : > { %v10374_v63 = vpop.f32.mrb[28].mxu0 }
 0x28a   : > { %v8742_v23 = vpop.f32.mrb[29].mxu0 }
 0x28c   : > { %v10376_v20 = vpop.f32.mrb[44].mxu1 }
 0x28d   : > { %v8747_v48 = vpop.f32.mrb[45].mxu1 }
 0x28e   : > { %v12016_v48 = vmov 0.0  }
 0x291   : > { %v10378_v61 = vpop.f32.mrb[30].mxu0 }
 0x292   : > { %v8752_v47 = vpop.f32.mrb[31].mxu0 }
 0x294   : > { %v10380_v55 = vpop.f32.mrb[46].mxu1 }
 0x295   : > { %v8757_v22 = vpop.f32.mrb[47].mxu1 }
 0x2cb   : > { %v1929_v11 = vpop.f32.mrb[32].mxu0 }
 0x2cc   : > { %v8762_v16 = vpop.f32.mrb[33].mxu0  ;;  %8846 = vmatprep.mubr.msk.f32.mxu0 %vm320_vm0, %v1929_v11 }
 0x2cf   : > { %v2007_v6 = vpop.f32.mrb[48].mxu1 }
 0x2d0   : > { %v8767_v37 = vpop.f32.mrb[49].mxu1  ;;  %8847 = vmatmul.mubr.msk.f32.vlgmr.msra.gmra.mrb[48].mxu0 %vm320_vm0, %v2007_v6 }
 0x2d1   : > { %9217 = vmatpush3.bf16.msra.mxu0 %v9861_v44 }
 0x2d2   : > { %9219 = vmatprep.subr.bf16.mxu0 %v9856_v40 }
 0x2d3   : > { %v2085_v21 = vpop.f32.mrb[34].mxu0 }
 0x2d4   : > { %v8772_v23 = vpop.f32.mrb[35].mxu0  ;;  %8849 = vmatprep.mubr.msk.f32.mxu0 %vm320_vm0, %v2085_v21 }
 0x2d5   : > { %9221 = vmatpush3.bf16.msra.mxu0 %v9856_v40 }
 0x2d6   : > { %8934 = vmatprep.subr.mxu0 %v12016_v48 }
 0x2d7   : > { %v2163_v47 = vpop.f32.mrb[50].mxu1 }
 0x2d8   : > { %v8777_v22 = vpop.f32.mrb[51].mxu1  ;;  %8850 = vmatmul.mubr.msk.f32.gmra.mrb[50].mxu0 %vm320_vm0, %v2163_v47 }
 0x2db   : > { %v2241_v11 = vpop.f32.mrb[36].mxu0 }
 0x2dc   : > { %v8782_v37 = vpop.f32.mrb[37].mxu0  ;;  %8852 = vmatprep.mubr.msk.f32.mxu0 %vm320_vm0, %v2241_v11 }
 0x2df   : > { %v2319_v16 = vpop.f32.mrb[52].mxu1 }
 0x2e0   : > { %v8787_v6 = vpop.f32.mrb[53].mxu1  ;;  %8853 = vmatmul.mubr.msk.f32.gmra.mrb[52].mxu0 %vm320_vm0, %v2319_v16 }
 0x2e3   : > { %v2397_v44 = vpop.f32.mrb[38].mxu0 }
 0x2e4   : > { %v8792_v23 = vpop.f32.mrb[39].mxu0  ;;  %8855 = vmatprep.mubr.msk.f32.mxu0 %vm320_vm0, %v2397_v44 }
 0x2e7   : > { %v2475_v21 = vpop.f32.mrb[54].mxu1 }
 0x2e8   : > { %v8797_v40 = vpop.f32.mrb[55].mxu1  ;;  %8856 = vmatmul.mubr.msk.f32.gmra.mrb[54].mxu0 %vm320_vm0, %v2475_v21 }
 0x2eb   : > { %v2553_v59 = vpop.f32.mrb[40].mxu0 }
 0x2ec   : > { %v8802_v22 = vpop.f32.mrb[41].mxu0  ;;  %8858 = vmatprep.mubr.msk.f32.mxu0 %vm320_vm0, %v2553_v59 }
 0x2ef   : > { %v2631_v47 = vpop.f32.mrb[56].mxu1 }
 0x2f0   : > { %v8807_v37 = vpop.f32.mrb[57].mxu1  ;;  %8859 = vmatmul.mubr.msk.f32.gmra.mrb[56].mxu0 %vm320_vm0, %v2631_v47 }
 0x2f3   : > { %v2709_v11 = vpop.f32.mrb[42].mxu0 }
 0x2f4   : > { %v8812_v6 = vpop.f32.mrb[43].mxu0  ;;  %8861 = vmatprep.mubr.msk.f32.mxu0 %vm320_vm0, %v2709_v11 }
 0x2f7   : > { %v2787_v16 = vpop.f32.mrb[58].mxu1 }
 0x2f8   : > { %v8817_v23 = vpop.f32.mrb[59].mxu1  ;;  %8862 = vmatmul.mubr.msk.f32.gmra.mrb[58].mxu0 %vm320_vm0, %v2787_v16 }
 0x2fb   : > { %v2865_v44 = vpop.f32.mrb[44].mxu0 }
 0x2fc   : > { %v8822_v40 = vpop.f32.mrb[45].mxu0  ;;  %8864 = vmatprep.mubr.msk.f32.mxu0 %vm320_vm0, %v2865_v44 }
 0x2ff   : > { %v2943_v21 = vpop.f32.mrb[60].mxu1 }
 0x300   : > { %v8827_v22 = vpop.f32.mrb[61].mxu1  ;;  %8865 = vmatmul.mubr.msk.f32.gmra.mrb[60].mxu0 %vm320_vm0, %v2943_v21 }
 0x303   : > { %v3021_v59 = vpop.f32.mrb[46].mxu0 }
 0x304   : > { %v8832_v37 = vpop.f32.mrb[47].mxu0  ;;  %8867 = vmatprep.mubr.msk.f32.mxu0 %vm320_vm0, %v3021_v59 }
 0x307   : > { %v3099_v47 = vpop.f32.mrb[62].mxu1 }
 0x308   : > { %v8837_v6 = vpop.f32.mrb[63].mxu1  ;;  %8868 = vmatmul.mubr.msk.f32.gmra.mrb[62].mxu0 %vm320_vm0, %v3099_v47 }
 0x309   : > { %8878 = vmatprep.mubr.msk.f32.mxu0 %vm320_vm0, %v10350_v38 }
 0x30c   : > { %8879 = vmatmul.mubr.msk.f32.vlgmr.msra.gmra.mrb[48].mxu0 %vm320_vm0, %v10352_v50 }
 0x30d   : > { %8881 = vmatprep.mubr.msk.f32.mxu0 %vm320_vm0, %v10354_v56  ;;  %v315_v56 = vpop.permute.xlu0 %314 }
 0x310   : > { %8882 = vmatmul.mubr.msk.f32.gmra.mrb[50].mxu0 %vm320_vm0, %v10356_v8 }
 0x311   : > { %8884 = vmatprep.mubr.msk.f32.mxu0 %vm320_vm0, %v10358_v13 }
 0x314   : > { %8885 = vmatmul.mubr.msk.f32.gmra.mrb[52].mxu0 %vm320_vm0, %v10360_v25 }
 0x315   : > { %8887 = vmatprep.mubr.msk.f32.mxu0 %vm320_vm0, %v10362_v7 }
 0x318   : > { %8888 = vmatmul.mubr.msk.f32.gmra.mrb[54].mxu0 %vm320_vm0, %v10364_v41 }
 0x319   : > { %8890 = vmatprep.mubr.msk.f32.mxu0 %vm320_vm0, %v10366_v27  ;;  %v317_v27 = vpop.permute.xlu1 %316 }
 0x31c   : > { %8891 = vmatmul.mubr.msk.f32.gmra.mrb[56].mxu0 %vm320_vm0, %v10368_v24 }
 0x31d   : > { %8893 = vmatprep.mubr.msk.f32.mxu0 %vm320_vm0, %v10370_v3  ;;  %v10436_v3 = vpop.permute.xlu0 %3498  ;;  %v3534_v11 = vpop.permute.xlu1 %3533 }
 0x31e   : > { %12017 = vst [vmem:[#allocation29_spill] sm:$0xff] %v10436_v3 }
 0x320   : > { %8894 = vmatmul.mubr.msk.f32.gmra.mrb[58].mxu0 %vm320_vm0, %v10372_v1 }
 0x321   : > { %8896 = vmatprep.mubr.msk.f32.mxu0 %vm320_vm0, %v10374_v63  ;;  %v3536_v24 = vpop.permute.xlu0 %3535  ;;  %v10439_v63 = vsel %vm305_vm1, %v315_v56, %v317_v27  ;;  %v3538_v56 = vpop.permute.xlu1 %3537 }
 0x322   : > { %v10448_v8 = vadd.f32 %v10206_v14, %v10439_v63  ;;  %v10465_v44 = vadd.f32 %v10212_v45, %v10439_v63 }
 0x324   : > { %8897 = vmatmul.mubr.msk.f32.gmra.mrb[60].mxu0 %vm320_vm0, %v10376_v20  ;;  %v10443_v20 = vadd.f32 %v10204_v12, %v10439_v63  ;;  %v10459_v12 = vadd.f32 %v10210_v34, %v10439_v63 }
 0x325   : > { %8899 = vmatprep.mubr.msk.f32.mxu0 %vm320_vm0, %v10378_v61  ;;  %v3540_v1 = vpop.permute.xlu0 %3539 }
 0x328   : > { %8900 = vmatmul.mubr.msk.f32.gmra.mrb[62].mxu0 %vm320_vm0, %v10380_v55 }
 0x329   : > { %8936 = vmatprep.mubr.msk.f32.mxu0 %vm9670_vm2, %v12016_v48  ;;  %v3544_v7 = vpop.permute.xlu0 %3543 }
 0x32d   : > { %v3548_v37 = vpop.permute.xlu0 %3547 }
 0x3df   : > { %v8880_v41 = vpop.f32.mrb[48].mxu0 }
 0x3e0   : > { %v3502_v61 = vadd.f32 %v8880_v41, %v10436_v3  ;;  %v3414_v55 = vpop.f32.mrb[49].mxu0 }
 0x3e1   : > { %v3501_v25 = vadd.f32 %v10436_v3, %v3414_v55 }
 0x3e2   : > { %v10452_v38 = vadd.f32 %v3502_v61, %v10443_v20  ;;  %v10483_v61 = vadd.f32 %v10218_v18, %v10439_v63 }
 0x3e3   : > { %v10455_v50 = vadd.f32 %v3501_v25, %v10448_v8  ;;  %v8883_v13 = vpop.f32.mrb[50].mxu0 }
 0x3e4   : > { %v3582_v16 = vadd.f32 %v3536_v24, %v10452_v38  ;;  %v3504_v23 = vadd.f32 %v8883_v13, %v10436_v3  ;;  %v3424_v14 = vpop.f32.mrb[51].mxu0  ;;  %v10477_v24 = vadd.f32 %v10214_v53, %v10439_v63 }
 0x3e5   : > { %v3581_v40 = vadd.f32 %v3534_v11, %v10455_v50  ;;  %v3503_v21 = vadd.f32 %v10436_v3, %v3424_v14  ;;  %v10495_v14 = vadd.f32 %v10221_v58, %v10439_v63 }
 0x3e6   : > { %v8229_v22 = vmul.f32 -1.442695, %v3582_v16  ;;  %v10470_v59 = vadd.f32 %v3504_v23, %v10459_v12  ;;  %v3542_v23 = vpop.permute.xlu1 %3541 }
 0x3e7   : > { %v8228_v34 = vmul.f32 -1.442695, %v3581_v40  ;;  %v10473_v47 = vadd.f32 %v3503_v21, %v10465_v44  ;;  %v8886_v6 = vpop.f32.mrb[52].mxu0 }
 0x3e8   : > { %9375 = vpow2.f32 %v8229_v22  ;;  %v3584_v45 = vadd.f32 %v3540_v1, %v10470_v59  ;;  %v3506_v27 = vadd.f32 %v8886_v6, %v10436_v3  ;;  %v3434_v41 = vpop.f32.mrb[53].mxu0  ;;  %v3552_v22 = vpop.permute.xlu0 %3551 }
 0x3e9   : > { %9377 = vpow2.f32 %v8228_v34  ;;  %v3583_v55 = vadd.f32 %v3538_v56, %v10473_v47  ;;  %v3505_v25 = vadd.f32 %v10436_v3, %v3434_v41  ;;  %v10501_v34 = vadd.f32 %v10223_v19, %v10439_v63 }
 0x3ea   : > { %v8231_v13 = vmul.f32 -1.442695, %v3584_v45  ;;  %v10488_v11 = vadd.f32 %v3506_v27, %v10477_v24  ;;  %v10514_v19 = vadd.f32 %v9993_v28, %v10439_v63 }
 0x3eb   : > { %v8230_v53 = vmul.f32 -1.442695, %v3583_v55  ;;  %v10491_v16 = vadd.f32 %v3505_v25, %v10483_v61  ;;  %v8889_v1 = vpop.f32.mrb[54].mxu0  ;;  %v3546_v55 = vpop.permute.xlu1 %3545 }
 0x3ec   : > { %9379 = vpow2.f32 %v8231_v13  ;;  %v3586_v18 = vadd.f32 %v3544_v7, %v10488_v11  ;;  %v3508_v40 = vadd.f32 %v8889_v1, %v10436_v3  ;;  %v3444_v21 = vpop.f32.mrb[55].mxu0 }
 0x3ed   : > { %9381 = vpow2.f32 %v8230_v53  ;;  %v3585_v6 = vadd.f32 %v3542_v23, %v10491_v16  ;;  %v3507_v56 = vadd.f32 %v10436_v3, %v3444_v21  ;;  %v10520_v23 = vadd.f32 %v9995_v29, %v10439_v63 }
 0x3ee   : > { %v8233_v45 = vmul.f32 -1.442695, %v3586_v18  ;;  %v10506_v58 = vadd.f32 %v3508_v40, %v10495_v14  ;;  %v10535_v29 = vadd.f32 %v9997_v30, %v10439_v63 }
 0x3ef   : > { %v8232_v27 = vmul.f32 -1.442695, %v3585_v6  ;;  %v10509_v7 = vadd.f32 %v3507_v56, %v10501_v34  ;;  %v8892_v41 = vpop.f32.mrb[56].mxu0  ;;  %v3556_v56 = vpop.permute.xlu0 %3555 }
 0x3f0   : > { %9383 = vpow2.f32 %v8233_v45  ;;  %v3588_v25 = vadd.f32 %v3548_v37, %v10506_v58  ;;  %v3510_v13 = vadd.f32 %v8892_v41, %v10436_v3  ;;  %v3454_v53 = vpop.f32.mrb[57].mxu0  ;;  %v10525_v37 = vadd.f32 %v10015_v42, %v9986_v26  ;;  %12018 = vst [vmem:[#allocation30_spill] sm:$0xff] %v10535_v29 }
 0x3f1   : > { %9385 = vpow2.f32 %v8232_v27  ;;  %v3587_v1 = vadd.f32 %v3546_v55, %v10509_v7  ;;  %v3509_v18 = vadd.f32 %v10436_v3, %v3454_v53  ;;  %v3550_v53 = vpop.permute.xlu1 %3549 }
 0x3f2   : > { %v9376_v40 = vpop.eup %9375  ;;  %v8235_v21 = vmul.f32 -1.442695, %v3588_v25  ;;  %v10528_v28 = vadd.f32 %v3510_v13, %v10514_v19 }
 0x3f3   : > { %v9378_v6 = vpop.eup %9377  ;;  %v3646_v45 = vadd.f32 1.0, %v9376_v40  ;;  %v8234_v27 = vmul.f32 -1.442695, %v3587_v1  ;;  %v10531_v41 = vadd.f32 %v3509_v18, %v10520_v23  ;;  %v8895_v55 = vpop.f32.mrb[58].mxu0  ;;  %v10542_v1 = vadd.f32 %v9999_v31, %v10439_v63 }
 0x3f4   : > { %v3645_v48 = vadd.f32 1.0, %v9378_v6  ;;  %9387 = vpow2.f32 %v8235_v21  ;;  %v3590_v42 = vadd.f32 %v3552_v22, %v10528_v28  ;;  %v3512_v25 = vadd.f32 %v8895_v55, %v10436_v3  ;;  %v3464_v13 = vpop.f32.mrb[59].mxu0 }
 0x3f5   : > { %9389 = vrcp.f32 %v3646_v45  ;;  %v3589_v40 = vadd.f32 %v3550_v53, %v10531_v41  ;;  %12019 = vst [vmem:[#allocation31_spill] sm:$0xff] %v10542_v1  ;;  %v3511_v18 = vadd.f32 %v10436_v3, %v3464_v13  ;;  %v10550_v22 = vadd.f32 %v10001_v32, %v10439_v63  ;;  %v3554_v52 = vpop.permute.xlu1 %3553 }
 0x3f6   : > { %v9380_v30 = vpop.eup %9379  ;;  %9391 = vrcp.f32 %v3645_v48  ;;  %v8237_v4 = vmul.f32 -1.442695, %v3590_v42  ;;  %v10546_v6 = vadd.f32 %v3512_v25, %v10535_v29  ;;  %v3560_v29 = vpop.permute.xlu0 %3559 }
 0x3f7   : > { %v9382_v21 = vpop.eup %9381  ;;  %v3648_v45 = vadd.f32 1.0, %v9380_v30  ;;  %9393 = vpow2.f32 %v8234_v27  ;;  %v8236_v55 = vmul.f32 -1.442695, %v3589_v40  ;;  %v10553_v53 = vadd.f32 %v3511_v18, %v10542_v1  ;;  %v8898_v31 = vpop.f32.mrb[60].mxu0 }
 0x3f8   : > { %v3647_v13 = vadd.f32 1.0, %v9382_v21  ;;  %9395 = vpow2.f32 %v8237_v4  ;;  %v3592_v48 = vadd.f32 %v3556_v56, %v10546_v6  ;;  %v3514_v42 = vadd.f32 %v8898_v31, %v10436_v3  ;;  %v3474_v25 = vpop.f32.mrb[61].mxu0 }
 0x3f9   : > { %9397 = vrcp.f32 %v3648_v45  ;;  %v3591_v32 = vadd.f32 %v3554_v52, %v10553_v53  ;;  %v10560_v27 = vadd.f32 %v10003_v33, %v10439_v63  ;;  %v3513_v40 = vadd.f32 %v10436_v3, %v3474_v25  ;;  %v3558_v1 = vpop.permute.xlu1 %3557 }
 0x3fa   : > { %v9384_v18 = vpop.eup %9383  ;;  %9399 = vrcp.f32 %v3647_v13  ;;  %v8239_v30 = vmul.f32 -1.442695, %v3592_v48  ;;  %v10564_v4 = vadd.f32 %v3514_v42, %v10550_v22  ;;  %v10568_v56 = vadd.f32 %v10006_v35, %v10439_v63 }
 0x3fb   : > { %v9386_v21 = vpop.eup %9385  ;;  %v3650_v45 = vadd.f32 1.0, %v9384_v18  ;;  %9401 = vpow2.f32 %v8236_v55  ;;  %v8238_v52 = vmul.f32 -1.442695, %v3591_v32  ;;  %v10571_v31 = vadd.f32 %v3513_v40, %v10560_v27  ;;  %v8901_v33 = vpop.f32.mrb[62].mxu0 }
 0x3fc   : > { %v3649_v25 = vadd.f32 1.0, %v9386_v21  ;;  %9403 = vpow2.f32 %v8239_v30  ;;  %v3594_v13 = vadd.f32 %v3560_v29, %v10564_v4  ;;  %v3516_v48 = vadd.f32 %v8901_v33, %v10436_v3  ;;  %v3484_v42 = vpop.f32.mrb[63].mxu0 }
 0x3fd   : > { %9405 = vrcp.f32 %v3650_v45  ;;  %v3593_v35 = vadd.f32 %v3558_v1, %v10571_v31  ;;  %v10578_v18 = vadd.f32 %v10008_v36, %v10439_v63  ;;  %v3515_v55 = vadd.f32 %v10436_v3, %v3484_v42  ;;  %v3564_v45 = vpop.permute.xlu0 %3563  ;;  %v3562_v42 = vpop.permute.xlu1 %3561 }
 0x3fe   : > { %v9388_v32 = vpop.eup %9387  ;;  %v600_v40 = vadd.f32 %v10023_v46, %v9986_v26  ;;  %9407 = vrcp.f32 %v3649_v25  ;;  %v8241_v30 = vmul.f32 -1.442695, %v3594_v13  ;;  %v10584_v29 = vadd.f32 %v3516_v48, %v10568_v56 }
 0x3ff   : > { %v10586_v21 = vpop.eup %9389  ;;  %v3652_v33 = vadd.f32 1.0, %v9388_v32  ;;  %9409 = vpow2.f32 %v8238_v52  ;;  %v8240_v1 = vmul.f32 -1.442695, %v3593_v35  ;;  %v10589_v36 = vadd.f32 %v3515_v55, %v10578_v18 }
 0x400   : > { %v10591_v63 = vpop.eup %9391  ;;  %9411 = vpow2.f32 %v8241_v30  ;;  %v3596_v46 = vadd.f32 %v3564_v45, %v10584_v29  ;;  %v3694_v25 = vmul.f32 %v10586_v21, %v600_v40  ;;  %v612_v35 = vadd.f32 %v10045_v54, %v9986_v26 }
 0x401   : > { %v9394_v13 = vpop.eup %9393  ;;  %9413 = vrcp.f32 %v3652_v33  ;;  %v3595_v48 = vadd.f32 %v3562_v42, %v10589_v36  ;;  %v3693_v32 = vmul.f32 %v10591_v63, %v10525_v37  ;;  %v606_v40 = vadd.f32 %v10034_v51, %v9986_v26 }
 0x402   : > { %v9396_v52 = vpop.eup %9395  ;;  %v3651_v55 = vadd.f32 1.0, %v9394_v13  ;;  %9415 = vpow2.f32 %v8240_v1  ;;  %v8243_v3 = vmul.f32 -1.442695, %v3596_v46  ;;  %3727 = vrot.lane.b32.xlu0 %v3694_v25, %s9671_s7  ;;  %v624_v25 = vadd.f32 %v10068_v60, %v9986_v26 }
 0x403   : > { %v10601_v30 = vpop.eup %9397  ;;  %v3654_v45 = vadd.f32 1.0, %v9396_v52  ;;  %v8242_v33 = vmul.f32 -1.442695, %v3595_v48  ;;  %3725 = vrot.lane.b32.xlu1 %v3693_v32, %s9671_s7  ;;  %v618_v48 = vadd.f32 %v10057_v57, %v9986_v26 }
 0x404   : > { %v10606_v42 = vpop.eup %9399  ;;  %9417 = vrcp.f32 %v3651_v55  ;;  %v3696_v37 = vmul.f32 %v10601_v30, %v612_v35 }
 0x405   : > { %v9402_v54 = vpop.eup %9401  ;;  %9419 = vrcp.f32 %v3654_v45  ;;  %v3695_v1 = vmul.f32 %v10606_v42, %v606_v40  ;;  %v636_v40 = vadd.f32 %v10091_v0, %v9986_v26  ;;  %v648_v0 = vadd.f32 %v10114_v5, %v9986_v26 }
 0x406   : > { %v9404_v46 = vpop.eup %9403  ;;  %v3653_v13 = vadd.f32 1.0, %v9402_v54  ;;  %9421 = vpow2.f32 %v8243_v3  ;;  %3731 = vrot.lane.b32.xlu0 %v3696_v37, %s9671_s7  ;;  %v660_v5 = vadd.f32 %v10135_v15, %v9986_v26  ;;  %v672_v15 = vadd.f32 %v10154_v43, %v9986_v26 }
 0x407   : > { %v10613_v51 = vpop.eup %9405  ;;  %v3656_v32 = vadd.f32 1.0, %v9404_v46  ;;  %9423 = vpow2.f32 %v8242_v33  ;;  %3729 = vrot.lane.b32.xlu1 %v3695_v1, %s9671_s7  ;;  %v630_v1 = vadd.f32 %v10080_v62, %v9986_v26  ;;  %v642_v62 = vadd.f32 %v10103_v2, %v9986_v26 }
 0x408   : > { %v10618_v52 = vpop.eup %9407  ;;  %9425 = vrcp.f32 %v3653_v13  ;;  %v3698_v35 = vmul.f32 %v10613_v51, %v624_v25  ;;  %v654_v2 = vadd.f32 %v10128_v10, %v9986_v26  ;;  %v684_v43 = vadd.f32 %v10173_v17, %v9986_v26 }
 0x409   : > { %v9410_v55 = vpop.eup %9409  ;;  %9427 = vrcp.f32 %v3656_v32  ;;  %v3697_v60 = vmul.f32 %v10618_v52, %v618_v48 }
 0x40a   : > { %v9412_v3 = vpop.eup %9411  ;;  %v3655_v45 = vadd.f32 1.0, %v9410_v55  ;;  %3735 = vrot.lane.b32.xlu0 %v3698_v35, %s9671_s7 }
 0x40b   : > { %v10625_v57 = vpop.eup %9413  ;;  %v3658_v33 = vadd.f32 1.0, %v9412_v3  ;;  %3733 = vrot.lane.b32.xlu1 %v3697_v60, %s9671_s7 }
 0x40c   : > { %v9416_v37 = vpop.eup %9415  ;;  %9429 = vrcp.f32 %v3655_v45  ;;  %v3700_v54 = vmul.f32 %v10625_v57, %v636_v40 }
 0x40d   : > { %9431 = vrcp.f32 %v3658_v33  ;;  %v3657_v46 = vadd.f32 1.0, %v9416_v37 }
 0x40e   : > { %v10631_v25 = vpop.eup %9417  ;;  %3739 = vrot.lane.b32.xlu0 %v3700_v54, %s9671_s7 }
 0x40f   : > { %v10636_v13 = vpop.eup %9419  ;;  %9433 = vrcp.f32 %v3657_v46  ;;  %v3699_v48 = vmul.f32 %v10631_v25, %v630_v1 }
 0x410   : > { %v9422_v32 = vpop.eup %9421  ;;  %v3702_v35 = vmul.f32 %v10636_v13, %v648_v0  ;;  %v666_v0 = vadd.f32 %v10147_v39, %v9986_v26 }
 0x411   : > { %v9424_v55 = vpop.eup %9423  ;;  %v3660_v60 = vadd.f32 1.0, %v9422_v32  ;;  %3737 = vrot.lane.b32.xlu1 %v3699_v48, %s9671_s7 }
 0x412   : > { %v10643_v3 = vpop.eup %9425  ;;  %v3659_v40 = vadd.f32 1.0, %v9424_v55  ;;  %3743 = vrot.lane.b32.xlu0 %v3702_v35, %s9671_s7  ;;  %v678_v55 = vadd.f32 %v10166_v49, %v9986_v26 }
 0x413   : > { %v10648_v45 = vpop.eup %9427  ;;  %9435 = vrcp.f32 %v3660_v60  ;;  %v3701_v33 = vmul.f32 %v10643_v3, %v642_v62 }
 0x414   : > { %9437 = vrcp.f32 %v3659_v40  ;;  %v3704_v37 = vmul.f32 %v10648_v45, %v660_v5 }
 0x415   : > { %3741 = vrot.lane.b32.xlu1 %v3701_v33, %s9671_s7 }
 0x416   : > { %v10655_v54 = vpop.eup %9429  ;;  %3747 = vrot.lane.b32.xlu0 %v3704_v37, %s9671_s7 }
 0x417   : > { %v10660_v1 = vpop.eup %9431  ;;  %v3703_v46 = vmul.f32 %v10655_v54, %v654_v2 }
 0x418   : > { %v3706_v48 = vmul.f32 %v10660_v1, %v672_v15 }
 0x419   : > { %v10666_v32 = vpop.eup %9433  ;;  %3745 = vrot.lane.b32.xlu1 %v3703_v46, %s9671_s7 }
 0x41a   : > { %3751 = vrot.lane.b32.xlu0 %v3706_v48, %s9671_s7  ;;  %v3705_v10 = vmul.f32 %v10666_v32, %v666_v0 }
 0x41d   : > { %v10673_v35 = vpop.eup %9435  ;;  %3749 = vrot.lane.b32.xlu1 %v3705_v10, %s9671_s7 }
 0x41e   : > { %v10678_v39 = vpop.eup %9437  ;;  %v3708_v62 = vmul.f32 %v10673_v35, %v684_v43 }
 0x41f   : > { %v3707_v60 = vmul.f32 %v10678_v39, %v678_v55 }
 0x420   : > { %3755 = vrot.lane.b32.xlu0 %v3708_v62, %s9671_s7 }
 0x421   : > { %3753 = vrot.lane.b32.xlu1 %v3707_v60, %s9671_s7 }
 0x474   : > { %v3728_v5 = vpop.permute.xlu0 %3727 }
 0x475   : > { %v3774_v17 = vadd.f32 %v3728_v5, %v10452_v38  ;;  %v3726_v40 = vpop.permute.xlu1 %3725 }
 0x476   : > { %v3773_v33 = vadd.f32 %v3726_v40, %v10455_v50 }
 0x477   : > { %9439 = vtanh.f32 %v3774_v17 }
 0x478   : > { %9441 = vtanh.f32 %v3773_v33  ;;  %v3732_v49 = vpop.permute.xlu0 %3731 }
 0x479   : > { %v3776_v37 = vadd.f32 %v3732_v49, %v10470_v59  ;;  %v3730_v2 = vpop.permute.xlu1 %3729 }
 0x47a   : > { %v3775_v15 = vadd.f32 %v3730_v2, %v10473_v47 }
 0x47b   : > { %9443 = vtanh.f32 %v3776_v37 }
 0x47c   : > { %9445 = vtanh.f32 %v3775_v15  ;;  %v3736_v46 = vpop.permute.xlu0 %3735 }
 0x47d   : > { %v3778_v0 = vadd.f32 %v3736_v46, %v10488_v11  ;;  %v3734_v48 = vpop.permute.xlu1 %3733 }
 0x47e   : > { %v3777_v10 = vadd.f32 %v3734_v48, %v10491_v16 }
 0x47f   : > { %9447 = vtanh.f32 %v3778_v0 }
 0x480   : > { %9449 = vtanh.f32 %v3777_v10  ;;  %v3740_v38 = vpop.permute.xlu0 %3739 }
 0x481   : > { %v10690_v50 = vpop.eup %9439  ;;  %v3780_v43 = vadd.f32 %v3740_v38, %v10506_v58 }
 0x482   : > { %v10693_v55 = vpop.eup %9441  ;;  %3823 = vrot.lane.b32.xlu0 %v10690_v50, %s9671_s7 }
 0x483   : > { %9451 = vtanh.f32 %v3780_v43  ;;  %v3738_v59 = vpop.permute.xlu1 %3737  ;;  %3821 = vrot.lane.b32.xlu1 %v10693_v55, %s9671_s7 }
 0x484   : > { %v3779_v47 = vadd.f32 %v3738_v59, %v10509_v7  ;;  %v3744_v11 = vpop.permute.xlu0 %3743 }
 0x485   : > { %v10700_v16 = vpop.eup %9443  ;;  %v3782_v62 = vadd.f32 %v3744_v11, %v10528_v28 }
 0x486   : > { %v10703_v60 = vpop.eup %9445  ;;  %9453 = vtanh.f32 %v3779_v47  ;;  %3827 = vrot.lane.b32.xlu0 %v10700_v16, %s9671_s7 }
 0x487   : > { %9455 = vtanh.f32 %v3782_v62  ;;  %v3742_v58 = vpop.permute.xlu1 %3741  ;;  %3825 = vrot.lane.b32.xlu1 %v10703_v60, %s9671_s7  ;;  %v9567_v62 = vld [vmem:[%s9783_s5 + $0x8] sm:$0xff] }
 0x488   : > { %v3781_v5 = vadd.f32 %v3742_v58, %v10531_v41  ;;  %v3748_v17 = vpop.permute.xlu0 %3747 }
 0x489   : > { %v10710_v7 = vpop.eup %9447  ;;  %v3784_v40 = vadd.f32 %v3748_v17, %v10546_v6  ;;  %v9568_v17 = vld [vmem:[%s9783_s5] sm:$0xff] }
 0x48a   : > { %v10713_v33 = vpop.eup %9449  ;;  %9457 = vtanh.f32 %v3781_v5  ;;  %3831 = vrot.lane.b32.xlu0 %v10710_v7, %s9671_s7 }
 0x48b   : > { %9459 = vtanh.f32 %v3784_v40  ;;  %v3746_v28 = vpop.permute.xlu1 %3745  ;;  %3829 = vrot.lane.b32.xlu1 %v10713_v33, %s9671_s7 }
 0x48c   : > { %v3783_v49 = vadd.f32 %v3746_v28, %v10553_v53  ;;  %v3752_v37 = vpop.permute.xlu0 %3751 }
 0x48d   : > { %v10720_v41 = vpop.eup %9451  ;;  %v3786_v2 = vadd.f32 %v3752_v37, %v10564_v4 }
 0x48e   : > { %9461 = vtanh.f32 %v3783_v49  ;;  %3835 = vrot.lane.b32.xlu0 %v10720_v41, %s9671_s7  ;;  %v9569_v49 = vld [vmem:[%s9783_s5 + $0x18] sm:$0xff] }
 0x48f   : > { %9463 = vtanh.f32 %v3786_v2  ;;  %v3750_v6 = vpop.permute.xlu1 %3749 }
 0x490   : > { %v10725_v15 = vpop.eup %9453  ;;  %v3785_v46 = vadd.f32 %v3750_v6, %v10571_v31  ;;  %v9570_v6 = vld [vmem:[%s9783_s5 + $0x10] sm:$0xff] }
 0x491   : > { %v10728_v0 = vpop.eup %9455  ;;  %3833 = vrot.lane.b32.xlu1 %v10725_v15, %s9671_s7 }
 0x492   : > { %9465 = vtanh.f32 %v3785_v46  ;;  %v3756_v53 = vpop.permute.xlu0 %3755  ;;  %3839 = vrot.lane.b32.xlu0 %v10728_v0, %s9671_s7 }
 0x493   : > { %v3788_v4 = vadd.f32 %v3756_v53, %v10584_v29  ;;  %v3754_v48 = vpop.permute.xlu1 %3753 }
 0x494   : > { %v10735_v10 = vpop.eup %9457  ;;  %v3787_v38 = vadd.f32 %v3754_v48, %v10589_v36 }
 0x495   : > { %v10738_v43 = vpop.eup %9459  ;;  %9467 = vtanh.f32 %v3788_v4  ;;  %3837 = vrot.lane.b32.xlu1 %v10735_v10, %s9671_s7  ;;  %v9571_v4 = vld [vmem:[%s9783_s5 + $0x28] sm:$0xff] }
 0x496   : > { %9469 = vtanh.f32 %v3787_v38  ;;  %3843 = vrot.lane.b32.xlu0 %v10738_v43, %s9671_s7 }
 0x498   : > { %v10744_v31 = vpop.eup %9461 }
 0x499   : > { %v10746_v29 = vpop.eup %9463  ;;  %3841 = vrot.lane.b32.xlu1 %v10744_v31, %s9671_s7 }
 0x49a   : > { %3847 = vrot.lane.b32.xlu0 %v10746_v29, %s9671_s7 }
 0x49c   : > { %v10752_v36 = vpop.eup %9465 }
 0x49d   : > { %3845 = vrot.lane.b32.xlu1 %v10752_v36, %s9671_s7 }
 0x49f   : > { %v10756_v59 = vpop.eup %9467 }
 0x4a0   : > { %v10758_v47 = vpop.eup %9469  ;;  %3851 = vrot.lane.b32.xlu0 %v10756_v59, %s9671_s7 }
 0x4a1   : > { %3849 = vrot.lane.b32.xlu1 %v10758_v47, %s9671_s7 }
 0x4f4   : > { %v3824_v11 = vpop.permute.xlu0 %3823 }
 0x4f5   : > { %v3870_v58 = vsub.f32 %v9567_v62, %v3824_v11  ;;  %v3822_v5 = vpop.permute.xlu1 %3821  ;;  %v9572_v11 = vld [vmem:[%s9783_s5 + $0x20] sm:$0xff] }
 0x4f6   : > { %v3869_v40 = vsub.f32 %v9568_v17, %v3822_v5  ;;  %v9573_v5 = vld [vmem:[%s9783_s5 + $0x38] sm:$0xff] }
 0x4f7   : > { %3903 = vrot.lane.b32.xlu0 %v3870_v58, %s9672_s29 }
 0x4f8   : > { %v3828_v28 = vpop.permute.xlu0 %3827  ;;  %3901 = vrot.lane.b32.xlu1 %v3869_v40, %s9672_s29 }
 0x4f9   : > { %v3872_v37 = vsub.f32 %v9569_v49, %v3828_v28  ;;  %v3826_v2 = vpop.permute.xlu1 %3825  ;;  %v9574_v28 = vld [vmem:[%s9783_s5 + $0x30] sm:$0xff] }
 0x4fa   : > { %v3871_v46 = vsub.f32 %v9570_v6, %v3826_v2  ;;  %v9575_v2 = vld [vmem:[%s9783_s5 + $0x48] sm:$0xff] }
 0x4fb   : > { %3907 = vrot.lane.b32.xlu0 %v3872_v37, %s9672_s29 }
 0x4fc   : > { %v3832_v53 = vpop.permute.xlu0 %3831  ;;  %3905 = vrot.lane.b32.xlu1 %v3871_v46, %s9672_s29 }
 0x4fd   : > { %v3874_v48 = vsub.f32 %v9571_v4, %v3832_v53  ;;  %v3830_v38 = vpop.permute.xlu1 %3829  ;;  %v9576_v53 = vld [vmem:[%s9783_s5 + $0x40] sm:$0xff] }
 0x4fe   : > { %v3873_v62 = vsub.f32 %v9572_v11, %v3830_v38  ;;  %v9577_v38 = vld [vmem:[%s9783_s5 + $0x58] sm:$0xff] }
 0x4ff   : > { %3911 = vrot.lane.b32.xlu0 %v3874_v48, %s9672_s29 }
 0x500   : > { %v3836_v58 = vpop.permute.xlu0 %3835  ;;  %3909 = vrot.lane.b32.xlu1 %v3873_v62, %s9672_s29 }
 0x501   : > { %v3876_v17 = vsub.f32 %v9573_v5, %v3836_v58  ;;  %v9578_v58 = vld [vmem:[%s9783_s5 + $0x50] sm:$0xff] }
 0x503   : > { %v3834_v40 = vpop.permute.xlu1 %3833  ;;  %3915 = vrot.lane.b32.xlu0 %v3876_v17, %s9672_s29 }
 0x504   : > { %v3875_v49 = vsub.f32 %v9574_v28, %v3834_v40  ;;  %v3840_v37 = vpop.permute.xlu0 %3839  ;;  %v9579_v40 = vld [vmem:[%s9783_s5 + $0x68] sm:$0xff] }
 0x505   : > { %v3878_v6 = vsub.f32 %v9575_v2, %v3840_v37  ;;  %v9580_v37 = vld [vmem:[%s9783_s5 + $0x60] sm:$0xff] }
 0x506   : > { %3913 = vrot.lane.b32.xlu1 %v3875_v49, %s9672_s29 }
 0x507   : > { %v3838_v46 = vpop.permute.xlu1 %3837  ;;  %3919 = vrot.lane.b32.xlu0 %v3878_v6, %s9672_s29 }
 0x508   : > { %v3877_v4 = vsub.f32 %v9576_v53, %v3838_v46  ;;  %v3844_v48 = vpop.permute.xlu0 %3843  ;;  %v9581_v46 = vld [vmem:[%s9783_s5 + $0x78] sm:$0xff] }
 0x509   : > { %v3880_v11 = vsub.f32 %v9577_v38, %v3844_v48  ;;  %v9582_v48 = vld [vmem:[%s9783_s5 + $0x70] sm:$0xff]  ;;  %s9673_s5 = smov [#allocation2]  }
 0x50a   : > { %3917 = vrot.lane.b32.xlu1 %v3877_v4, %s9672_s29  ;;  %s9607_s30 = sshll.u32 %s9673_s5, 4  ;;  %s9608_s30 = int_to_ptr.vmem [resolvable:$false] %s9607_s30 }
 0x50b   : > { %v3842_v62 = vpop.permute.xlu1 %3841  ;;  %3923 = vrot.lane.b32.xlu0 %v3880_v11, %s9672_s29  ;;  %s9609_s6 = scalar_lea.vmem %s9608_s30, 4096 }
 0x50c   : > { %v3879_v5 = vsub.f32 %v9578_v58, %v3842_v62  ;;  %v3848_v17 = vpop.permute.xlu0 %3847 }
 0x50d   : > { %v3882_v28 = vsub.f32 %v9579_v40, %v3848_v17 }
 0x50e   : > { %3921 = vrot.lane.b32.xlu1 %v3879_v5, %s9672_s29 }
 0x50f   : > { %v3846_v49 = vpop.permute.xlu1 %3845  ;;  %3927 = vrot.lane.b32.xlu0 %v3882_v28, %s9672_s29 }
 0x510   : > { %v3881_v2 = vsub.f32 %v9580_v37, %v3846_v49 }
 0x512   : > { %v3852_v6 = vpop.permute.xlu0 %3851  ;;  %3925 = vrot.lane.b32.xlu1 %v3881_v2, %s9672_s29 }
 0x513   : > { %v3884_v53 = vsub.f32 %v9581_v46, %v3852_v6  ;;  %v3850_v4 = vpop.permute.xlu1 %3849 }
 0x514   : > { %v3883_v38 = vsub.f32 %v9582_v48, %v3850_v4 }
 0x515   : > { %3931 = vrot.lane.b32.xlu0 %v3884_v53, %s9672_s29 }
 0x516   : > { %3929 = vrot.lane.b32.xlu1 %v3883_v38, %s9672_s29 }
 0x569   : > { %v3904_v11 = vpop.permute.xlu0 %3903 }
 0x56a   : > { %v3950_v62 = vmul.f32 %v10586_v21, %v3904_v11  ;;  %v3902_v58 = vpop.permute.xlu1 %3901 }
 0x56b   : > { %v3949_v5 = vmul.f32 %v10591_v63, %v3902_v58 }
 0x56c   : > { %3983 = vrot.lane.b32.xlu0 %v3950_v62, %s9672_s29 }
 0x56d   : > { %v3908_v17 = vpop.permute.xlu0 %3907  ;;  %3981 = vrot.lane.b32.xlu1 %v3949_v5, %s9672_s29 }
 0x56e   : > { %v3952_v40 = vmul.f32 %v10601_v30, %v3908_v17  ;;  %v3906_v28 = vpop.permute.xlu1 %3905  ;;  %v9586_v17 = vld [vmem:[%s11921_s2 + $0x38] sm:$0xff] }
 0x56f   : > { %v3951_v49 = vmul.f32 %v10606_v42, %v3906_v28 }
 0x570   : > { %3987 = vrot.lane.b32.xlu0 %v3952_v40, %s9672_s29 }
 0x571   : > { %v3912_v37 = vpop.permute.xlu0 %3911  ;;  %3985 = vrot.lane.b32.xlu1 %v3951_v49, %s9672_s29 }
 0x572   : > { %v3954_v21 = vmul.f32 %v10613_v51, %v3912_v37  ;;  %v3910_v2 = vpop.permute.xlu1 %3909 }
 0x573   : > { %v3953_v63 = vmul.f32 %v10618_v52, %v3910_v2 }
 0x574   : > { %3991 = vrot.lane.b32.xlu0 %v3954_v21, %s9672_s29 }
 0x575   : > { %v3916_v6 = vpop.permute.xlu0 %3915  ;;  %3989 = vrot.lane.b32.xlu1 %v3953_v63, %s9672_s29 }
 0x576   : > { %v3956_v30 = vmul.f32 %v10625_v57, %v3916_v6 }
 0x578   : > { %v3914_v46 = vpop.permute.xlu1 %3913  ;;  %3995 = vrot.lane.b32.xlu0 %v3956_v30, %s9672_s29 }
 0x579   : > { %v3955_v42 = vmul.f32 %v10631_v25, %v3914_v46  ;;  %v3920_v53 = vpop.permute.xlu0 %3919 }
 0x57a   : > { %v3958_v4 = vmul.f32 %v10636_v13, %v3920_v53 }
 0x57b   : > { %3993 = vrot.lane.b32.xlu1 %v3955_v42, %s9672_s29 }
 0x57c   : > { %v3918_v51 = vpop.permute.xlu1 %3917  ;;  %3999 = vrot.lane.b32.xlu0 %v3958_v4, %s9672_s29 }
 0x57d   : > { %v3957_v52 = vmul.f32 %v10643_v3, %v3918_v51  ;;  %v3924_v48 = vpop.permute.xlu0 %3923  ;;  %v9583_v3 = vld [vmem:[%s11921_s2 + $0x58] sm:$0xff] }
 0x57e   : > { %v3960_v38 = vmul.f32 %v10648_v45, %v3924_v48  ;;  %v9584_v45 = vld [vmem:[%s11921_s2 + $0x78] sm:$0xff] }
 0x57f   : > { %3997 = vrot.lane.b32.xlu1 %v3957_v52, %s9672_s29  ;;  %v9370_v58 = vpack.i.bf16 %v9584_v45, %v9583_v3 }
 0x580   : > { %v3922_v57 = vpop.permute.xlu1 %3921  ;;  %4003 = vrot.lane.b32.xlu0 %v3960_v38, %s9672_s29 }
 0x581   : > { %v3959_v25 = vmul.f32 %v10655_v54, %v3922_v57  ;;  %v3928_v11 = vpop.permute.xlu0 %3927 }
 0x582   : > { %v3962_v13 = vmul.f32 %v10660_v1, %v3928_v11  ;;  %v9585_v1 = vld [vmem:[%s11921_s2 + $0x18] sm:$0xff] }
 0x583   : > { %4001 = vrot.lane.b32.xlu1 %v3959_v25, %s9672_s29  ;;  %v9365_v40 = vpack.i.bf16 %v9586_v17, %v9585_v1 }
 0x584   : > { %v3926_v62 = vpop.permute.xlu1 %3925  ;;  %4007 = vrot.lane.b32.xlu0 %v3962_v13, %s9672_s29 }
 0x585   : > { %v3961_v5 = vmul.f32 %v10666_v32, %v3926_v62 }
 0x587   : > { %v3932_v54 = vpop.permute.xlu0 %3931  ;;  %4005 = vrot.lane.b32.xlu1 %v3961_v5, %s9672_s29 }
 0x588   : > { %9371 = vrot.lane.b32.xlu0 %v9370_v58, %s9672_s29  ;;  %v3964_v28 = vmul.f32 %v10673_v35, %v3932_v54  ;;  %v3930_v49 = vpop.permute.xlu1 %3929 }
 0x589   : > { %v3963_v32 = vmul.f32 %v10678_v39, %v3930_v49  ;;  %v12023_v49 = vld [vmem:[#allocation5_spill] sm:$0xff] }
 0x58b   : > { %9366 = vrot.lane.b32.xlu1 %v9365_v40, %s9672_s29  ;;  %v12022_v40 = vld [vmem:[#allocation8_spill] sm:$0xff] }
 0x58c   : > { %4011 = vrot.lane.b32.xlu0 %v3964_v28, %s9672_s29 }
 0x58f   : > { %4009 = vrot.lane.b32.xlu1 %v3963_v32, %s9672_s29 }
 0x5de   : > { %v3984_v37 = vpop.permute.xlu0 %3983 }
 0x5df   : > { %v4030_v21 = vadd.f32 %v10690_v50, %v3984_v37  ;;  %v3982_v2 = vpop.permute.xlu1 %3981  ;;  %v12024_v37 = vld [vmem:[#allocation9_spill] sm:$0xff] }
 0x5e0   : > { %v4029_v63 = vadd.f32 %v10693_v55, %v3982_v2  ;;  %v12025_v2 = vmov 0.0  }
 0x5e1   : > { %4063 = vrot.lane.b32.xlu0 %v4030_v21, %s9671_s7 }
 0x5e2   : > { %v3988_v6 = vpop.permute.xlu0 %3987  ;;  %4061 = vrot.lane.b32.xlu1 %v4029_v63, %s9671_s7 }
 0x5e3   : > { %v4032_v35 = vadd.f32 %v10700_v16, %v3988_v6  ;;  %v3986_v30 = vpop.permute.xlu1 %3985 }
 0x5e4   : > { %v4031_v46 = vadd.f32 %v10703_v60, %v3986_v30 }
 0x5e5   : > { %4067 = vrot.lane.b32.xlu0 %v4032_v35, %s9671_s7 }
 0x5e6   : > { %v3992_v39 = vpop.permute.xlu0 %3991  ;;  %4065 = vrot.lane.b32.xlu1 %v4031_v46, %s9671_s7 }
 0x5e7   : > { %v4034_v50 = vadd.f32 %v10710_v7, %v3992_v39  ;;  %v3990_v42 = vpop.permute.xlu1 %3989 }
 0x5e8   : > { %v4033_v55 = vadd.f32 %v10713_v33, %v3990_v42 }
 0x5e9   : > { %4071 = vrot.lane.b32.xlu0 %v4034_v50, %s9671_s7 }
 0x5ea   : > { %v3996_v53 = vpop.permute.xlu0 %3995  ;;  %4069 = vrot.lane.b32.xlu1 %v4033_v55, %s9671_s7 }
 0x5eb   : > { %v4036_v16 = vadd.f32 %v10720_v41, %v3996_v53 }
 0x5ed   : > { %v3994_v4 = vpop.permute.xlu1 %3993  ;;  %4075 = vrot.lane.b32.xlu0 %v4036_v16, %s9671_s7 }
 0x5ee   : > { %v4035_v60 = vadd.f32 %v10725_v15, %v3994_v4  ;;  %v4000_v51 = vpop.permute.xlu0 %3999 }
 0x5ef   : > { %v4038_v52 = vadd.f32 %v10728_v0, %v4000_v51 }
 0x5f0   : > { %4073 = vrot.lane.b32.xlu1 %v4035_v60, %s9671_s7 }
 0x5f1   : > { %v3998_v7 = vpop.permute.xlu1 %3997  ;;  %4079 = vrot.lane.b32.xlu0 %v4038_v52, %s9671_s7 }
 0x5f2   : > { %v4037_v33 = vadd.f32 %v10735_v10, %v3998_v7  ;;  %v4004_v48 = vpop.permute.xlu0 %4003 }
 0x5f3   : > { %v4040_v38 = vadd.f32 %v10738_v43, %v4004_v48 }
 0x5f4   : > { %4077 = vrot.lane.b32.xlu1 %v4037_v33, %s9671_s7 }
 0x5f5   : > { %v4002_v41 = vpop.permute.xlu1 %4001  ;;  %4083 = vrot.lane.b32.xlu0 %v4040_v38, %s9671_s7 }
 0x5f6   : > { %v4039_v15 = vadd.f32 %v10744_v31, %v4002_v41  ;;  %v4008_v57 = vpop.permute.xlu0 %4007 }
 0x5f7   : > { %v4042_v0 = vadd.f32 %v10746_v29, %v4008_v57 }
 0x5f8   : > { %4081 = vrot.lane.b32.xlu1 %v4039_v15, %s9671_s7 }
 0x5f9   : > { %v4006_v25 = vpop.permute.xlu1 %4005  ;;  %4087 = vrot.lane.b32.xlu0 %v4042_v0, %s9671_s7 }
 0x5fa   : > { %v4041_v10 = vadd.f32 %v10752_v36, %v4006_v25  ;;  %v9372_v11 = vpop.permute.xlu0 %9371 }
 0x5fb   : > { %v9374_v13 = vunpack.i.h.bf16 %v9372_v11  ;;  %v9373_v43 = vunpack.i.l.bf16 %v9372_v11 }
 0x5fc   : > { %4085 = vrot.lane.b32.xlu1 %v4041_v10, %s9671_s7 }
 0x5fd   : > { %v9367_v62 = vpop.permute.xlu1 %9366  ;;  %v10871_v5 = vpack.c.bf16 %v9374_v13, %v9373_v43 }
 0x5fe   : > { %v9369_v3 = vunpack.i.h.bf16 %v9367_v62  ;;  %v9368_v45 = vunpack.i.l.bf16 %v9367_v62  ;;  %v4012_v58 = vpop.permute.xlu0 %4011 }
 0x5ff   : > { %v4044_v31 = vadd.f32 %v10756_v59, %v4012_v58  ;;  %v12021_v59 = vld [vmem:[#allocation31_spill] sm:$0xff] }
 0x600   : > { %v10873_v29 = vpack.c.bf16 %v9369_v3, %v9368_v45 }
 0x601   : > { %v4010_v54 = vpop.permute.xlu1 %4009  ;;  %4091 = vrot.lane.b32.xlu0 %v4044_v31, %s9671_s7 }
 0x602   : > { %v4043_v36 = vadd.f32 %v10758_v47, %v4010_v54  ;;  %9223 = vmatprep.subr.bf16.mxu1 %v10873_v29 }
 0x603   : > { %9225 = vmatpush3.bf16.msra.mxu1 %v10873_v29 }
 0x604   : > { %4089 = vrot.lane.b32.xlu1 %v4043_v36, %s9671_s7  ;;  %9227 = vmatprep.subr.bf16.mxu1 %v10871_v5 }
 0x605   : > { %4127 = vrot.lane.b32.xlu0 %v10443_v20, %s9672_s29 }
 0x607   : > { %9229 = vmatpush3.bf16.msra.mxu1 %v10871_v5 }
 0x608   : > { %4125 = vrot.lane.b32.xlu1 %v10448_v8, %s9672_s29  ;;  %9231 = vmatprep.subr.bf16.mxu1 %v9770_v9  ;;  %v12020_v9 = vld [vmem:[#allocation30_spill] sm:$0xff] }
 0x609   : > { %4131 = vrot.lane.b32.xlu0 %v10459_v12, %s9672_s29 }
 0x60c   : > { %4129 = vrot.lane.b32.xlu1 %v10465_v44, %s9672_s29 }
 0x60d   : > { %4135 = vrot.lane.b32.xlu0 %v10477_v24, %s9672_s29 }
 0x610   : > { %4133 = vrot.lane.b32.xlu1 %v10483_v61, %s9672_s29 }
 0x611   : > { %4139 = vrot.lane.b32.xlu0 %v10495_v14, %s9672_s29 }
 0x614   : > { %4137 = vrot.lane.b32.xlu1 %v10501_v34, %s9672_s29 }
 0x615   : > { %4143 = vrot.lane.b32.xlu0 %v10514_v19, %s9672_s29 }
 0x618   : > { %4141 = vrot.lane.b32.xlu1 %v10520_v23, %s9672_s29 }
 0x619   : > { %4147 = vrot.lane.b32.xlu0 %v12020_v9, %s9672_s29 }
 0x61c   : > { %4145 = vrot.lane.b32.xlu1 %v12021_v59, %s9672_s29 }
 0x61d   : > { %4151 = vrot.lane.b32.xlu0 %v10550_v22, %s9672_s29 }
 0x620   : > { %4149 = vrot.lane.b32.xlu1 %v10560_v27, %s9672_s29 }
 0x621   : > { %4155 = vrot.lane.b32.xlu0 %v10568_v56, %s9672_s29 }
 0x624   : > { %4153 = vrot.lane.b32.xlu1 %v10578_v18, %s9672_s29 }
 0x653   : > { %v4064_v47 = vpop.permute.xlu0 %4063 }
 0x654   : > { %v4062_v1 = vpop.permute.xlu1 %4061 }
 0x655   : > { %8910 = vmatprep.mubr.msk.f32.mxu1 %vm320_vm0, %v4062_v1 }
 0x656   : > { %8911 = vmatmul.mubr.msk.f32.vlgmr.msra.gmra.mrb[64].mxu1 %vm320_vm0, %v4064_v47 }
 0x657   : > { %v4068_v17 = vpop.permute.xlu0 %4067  ;;  %9233 = vmatpush1.bf16.msra.mxu1 %v12022_v40 }
 0x658   : > { %v4066_v28 = vpop.permute.xlu1 %4065  ;;  %9235 = vmatprep.subr.bf16.mxu1 %v12023_v49 }
 0x659   : > { %8913 = vmatprep.mubr.msk.f32.mxu1 %vm320_vm0, %v4066_v28 }
 0x65a   : > { %8914 = vmatmul.mubr.msk.f32.gmra.mrb[66].mxu1 %vm320_vm0, %v4068_v17 }
 0x65b   : > { %v4072_v32 = vpop.permute.xlu0 %4071  ;;  %9237 = vmatpush1.bf16.msra.mxu1 %v12024_v37 }
 0x65c   : > { %v4070_v21 = vpop.permute.xlu1 %4069  ;;  %8979 = vmatprep.subr.mxu1 %v12025_v2 }
 0x65d   : > { %8916 = vmatprep.mubr.msk.f32.mxu1 %vm320_vm0, %v4070_v21 }
 0x65e   : > { %8917 = vmatmul.mubr.msk.f32.gmra.mrb[68].mxu1 %vm320_vm0, %v4072_v32 }
 0x65f   : > { %v4076_v63 = vpop.permute.xlu0 %4075 }
 0x662   : > { %v4074_v6 = vpop.permute.xlu1 %4073 }
 0x663   : > { %8919 = vmatprep.mubr.msk.f32.mxu1 %vm320_vm0, %v4074_v6  ;;  %v4080_v35 = vpop.permute.xlu0 %4079 }
 0x664   : > { %8920 = vmatmul.mubr.msk.f32.gmra.mrb[70].mxu1 %vm320_vm0, %v4076_v63 }
 0x666   : > { %v4078_v30 = vpop.permute.xlu1 %4077 }
 0x667   : > { %8922 = vmatprep.mubr.msk.f32.mxu1 %vm320_vm0, %v4078_v30  ;;  %v4084_v46 = vpop.permute.xlu0 %4083 }
 0x668   : > { %8923 = vmatmul.mubr.msk.f32.gmra.mrb[72].mxu1 %vm320_vm0, %v4080_v35 }
 0x66a   : > { %v4082_v39 = vpop.permute.xlu1 %4081 }
 0x66b   : > { %8925 = vmatprep.mubr.msk.f32.mxu1 %vm320_vm0, %v4082_v39  ;;  %v4088_v42 = vpop.permute.xlu0 %4087 }
 0x66c   : > { %8926 = vmatmul.mubr.msk.f32.gmra.mrb[74].mxu1 %vm320_vm0, %v4084_v46 }
 0x66e   : > { %v4086_v50 = vpop.permute.xlu1 %4085 }
 0x66f   : > { %8928 = vmatprep.mubr.msk.f32.mxu1 %vm320_vm0, %v4086_v50 }
 0x670   : > { %8929 = vmatmul.mubr.msk.f32.gmra.mrb[76].mxu1 %vm320_vm0, %v4088_v42 }
 0x673   : > { %v4092_v53 = vpop.permute.xlu0 %4091 }
 0x676   : > { %v4090_v55 = vpop.permute.xlu1 %4089 }
 0x677   : > { %8931 = vmatprep.mubr.msk.f32.mxu1 %vm320_vm0, %v4090_v55  ;;  %v10943_v7 = vpop.permute.xlu0 %4127 }
 0x678   : > { %8932 = vmatmul.mubr.msk.f32.gmra.mrb[78].mxu1 %vm320_vm0, %v4092_v53  ;;  %12027 = vst [vmem:[#allocation31_spill] sm:$0xff] %v10943_v7 }
 0x679   : > { %4462 = vmatprep.mubr.f32.mxu1 %v12025_v2 }
 0x67a   : > { %v10936_v4 = vpop.permute.xlu1 %4125 }
 0x67b   : > { %12026 = vst [vmem:[#allocation30_spill] sm:$0xff] %v10936_v4  ;;  %v10959_v0 = vpop.permute.xlu0 %4131 }
 0x67c   : > { %12029 = vst [vmem:[#allocation5_spill] sm:$0xff] %v10959_v0 }
 0x67e   : > { %v10951_v41 = vpop.permute.xlu1 %4129 }
 0x67f   : > { %12028 = vst [vmem:[#allocation8_spill] sm:$0xff] %v10951_v41  ;;  %v10975_v45 = vpop.permute.xlu0 %4135 }
 0x680   : > { %12032 = vst [vmem:[#allocation33_spill] sm:$0xff] %v10975_v45 }
 0x682   : > { %v10967_v13 = vpop.permute.xlu1 %4133 }
 0x683   : > { %12030 = vst [vmem:[#allocation9_spill] sm:$0xff] %v10967_v13  ;;  %v10991_v40 = vpop.permute.xlu0 %4139 }
 0x684   : > { %12036 = vst [vmem:[#allocation37_spill] sm:$0xff] %v10991_v40 }
 0x686   : > { %v10983_v36 = vpop.permute.xlu1 %4137 }
 0x687   : > { %12034 = vst [vmem:[#allocation35_spill] sm:$0xff] %v10983_v36  ;;  %v11007_v63 = vpop.permute.xlu0 %4143 }
 0x688   : > { %12040 = vst [vmem:[#allocation41_spill] sm:$0xff] %v11007_v63 }
 0x68a   : > { %v10999_v49 = vpop.permute.xlu1 %4141 }
 0x68b   : > { %12038 = vst [vmem:[#allocation39_spill] sm:$0xff] %v10999_v49  ;;  %v11023_v46 = vpop.permute.xlu0 %4147 }
 0x68c   : > { %12044 = vst [vmem:[#allocation45_spill] sm:$0xff] %v11023_v46 }
 0x68e   : > { %v11015_v35 = vpop.permute.xlu1 %4145 }
 0x68f   : > { %12042 = vst [vmem:[#allocation43_spill] sm:$0xff] %v11015_v35  ;;  %v11039_v55 = vpop.permute.xlu0 %4151 }
 0x690   : > { %12048 = vst [vmem:[#allocation49_spill] sm:$0xff] %v11039_v55 }
 0x692   : > { %v11031_v50 = vpop.permute.xlu1 %4149 }
 0x693   : > { %12046 = vst [vmem:[#allocation47_spill] sm:$0xff] %v11031_v50 }
 0x729   : > { %v8912_v16 = vpop.f32.mrb[64].mxu1 }
 0x72a   : > { %v4271_v60 = vpop.f32.mrb[65].mxu1  ;;  %v10947_v48 = vadd.f32 %v8912_v16, %v10943_v7  ;;  %v11047_v16 = vpop.permute.xlu1 %4153 }
 0x72b   : > { %v10939_v51 = vadd.f32 %v4271_v60, %v10936_v4  ;;  %12050 = vst [vmem:[#allocation51_spill] sm:$0xff] %v11047_v16  ;;  %v9597_v4 = vld [vmem:[%s9800_s8 + $0x50] sm:$0xff] }
 0x72d   : > { %v8915_v52 = vpop.f32.mrb[66].mxu1  ;;  %8260 = vmatmul.mubr.msk.f32.vlgmr.msra.gmra.mrb[80].mxu1 %vm320_vm0, %v10939_v51 }
 0x72e   : > { %v4281_v33 = vpop.f32.mrb[67].mxu1  ;;  %4468 = vmatprep.mubr.f32.mxu1 %v12025_v2  ;;  %v10963_v25 = vadd.f32 %v8915_v52, %v10959_v0  ;;  %v11055_v52 = vpop.permute.xlu0 %4155 }
 0x72f   : > { %v10955_v57 = vadd.f32 %v4281_v33, %v10951_v41  ;;  %12052 = vst [vmem:[#allocation53_spill] sm:$0xff] %v11055_v52  ;;  %v9596_v41 = vld [vmem:[%s9800_s8 + $0x48] sm:$0xff] }
 0x731   : > { %v8918_v38 = vpop.f32.mrb[68].mxu1  ;;  %8261 = vmatmul.mubr.msk.f32.gmra.mrb[82].mxu1 %vm320_vm0, %v10947_v48 }
 0x732   : > { %v4291_v15 = vpop.f32.mrb[69].mxu1  ;;  %4474 = vmatprep.mubr.f32.mxu1 %v12025_v2  ;;  %v10979_v58 = vadd.f32 %v8918_v38, %v10975_v45 }
 0x733   : > { %v10971_v43 = vadd.f32 %v4291_v15, %v10967_v13  ;;  %v12054_v15 = vld [vmem:[#allocation10_spill] sm:$0xff]  ;;  %v9595_v13 = vld [vmem:[%s9800_s8 + $0x40] sm:$0xff] }
 0x734   : > { %12033 = vst [vmem:[#allocation34_spill] sm:$0xff] %v10979_v58 }
 0x735   : > { %8262 = vmatmul.mubr.msk.f32.gmra.mrb[84].mxu1 %vm320_vm0, %v10955_v57  ;;  %12031 = vst [vmem:[#allocation32_spill] sm:$0xff] %v10971_v43 }
 0x736   : > { %4480 = vmatprep.mubr.f32.mxu1 %v12025_v2 }
 0x737   : > { %v8921_v10 = vpop.f32.mrb[70].mxu1 }
 0x738   : > { %v4301_v11 = vpop.f32.mrb[71].mxu1  ;;  %v10995_v28 = vadd.f32 %v8921_v10, %v10991_v40 }
 0x739   : > { %8263 = vmatmul.mubr.msk.f32.gmra.mrb[86].mxu1 %vm320_vm0, %v10963_v25  ;;  %v10987_v47 = vadd.f32 %v4301_v11, %v10983_v36  ;;  %v9594_v36 = vld [vmem:[%s9800_s8 + $0x38] sm:$0xff] }
 0x73a   : > { %4486 = vmatprep.mubr.f32.mxu1 %v12025_v2  ;;  %12037 = vst [vmem:[#allocation38_spill] sm:$0xff] %v10995_v28 }
 0x73b   : > { %v8924_v62 = vpop.f32.mrb[72].mxu1  ;;  %12035 = vst [vmem:[#allocation36_spill] sm:$0xff] %v10987_v47 }
 0x73c   : > { %v4311_v3 = vpop.f32.mrb[73].mxu1  ;;  %v11011_v6 = vadd.f32 %v8924_v62, %v11007_v63 }
 0x73d   : > { %8264 = vmatmul.mubr.msk.f32.gmra.mrb[88].mxu1 %vm320_vm0, %v10971_v43  ;;  %v11003_v32 = vadd.f32 %v4311_v3, %v10999_v49  ;;  %v9587_v3 = vld [vmem:[%s9800_s8] sm:$0xff]  ;;  %v9593_v49 = vld [vmem:[%s9800_s8 + $0x30] sm:$0xff] }
 0x73e   : > { %4492 = vmatprep.mubr.f32.mxu1 %v12025_v2  ;;  %12041 = vst [vmem:[#allocation42_spill] sm:$0xff] %v11011_v6 }
 0x73f   : > { %v8927_v31 = vpop.f32.mrb[74].mxu1  ;;  %12039 = vst [vmem:[#allocation40_spill] sm:$0xff] %v11003_v32 }
 0x740   : > { %v4321_v54 = vpop.f32.mrb[75].mxu1  ;;  %v11027_v39 = vadd.f32 %v8927_v31, %v11023_v46 }
 0x741   : > { %8265 = vmatmul.mubr.msk.f32.gmra.mrb[90].mxu1 %vm320_vm0, %v10979_v58  ;;  %v11019_v30 = vadd.f32 %v4321_v54, %v11015_v35  ;;  %v9592_v35 = vld [vmem:[%s9800_s8 + $0x28] sm:$0xff] }
 0x742   : > { %4498 = vmatprep.mubr.f32.mxu1 %v12025_v2  ;;  %12045 = vst [vmem:[#allocation46_spill] sm:$0xff] %v11027_v39 }
 0x743   : > { %v8930_v1 = vpop.f32.mrb[76].mxu1  ;;  %12043 = vst [vmem:[#allocation44_spill] sm:$0xff] %v11019_v30 }
 0x744   : > { %v4331_v17 = vpop.f32.mrb[77].mxu1  ;;  %v11043_v53 = vadd.f32 %v8930_v1, %v11039_v55 }
 0x745   : > { %8266 = vmatmul.mubr.msk.f32.gmra.mrb[92].mxu1 %vm320_vm0, %v10987_v47  ;;  %v11035_v42 = vadd.f32 %v4331_v17, %v11031_v50  ;;  %v9588_v17 = vld [vmem:[%s9800_s8 + $0x8] sm:$0xff]  ;;  %v9591_v50 = vld [vmem:[%s9800_s8 + $0x20] sm:$0xff] }
 0x746   : > { %4504 = vmatprep.mubr.f32.mxu1 %v12025_v2  ;;  %12049 = vst [vmem:[#allocation50_spill] sm:$0xff] %v11043_v53 }
 0x747   : > { %12047 = vst [vmem:[#allocation48_spill] sm:$0xff] %v11035_v42 }
 0x749   : > { %8267 = vmatmul.mubr.msk.f32.gmra.mrb[94].mxu1 %vm320_vm0, %v10995_v28 }
 0x74a   : > { %4510 = vmatprep.mubr.f32.mxu1 %v12025_v2 }
 0x74b   : > { %v8933_v37 = vpop.f32.mrb[78].mxu1 }
 0x74c   : > { %v4341_v21 = vpop.f32.mrb[79].mxu1  ;;  %v11059_v33 = vadd.f32 %v8933_v37, %v11055_v52 }
 0x74d   : > { %8268 = vmatmul.mubr.msk.f32.gmra.mrb[96].mxu1 %vm320_vm0, %v11003_v32  ;;  %v11051_v60 = vadd.f32 %v4341_v21, %v11047_v16  ;;  %v9590_v16 = vld [vmem:[%s9800_s8 + $0x18] sm:$0xff]  ;;  %v9601_v32 = vld [vmem:[%s9800_s8 + $0x70] sm:$0xff] }
 0x74e   : > { %4516 = vmatprep.mubr.f32.mxu1 %v12025_v2  ;;  %12053 = vst [vmem:[#allocation54_spill] sm:$0xff] %v11059_v33 }
 0x74f   : > { %12051 = vst [vmem:[#allocation52_spill] sm:$0xff] %v11051_v60 }
 0x751   : > { %8269 = vmatmul.mubr.msk.f32.gmra.mrb[98].mxu1 %vm320_vm0, %v11011_v6 }
 0x752   : > { %4522 = vmatprep.mubr.f32.mxu1 %v12025_v2 }
 0x755   : > { %8270 = vmatmul.mubr.msk.f32.gmra.mrb[100].mxu1 %vm320_vm0, %v11019_v30  ;;  %v9600_v30 = vld [vmem:[%s9800_s8 + $0x68] sm:$0xff] }
 0x756   : > { %4528 = vmatprep.mubr.f32.mxu1 %v12025_v2 }
 0x759   : > { %8271 = vmatmul.mubr.msk.f32.gmra.mrb[102].mxu1 %vm320_vm0, %v11027_v39 }
 0x75a   : > { %4534 = vmatprep.mubr.f32.mxu1 %v12025_v2 }
 0x75d   : > { %8272 = vmatmul.mubr.msk.f32.gmra.mrb[104].mxu1 %vm320_vm0, %v11035_v42  ;;  %v9599_v42 = vld [vmem:[%s9800_s8 + $0x60] sm:$0xff] }
 0x75e   : > { %4540 = vmatprep.mubr.f32.mxu1 %v12025_v2 }
 0x761   : > { %8273 = vmatmul.mubr.msk.f32.gmra.mrb[106].mxu1 %vm320_vm0, %v11043_v53 }
 0x762   : > { %4546 = vmatprep.mubr.f32.mxu1 %v12025_v2 }
 0x765   : > { %8274 = vmatmul.mubr.msk.f32.gmra.mrb[108].mxu1 %vm320_vm0, %v11051_v60  ;;  %v9598_v60 = vld [vmem:[%s9800_s8 + $0x58] sm:$0xff] }
 0x766   : > { %4552 = vmatprep.mubr.f32.mxu1 %v12025_v2 }
 0x769   : > { %8275 = vmatmul.mubr.msk.f32.gmra.mrb[110].mxu1 %vm320_vm0, %v11059_v33 }
 0x76a   : > { %8981 = vmatprep.mubr.msk.f32.mxu1 %vm9670_vm2, %v12025_v2 }
 0x800   : > { %v4464_v38 = vpop.f32.mrb[80].mxu1 }
 0x801   : > { %v11066_v10 = vadd.f32 %v4464_v38, %v12054_v15  ;;  %v11068_v11 = vpop.f32.mrb[81].mxu1 }
 0x803   : > { %5680 = vrot.lane.b32.xlu1 %v11066_v10, %s9667_s27  ;;  %8935 = vmatpush3.msra.mxu0 %v11066_v10 }
 0x804   : > { %v4470_v62 = vpop.f32.mrb[82].mxu1  ;;  %8939 = vmatprep.subr.mxu0 %v12025_v2  ;;  %8937 = vmatmul.mubr.msk.f32.vlgmr.msra.gmra.mrb[64].mxu0 %vm686_vm3, %v9587_v3 }
 0x805   : > { %v11077_v31 = vadd.f32 %v4470_v62, %v12054_v15  ;;  %v11079_v54 = vpop.f32.mrb[83].mxu1  ;;  %8941 = vmatprep.mubr.msk.f32.mxu0 %vm9670_vm2, %v12025_v2  ;;  %v9589_v62 = vld [vmem:[%s9800_s8 + $0x10] sm:$0xff] }
 0x807   : > { %5754 = vrot.lane.b32.xlu0 %v11077_v31, %s9667_s27  ;;  %8940 = vmatpush3.msra.mxu0 %v11077_v31 }
 0x808   : > { %v4476_v1 = vpop.f32.mrb[84].mxu1  ;;  %8944 = vmatprep.subr.mxu0 %v12025_v2  ;;  %8942 = vmatmul.mubr.msk.f32.vlgmr.msra.gmra.mrb[66].mxu0 %vm686_vm3, %v9588_v17 }
 0x809   : > { %v11090_v37 = vadd.f32 %v4476_v1, %v12054_v15  ;;  %v11092_v21 = vpop.f32.mrb[85].mxu1  ;;  %8946 = vmatprep.mubr.msk.f32.mxu0 %vm9670_vm2, %v12025_v2 }
 0x80b   : > { %5828 = vrot.lane.b32.xlu1 %v11090_v37, %s9667_s27  ;;  %8945 = vmatpush3.msra.mxu0 %v11090_v37 }
 0x80c   : > { %v4482_v38 = vpop.f32.mrb[86].mxu1  ;;  %8949 = vmatprep.subr.mxu0 %v12025_v2  ;;  %8947 = vmatmul.mubr.msk.f32.vlgmr.msra.gmra.mrb[68].mxu0 %vm686_vm3, %v9589_v62 }
 0x80d   : > { %v11103_v3 = vadd.f32 %v4482_v38, %v12054_v15  ;;  %v11105_v1 = vpop.f32.mrb[87].mxu1  ;;  %8951 = vmatprep.mubr.msk.f32.mxu0 %vm9670_vm2, %v12025_v2 }
 0x80f   : > { %5902 = vrot.lane.b32.xlu0 %v11103_v3, %s9667_s27  ;;  %8950 = vmatpush3.msra.mxu0 %v11103_v3 }
 0x810   : > { %v4488_v17 = vpop.f32.mrb[88].mxu1  ;;  %8954 = vmatprep.subr.mxu0 %v12025_v2  ;;  %8952 = vmatmul.mubr.msk.f32.vlgmr.msra.gmra.mrb[70].mxu0 %vm686_vm3, %v9590_v16 }
 0x811   : > { %v11116_v38 = vadd.f32 %v4488_v17, %v12054_v15  ;;  %v11118_v62 = vpop.f32.mrb[89].mxu1  ;;  %8956 = vmatprep.mubr.msk.f32.mxu0 %vm9670_vm2, %v12025_v2 }
 0x813   : > { %5976 = vrot.lane.b32.xlu1 %v11116_v38, %s9667_s27  ;;  %8955 = vmatpush3.msra.mxu0 %v11116_v38 }
 0x814   : > { %v4494_v52 = vpop.f32.mrb[90].mxu1  ;;  %8959 = vmatprep.subr.mxu0 %v12025_v2  ;;  %8957 = vmatmul.mubr.msk.f32.vlgmr.msra.gmra.mrb[72].mxu0 %vm686_vm3, %v9591_v50 }
 0x815   : > { %v11129_v16 = vadd.f32 %v4494_v52, %v12054_v15  ;;  %v11131_v17 = vpop.f32.mrb[91].mxu1  ;;  %8961 = vmatprep.mubr.msk.f32.mxu0 %vm9670_vm2, %v12025_v2 }
 0x817   : > { %6050 = vrot.lane.b32.xlu0 %v11129_v16, %s9667_s27  ;;  %8960 = vmatpush3.msra.mxu0 %v11129_v16 }
 0x818   : > { %v4500_v55 = vpop.f32.mrb[92].mxu1  ;;  %8964 = vmatprep.subr.mxu0 %v12025_v2  ;;  %8962 = vmatmul.mubr.msk.f32.vlgmr.msra.gmra.mrb[74].mxu0 %vm686_vm3, %v9592_v35 }
 0x819   : > { %v11142_v50 = vadd.f32 %v4500_v55, %v12054_v15  ;;  %v11144_v52 = vpop.f32.mrb[93].mxu1  ;;  %8966 = vmatprep.mubr.msk.f32.mxu0 %vm9670_vm2, %v12025_v2 }
 0x81b   : > { %6124 = vrot.lane.b32.xlu1 %v11142_v50, %s9667_s27  ;;  %8965 = vmatpush3.msra.mxu0 %v11142_v50 }
 0x81c   : > { %v4506_v46 = vpop.f32.mrb[94].mxu1  ;;  %8969 = vmatprep.subr.mxu0 %v12025_v2  ;;  %8967 = vmatmul.mubr.msk.f32.vlgmr.msra.gmra.mrb[76].mxu0 %vm686_vm3, %v9593_v49 }
 0x81d   : > { %v11155_v35 = vadd.f32 %v4506_v46, %v12054_v15  ;;  %v11157_v55 = vpop.f32.mrb[95].mxu1  ;;  %8971 = vmatprep.mubr.msk.f32.mxu0 %vm9670_vm2, %v12025_v2 }
 0x81f   : > { %6198 = vrot.lane.b32.xlu0 %v11155_v35, %s9667_s27  ;;  %8970 = vmatpush3.msra.mxu0 %v11155_v35 }
 0x820   : > { %v4512_v63 = vpop.f32.mrb[96].mxu1  ;;  %8974 = vmatprep.subr.mxu0 %v12025_v2  ;;  %8972 = vmatmul.mubr.msk.f32.vlgmr.msra.gmra.mrb[78].mxu0 %vm686_vm3, %v9594_v36 }
 0x821   : > { %v11168_v49 = vadd.f32 %v4512_v63, %v12054_v15  ;;  %v11170_v46 = vpop.f32.mrb[97].mxu1  ;;  %8976 = vmatprep.mubr.msk.f32.mxu0 %vm9670_vm2, %v12025_v2 }
 0x823   : > { %6272 = vrot.lane.b32.xlu1 %v11168_v49, %s9667_s27  ;;  %8975 = vmatpush3.msra.mxu0 %v11168_v49 }
 0x824   : > { %v4518_v40 = vpop.f32.mrb[98].mxu1  ;;  %8984 = vmatprep.subr.mxu0 %v12025_v2  ;;  %8977 = vmatmul.mubr.msk.f32.vlgmr.msra.gmra.mrb[80].mxu0 %vm686_vm3, %v9595_v13 }
 0x825   : > { %v11181_v36 = vadd.f32 %v4518_v40, %v12054_v15  ;;  %v11183_v63 = vpop.f32.mrb[99].mxu1  ;;  %8986 = vmatprep.mubr.msk.f32.mxu0 %vm9670_vm2, %v12025_v2 }
 0x827   : > { %8980 = vmatpush3.msra.mxu1 %v11181_v36  ;;  %6346 = vrot.lane.b32.xlu0 %v11181_v36, %s9667_s27 }
 0x828   : > { %v4524_v45 = vpop.f32.mrb[100].mxu1  ;;  %8989 = vmatprep.subr.mxu1 %v12025_v2  ;;  %8982 = vmatmul.mubr.msk.f32.vlgmr.msra.gmra.mrb[112].mxu1 %vm686_vm3, %v9596_v41 }
 0x829   : > { %v11194_v13 = vadd.f32 %v4524_v45, %v12054_v15  ;;  %v11196_v40 = vpop.f32.mrb[101].mxu1  ;;  %8991 = vmatprep.mubr.msk.f32.mxu1 %vm9670_vm2, %v12025_v2 }
 0x82b   : > { %6420 = vrot.lane.b32.xlu1 %v11194_v13, %s9667_s27  ;;  %8985 = vmatpush3.msra.mxu0 %v11194_v13 }
 0x82c   : > { %v4530_v0 = vpop.f32.mrb[102].mxu1  ;;  %8994 = vmatprep.subr.mxu0 %v12025_v2  ;;  %8987 = vmatmul.mubr.msk.f32.vlgmr.msra.gmra.mrb[82].mxu0 %vm686_vm3, %v9597_v4 }
 0x82d   : > { %v4531_v41 = vadd.f32 %v4530_v0, %v12054_v15  ;;  %v11207_v45 = vpop.f32.mrb[103].mxu1  ;;  %8996 = vmatprep.mubr.msk.f32.mxu0 %vm9670_vm2, %v12025_v2 }
 0x82f   : > { %8990 = vmatpush3.msra.mxu1 %v4531_v41  ;;  %6494 = vrot.lane.b32.xlu0 %v4531_v41, %s9667_s27 }
 0x830   : > { %v4536_v7 = vpop.f32.mrb[104].mxu1  ;;  %8999 = vmatprep.subr.mxu1 %v12025_v2  ;;  %8992 = vmatmul.mubr.msk.f32.vlgmr.msra.gmra.mrb[114].mxu1 %vm686_vm3, %v9598_v60 }
 0x831   : > { %v4537_v33 = vadd.f32 %v4536_v7, %v12054_v15  ;;  %v11216_v4 = vpop.f32.mrb[105].mxu1  ;;  %9001 = vmatprep.mubr.msk.f32.mxu1 %vm9670_vm2, %v12025_v2 }
 0x833   : > { %6568 = vrot.lane.b32.xlu1 %v4537_v33, %s9667_s27  ;;  %8995 = vmatpush3.msra.mxu0 %v4537_v33 }
 0x834   : > { %v4542_v0 = vpop.f32.mrb[106].mxu1  ;;  %9004 = vmatprep.subr.mxu0 %v12025_v2  ;;  %8997 = vmatmul.mubr.msk.f32.vlgmr.msra.gmra.mrb[84].mxu0 %vm686_vm3, %v9599_v42 }
 0x835   : > { %v4543_v60 = vadd.f32 %v4542_v0, %v12054_v15  ;;  %v11225_v53 = vpop.f32.mrb[107].mxu1  ;;  %9006 = vmatprep.mubr.msk.f32.mxu0 %vm9670_vm2, %v12025_v2 }
 0x837   : > { %9000 = vmatpush3.msra.mxu1 %v4543_v60  ;;  %6642 = vrot.lane.b32.xlu0 %v4543_v60, %s9667_s27 }
 0x838   : > { %v4548_v7 = vpop.f32.mrb[108].mxu1  ;;  %9009 = vmatprep.subr.mxu1 %v12025_v2  ;;  %9002 = vmatmul.mubr.msk.f32.vlgmr.msra.gmra.mrb[116].mxu1 %vm686_vm3, %v9600_v30 }
 0x839   : > { %v4549_v42 = vadd.f32 %v4548_v7, %v12054_v15  ;;  %v11234_v39 = vpop.f32.mrb[109].mxu1  ;;  %9011 = vmatprep.mubr.msk.f32.mxu1 %vm9670_vm2, %v12025_v2  ;;  %v9602_v7 = vld [vmem:[%s9800_s8 + $0x78] sm:$0xff] }
 0x83b   : > { %6716 = vrot.lane.b32.xlu1 %v4549_v42, %s9667_s27  ;;  %9005 = vmatpush3.msra.mxu0 %v4549_v42 }
 0x83c   : > { %v4554_v0 = vpop.f32.mrb[110].mxu1  ;;  %9007 = vmatmul.mubr.msk.f32.vlgmr.msra.gmra.mrb[86].mxu0 %vm686_vm3, %v9601_v32  ;;  %9014 = vmatprep.subr.mxu0 %v12025_v2 }
 0x83d   : > { %v4555_v6 = vadd.f32 %v4554_v0, %v12054_v15  ;;  %v11243_v30 = vpop.f32.mrb[111].mxu1  ;;  %9016 = vmatprep.mubr.msk.f32.mxu0 %vm9670_vm2, %v12025_v2  ;;  %v12055_v15 = vld [vmem:[#allocation11_spill] sm:$0xff] }
 0x83f   : > { %9010 = vmatpush3.msra.mxu1 %v4555_v6  ;;  %6790 = vrot.lane.b32.xlu0 %v4555_v6, %s9667_s27  ;;  %s205_s27 = sand.u32 1, %s9657_s16  }
 0x840   : > { %7281 = vrot.lane.b32.xlu1 %v11066_v10, %s9671_s7  ;;  %9012 = vmatmul.mubr.msk.f32.vlgmr.msra.gmra.mrb[118].mxu1 %vm686_vm3, %v9602_v7  ;;  %v12064_v7 = vld [vmem:[#allocation20_spill] sm:$0xff]  ;;  %s8126_s8 = sshll.u32 %s205_s27, 7  ;;  %s11878_s19 = scalar_lea.sflag [#allocation3], %s205_s27 }
 0x841   : > { %9019 = vmatprep.subr.mxu1 %v12025_v2  ;;  %9021 = vmatprep.mubr.msk.f32.mxu1 %vm9670_vm2, %v12025_v2 }
 0x843   : > { %7283 = vrot.lane.b32.xlu0 %v11077_v31, %s9671_s7  ;;  %v12056_v31 = vld [vmem:[#allocation12_spill] sm:$0xff] }
 0x844   : > { %7285 = vrot.lane.b32.xlu1 %v11090_v37, %s9671_s7 }
 0x847   : > { %7287 = vrot.lane.b32.xlu0 %v11103_v3, %s9671_s7  ;;  %v12058_v3 = vld [vmem:[#allocation14_spill] sm:$0xff] }
 0x848   : > { %7289 = vrot.lane.b32.xlu1 %v11116_v38, %s9671_s7 }
 0x84b   : > { %7291 = vrot.lane.b32.xlu0 %v11129_v16, %s9671_s7  ;;  %v12059_v16 = vld [vmem:[#allocation15_spill] sm:$0xff] }
 0x84c   : > { %7293 = vrot.lane.b32.xlu1 %v11142_v50, %s9671_s7 }
 0x84f   : > { %7295 = vrot.lane.b32.xlu0 %v11155_v35, %s9671_s7  ;;  %v12060_v35 = vld [vmem:[#allocation16_spill] sm:$0xff] }
 0x850   : > { %7297 = vrot.lane.b32.xlu1 %v11168_v49, %s9671_s7 }
 0x853   : > { %7299 = vrot.lane.b32.xlu0 %v11181_v36, %s9671_s7  ;;  %v12061_v36 = vld [vmem:[#allocation17_spill] sm:$0xff] }
 0x854   : > { %7301 = vrot.lane.b32.xlu1 %v11194_v13, %s9671_s7 }
 0x857   : > { %7303 = vrot.lane.b32.xlu0 %v4531_v41, %s9671_s7  ;;  %v12062_v41 = vld [vmem:[#allocation18_spill] sm:$0xff] }
 0x858   : > { %7305 = vrot.lane.b32.xlu1 %v4537_v33, %s9671_s7  ;;  %v12057_v33 = vld [vmem:[#allocation13_spill] sm:$0xff] }
 0x85b   : > { %7307 = vrot.lane.b32.xlu0 %v4543_v60, %s9671_s7 }
 0x85c   : > { %7309 = vrot.lane.b32.xlu1 %v4549_v42, %s9671_s7  ;;  %v12063_v42 = vld [vmem:[#allocation19_spill] sm:$0xff] }
 0x85f   : > { %7311 = vrot.lane.b32.xlu0 %v4555_v6, %s9671_s7 }
 0x875   : > { %v5681_v32 = vpop.permute.xlu1 %5680 }
 0x876   : > { %9015 = vmatpush3.msra.mxu0 %v5681_v32 }
 0x877   : > { %9017 = vmatmul.mubr.msk.f32.vlgmr.msra.gmra.mrb[88].mxu0 %vm686_vm3, %v12055_v15  ;;  %9024 = vmatprep.subr.mxu0 %v12025_v2  ;;  %v12065_v15 = vld [vmem:[#allocation21_spill] sm:$0xff] }
 0x878   : > { %9026 = vmatprep.mubr.msk.f32.mxu0 %vm9670_vm2, %v12025_v2 }
 0x879   : > { %v5755_v10 = vpop.permute.xlu0 %5754 }
 0x87a   : > { %9020 = vmatpush3.msra.mxu1 %v5755_v10 }
 0x87b   : > { %9022 = vmatmul.mubr.msk.f32.vlgmr.msra.gmra.mrb[120].mxu1 %vm686_vm3, %v12056_v31  ;;  %9029 = vmatprep.subr.mxu1 %v12025_v2  ;;  %v12066_v31 = vld [vmem:[#allocation22_spill] sm:$0xff] }
 0x87c   : > { %9031 = vmatprep.mubr.msk.f32.mxu1 %vm9670_vm2, %v12025_v2 }
 0x87d   : > { %v5829_v6 = vpop.permute.xlu1 %5828 }
 0x87e   : > { %9025 = vmatpush3.msra.mxu0 %v5829_v6 }
 0x87f   : > { %9027 = vmatmul.mubr.msk.f32.vlgmr.msra.gmra.mrb[90].mxu0 %vm686_vm3, %v12057_v33  ;;  %9034 = vmatprep.subr.mxu0 %v12025_v2  ;;  %v12067_v33 = vld [vmem:[#allocation23_spill] sm:$0xff] }
 0x880   : > { %9036 = vmatprep.mubr.msk.f32.mxu0 %vm9670_vm2, %v12025_v2 }
 0x881   : > { %v5903_v37 = vpop.permute.xlu0 %5902 }
 0x882   : > { %9030 = vmatpush3.msra.mxu1 %v5903_v37 }
 0x883   : > { %9032 = vmatmul.mubr.msk.f32.vlgmr.msra.gmra.mrb[122].mxu1 %vm686_vm3, %v12058_v3  ;;  %9039 = vmatprep.subr.mxu1 %v12025_v2  ;;  %v12068_v3 = vld [vmem:[#allocation24_spill] sm:$0xff] }
 0x884   : > { %9041 = vmatprep.mubr.msk.f32.mxu1 %vm9670_vm2, %v12025_v2 }
 0x885   : > { %v5977_v38 = vpop.permute.xlu1 %5976 }
 0x886   : > { %9035 = vmatpush3.msra.mxu0 %v5977_v38 }
 0x887   : > { %9037 = vmatmul.mubr.msk.f32.vlgmr.msra.gmra.mrb[92].mxu0 %vm686_vm3, %v12059_v16  ;;  %9044 = vmatprep.subr.mxu0 %v12025_v2  ;;  %v12069_v16 = vld [vmem:[#allocation26_spill] sm:$0xff] }
 0x888   : > { %9046 = vmatprep.mubr.msk.f32.mxu0 %vm9670_vm2, %v12025_v2 }
 0x889   : > { %v6051_v50 = vpop.permute.xlu0 %6050 }
 0x88a   : > { %9040 = vmatpush3.msra.mxu1 %v6051_v50  ;;  %v12070_v50 = vld [vmem:[#allocation25_spill] sm:$0xff] }
 0x88b   : > { %9042 = vmatmul.mubr.msk.f32.vlgmr.msra.gmra.mrb[124].mxu1 %vm686_vm3, %v12060_v35  ;;  %9049 = vmatprep.subr.mxu1 %v12025_v2 }
 0x88c   : > { %9051 = vmatprep.mubr.msk.f32.mxu1 %vm9670_vm2, %v12025_v2 }
 0x88d   : > { %v6125_v49 = vpop.permute.xlu1 %6124 }
 0x88e   : > { %9045 = vmatpush3.msra.mxu0 %v6125_v49  ;;  %v12071_v49 = vld [vmem:[#allocation27_spill] sm:$0xff] }
 0x88f   : > { %9047 = vmatmul.mubr.msk.f32.vlgmr.msra.gmra.mrb[94].mxu0 %vm686_vm3, %v12061_v36  ;;  %9054 = vmatprep.subr.mxu0 %v12025_v2  ;;  %v12072_v36 = vld [vmem:[#allocation28_spill] sm:$0xff] }
 0x890   : > { %9056 = vmatprep.mubr.msk.f32.mxu0 %vm9670_vm2, %v12025_v2 }
 0x891   : > { %v6199_v13 = vpop.permute.xlu0 %6198 }
 0x892   : > { %9050 = vmatpush3.msra.mxu1 %v6199_v13 }
 0x893   : > { %9052 = vmatmul.mubr.msk.f32.vlgmr.msra.gmra.mrb[126].mxu1 %vm686_vm3, %v12062_v41  ;;  %9059 = vmatprep.subr.mxu1 %v12025_v2 }
 0x894   : > { %9061 = vmatprep.mubr.msk.f32.mxu1 %vm9670_vm2, %v12025_v2 }
 0x895   : > { %v6273_v60 = vpop.permute.xlu1 %6272 }
 0x896   : > { %9055 = vmatpush3.msra.mxu0 %v6273_v60 }
 0x897   : > { %9057 = vmatmul.mubr.msk.f32.vlgmr.msra.gmra.mrb[96].mxu0 %vm686_vm3, %v12063_v42  ;;  %9064 = vmatprep.subr.mxu0 %v12025_v2 }
 0x898   : > { %9066 = vmatprep.mubr.msk.f32.mxu0 %vm9670_vm2, %v12025_v2 }
 0x899   : > { %v6347_v0 = vpop.permute.xlu0 %6346 }
 0x89a   : > { %9060 = vmatpush3.msra.mxu1 %v6347_v0 }
 0x89b   : > { %9062 = vmatmul.mubr.msk.f32.vlgmr.msra.gmra.mrb[128].mxu1 %vm686_vm3, %v12064_v7  ;;  %9069 = vmatprep.subr.mxu1 %v12025_v2 }
 0x89c   : > { %9071 = vmatprep.mubr.msk.f32.mxu1 %vm9670_vm2, %v12025_v2 }
 0x89d   : > { %v6421_v32 = vpop.permute.xlu1 %6420 }
 0x89e   : > { %9065 = vmatpush3.msra.mxu0 %v6421_v32 }
 0x89f   : > { %9067 = vmatmul.mubr.msk.f32.vlgmr.msra.gmra.mrb[98].mxu0 %vm686_vm3, %v12065_v15  ;;  %9074 = vmatprep.subr.mxu0 %v12025_v2 }
 0x8a0   : > { %9076 = vmatprep.mubr.msk.f32.mxu0 %vm9670_vm2, %v12025_v2 }
 0x8a1   : > { %v6495_v10 = vpop.permute.xlu0 %6494 }
 0x8a2   : > { %9070 = vmatpush3.msra.mxu1 %v6495_v10 }
 0x8a3   : > { %9072 = vmatmul.mubr.msk.f32.vlgmr.msra.gmra.mrb[130].mxu1 %vm686_vm3, %v12066_v31  ;;  %9079 = vmatprep.subr.mxu1 %v12025_v2 }
 0x8a4   : > { %9081 = vmatprep.mubr.msk.f32.mxu1 %vm9670_vm2, %v12025_v2 }
 0x8a5   : > { %v6569_v6 = vpop.permute.xlu1 %6568 }
 0x8a6   : > { %9075 = vmatpush3.msra.mxu0 %v6569_v6 }
 0x8a7   : > { %9077 = vmatmul.mubr.msk.f32.vlgmr.msra.gmra.mrb[100].mxu0 %vm686_vm3, %v12067_v33  ;;  %9084 = vmatprep.subr.mxu0 %v12025_v2 }
 0x8a8   : > { %9086 = vmatprep.mubr.msk.f32.mxu0 %vm9670_vm2, %v12025_v2 }
 0x8a9   : > { %v6643_v37 = vpop.permute.xlu0 %6642 }
 0x8aa   : > { %9080 = vmatpush3.msra.mxu1 %v6643_v37 }
 0x8ab   : > { %9082 = vmatmul.mubr.msk.f32.vlgmr.msra.gmra.mrb[132].mxu1 %vm686_vm3, %v12068_v3  ;;  %9089 = vmatprep.subr.mxu1 %v12025_v2 }
 0x8ac   : > { %9091 = vmatprep.mubr.msk.f32.mxu1 %vm9670_vm2, %v12025_v2  ;;  %v12073_v2 = vld [vmem:[#allocation7_spill] sm:$0xff] }
 0x8ad   : > { %v6717_v38 = vpop.permute.xlu1 %6716 }
 0x8ae   : > { %9085 = vmatpush3.msra.mxu0 %v6717_v38 }
 0x8af   : > { %9087 = vmatmul.mubr.msk.f32.vlgmr.msra.gmra.mrb[102].mxu0 %vm686_vm3, %v12069_v16  ;;  %9239 = vmatprep.subr.bf16.mxu0 %v12070_v50 }
 0x8b0   : > { %9241 = vmatpush3.bf16.msra.mxu0 %v12070_v50 }
 0x8b1   : > { %v6791_v35 = vpop.permute.xlu0 %6790  ;;  %9243 = vmatprep.subr.bf16.mxu0 %v12071_v49 }
 0x8b2   : > { %9090 = vmatpush3.msra.mxu1 %v6791_v35 }
 0x8b3   : > { %9092 = vmatmul.mubr.msk.f32.vlgmr.msra.gmra.mrb[134].mxu1 %vm686_vm3, %v12072_v36  ;;  %9255 = vmatprep.subr.bf16.mxu1 %v10873_v29 }
 0x8b4   : > { %9245 = vmatpush3.bf16.msra.mxu0 %v12071_v49  ;;  %9257 = vmatpush3.bf16.msra.mxu1 %v10873_v29 }
 0x8b5   : > { %9259 = vmatprep.subr.bf16.mxu1 %v10871_v5  ;;  %9247 = vmatprep.subr.bf16.mxu0 %v12073_v2 }
 0x8b8   : > { %9261 = vmatpush3.bf16.msra.mxu1 %v10871_v5 }
 0x8d7   : > { %v11363_v13 = vpop.f32.mrb[64].mxu0 }
 0x8d8   : > { %v8938_v41 = vpop.f32.mrb[65].mxu0 }
 0x8db   : > { %v11365_v60 = vpop.f32.mrb[66].mxu0 }
 0x8dc   : > { %v8943_v42 = vpop.f32.mrb[67].mxu0 }
 0x8df   : > { %v11367_v0 = vpop.f32.mrb[68].mxu0 }
 0x8e0   : > { %v8948_v7 = vpop.f32.mrb[69].mxu0 }
 0x8e3   : > { %v11369_v32 = vpop.f32.mrb[70].mxu0 }
 0x8e4   : > { %v8953_v15 = vpop.f32.mrb[71].mxu0 }
 0x8e7   : > { %v11371_v10 = vpop.f32.mrb[72].mxu0 }
 0x8e8   : > { %v8958_v29 = vpop.f32.mrb[73].mxu0 }
 0x8eb   : > { %v11373_v31 = vpop.f32.mrb[74].mxu0 }
 0x8ec   : > { %v8963_v6 = vpop.f32.mrb[75].mxu0 }
 0x8ef   : > { %v11375_v33 = vpop.f32.mrb[76].mxu0 }
 0x8f0   : > { %v8968_v5 = vpop.f32.mrb[77].mxu0 }
 0x8f3   : > { %v11377_v37 = vpop.f32.mrb[78].mxu0 }
 0x8f4   : > { %v8973_v3 = vpop.f32.mrb[79].mxu0 }
 0x8f7   : > { %v11379_v38 = vpop.f32.mrb[80].mxu0 }
 0x8f8   : > { %v8978_v16 = vpop.f32.mrb[81].mxu0 }
 0x8fb   : > { %v11381_v50 = vpop.f32.mrb[112].mxu1 }
 0x8fc   : > { %v8983_v35 = vpop.f32.mrb[113].mxu1 }
 0x8ff   : > { %v11383_v49 = vpop.f32.mrb[82].mxu0 }
 0x900   : > { %v8988_v36 = vpop.f32.mrb[83].mxu0 }
 0x903   : > { %v11385_v41 = vpop.f32.mrb[114].mxu1 }
 0x904   : > { %v8993_v42 = vpop.f32.mrb[115].mxu1 }
 0x905   : > { %v12074_v42 = vld [vmem:[#allocation6_spill] sm:$0xff] }
 0x907   : > { %v11387_v7 = vpop.f32.mrb[84].mxu0 }
 0x908   : > { %v8998_v15 = vpop.f32.mrb[85].mxu0 }
 0x90b   : > { %v11389_v29 = vpop.f32.mrb[116].mxu1 }
 0x90c   : > { %v9003_v6 = vpop.f32.mrb[117].mxu1 }
 0x90f   : > { %v11391_v5 = vpop.f32.mrb[86].mxu0 }
 0x910   : > { %v9008_v3 = vpop.f32.mrb[87].mxu0 }
 0x913   : > { %v11393_v47 = vpop.f32.mrb[118].mxu1 }
 0x914   : > { %v9013_v16 = vpop.f32.mrb[119].mxu1 }
 0x94a   : > { %v5749_v28 = vpop.f32.mrb[88].mxu0 }
 0x94b   : > { %v9018_v35 = vpop.f32.mrb[89].mxu0  ;;  %9102 = vmatprep.mubr.msk.f32.mxu0 %vm320_vm0, %v5749_v28 }
 0x94e   : > { %v5823_v36 = vpop.f32.mrb[120].mxu1 }
 0x94f   : > { %v9023_v43 = vpop.f32.mrb[121].mxu1  ;;  %9103 = vmatmul.mubr.msk.f32.vlgmr.msra.gmra.mrb[104].mxu0 %vm320_vm0, %v5823_v36 }
 0x950   : > { %9249 = vmatpush3.bf16.msra.mxu0 %v12073_v2 }
 0x951   : > { %9251 = vmatprep.subr.bf16.mxu0 %v12074_v42 }
 0x952   : > { %v5897_v15 = vpop.f32.mrb[90].mxu0 }
 0x953   : > { %v9028_v6 = vpop.f32.mrb[91].mxu0  ;;  %9105 = vmatprep.mubr.msk.f32.mxu0 %vm320_vm0, %v5897_v15 }
 0x954   : > { %9253 = vmatpush3.bf16.msra.mxu0 %v12074_v42 }
 0x956   : > { %v5971_v3 = vpop.f32.mrb[122].mxu1 }
 0x957   : > { %v9033_v16 = vpop.f32.mrb[123].mxu1  ;;  %9106 = vmatmul.mubr.msk.f32.gmra.mrb[106].mxu0 %vm320_vm0, %v5971_v3 }
 0x95a   : > { %v6045_v35 = vpop.f32.mrb[92].mxu0 }
 0x95b   : > { %v9038_v28 = vpop.f32.mrb[93].mxu0  ;;  %9108 = vmatprep.mubr.msk.f32.mxu0 %vm320_vm0, %v6045_v35 }
 0x95e   : > { %v6119_v43 = vpop.f32.mrb[124].mxu1 }
 0x95f   : > { %v9043_v36 = vpop.f32.mrb[125].mxu1  ;;  %9109 = vmatmul.mubr.msk.f32.gmra.mrb[108].mxu0 %vm320_vm0, %v6119_v43 }
 0x962   : > { %v6193_v2 = vpop.f32.mrb[94].mxu0 }
 0x963   : > { %v9048_v58 = vpop.f32.mrb[95].mxu0  ;;  %9111 = vmatprep.mubr.msk.f32.mxu0 %vm320_vm0, %v6193_v2 }
 0x966   : > { %v6267_v6 = vpop.f32.mrb[126].mxu1 }
 0x967   : > { %v9053_v15 = vpop.f32.mrb[127].mxu1  ;;  %9112 = vmatmul.mubr.msk.f32.gmra.mrb[110].mxu0 %vm320_vm0, %v6267_v6 }
 0x96a   : > { %v6341_v42 = vpop.f32.mrb[96].mxu0 }
 0x96b   : > { %v9058_v16 = vpop.f32.mrb[97].mxu0  ;;  %9114 = vmatprep.mubr.msk.f32.mxu0 %vm320_vm0, %v6341_v42 }
 0x96e   : > { %v6415_v3 = vpop.f32.mrb[128].mxu1 }
 0x96f   : > { %v9063_v28 = vpop.f32.mrb[129].mxu1  ;;  %9115 = vmatmul.mubr.msk.f32.gmra.mrb[112].mxu0 %vm320_vm0, %v6415_v3 }
 0x972   : > { %v6489_v35 = vpop.f32.mrb[98].mxu0 }
 0x973   : > { %v9068_v36 = vpop.f32.mrb[99].mxu0  ;;  %9117 = vmatprep.mubr.msk.f32.mxu0 %vm320_vm0, %v6489_v35 }
 0x976   : > { %v6563_v43 = vpop.f32.mrb[130].mxu1 }
 0x977   : > { %v9073_v58 = vpop.f32.mrb[131].mxu1  ;;  %9118 = vmatmul.mubr.msk.f32.gmra.mrb[114].mxu0 %vm320_vm0, %v6563_v43 }
 0x97a   : > { %v6637_v2 = vpop.f32.mrb[100].mxu0 }
 0x97b   : > { %v9078_v15 = vpop.f32.mrb[101].mxu0  ;;  %9120 = vmatprep.mubr.msk.f32.mxu0 %vm320_vm0, %v6637_v2 }
 0x97e   : > { %v6711_v6 = vpop.f32.mrb[132].mxu1 }
 0x97f   : > { %v9083_v16 = vpop.f32.mrb[133].mxu1  ;;  %9121 = vmatmul.mubr.msk.f32.gmra.mrb[116].mxu0 %vm320_vm0, %v6711_v6 }
 0x982   : > { %v6785_v42 = vpop.f32.mrb[102].mxu0 }
 0x983   : > { %v9088_v28 = vpop.f32.mrb[103].mxu0  ;;  %9123 = vmatprep.mubr.msk.f32.mxu0 %vm320_vm0, %v6785_v42 }
 0x986   : > { %v6859_v3 = vpop.f32.mrb[134].mxu1 }
 0x987   : > { %v9093_v36 = vpop.f32.mrb[135].mxu1  ;;  %9124 = vmatmul.mubr.msk.f32.gmra.mrb[118].mxu0 %vm320_vm0, %v6859_v3 }
 0x988   : > { %9134 = vmatprep.mubr.msk.f32.mxu0 %vm320_vm0, %v11363_v13  ;;  %v7284_v13 = vpop.permute.xlu0 %7283 }
 0x98b   : > { %9135 = vmatmul.mubr.msk.f32.vlgmr.msra.gmra.mrb[104].mxu0 %vm320_vm0, %v11365_v60  ;;  %v7282_v60 = vpop.permute.xlu1 %7281 }
 0x98c   : > { %9137 = vmatprep.mubr.msk.f32.mxu0 %vm320_vm0, %v11367_v0  ;;  %v7288_v0 = vpop.permute.xlu0 %7287 }
 0x98f   : > { %9138 = vmatmul.mubr.msk.f32.gmra.mrb[106].mxu0 %vm320_vm0, %v11369_v32  ;;  %v7286_v32 = vpop.permute.xlu1 %7285 }
 0x990   : > { %9140 = vmatprep.mubr.msk.f32.mxu0 %vm320_vm0, %v11371_v10 }
 0x993   : > { %9141 = vmatmul.mubr.msk.f32.gmra.mrb[108].mxu0 %vm320_vm0, %v11373_v31  ;;  %v12075_v31 = vld [vmem:[#allocation29_spill] sm:$0xff] }
 0x994   : > { %9143 = vmatprep.mubr.msk.f32.mxu0 %vm320_vm0, %v11375_v33 }
 0x997   : > { %9144 = vmatmul.mubr.msk.f32.gmra.mrb[110].mxu0 %vm320_vm0, %v11377_v37 }
 0x998   : > { %9146 = vmatprep.mubr.msk.f32.mxu0 %vm320_vm0, %v11379_v38  ;;  %v7292_v38 = vpop.permute.xlu0 %7291 }
 0x99b   : > { %9147 = vmatmul.mubr.msk.f32.gmra.mrb[112].mxu0 %vm320_vm0, %v11381_v50 }
 0x99c   : > { %9149 = vmatprep.mubr.msk.f32.mxu0 %vm320_vm0, %v11383_v49  ;;  %v7290_v49 = vpop.permute.xlu1 %7289  ;;  %v7296_v6 = vpop.permute.xlu0 %7295 }
 0x99f   : > { %9150 = vmatmul.mubr.msk.f32.gmra.mrb[114].mxu0 %vm320_vm0, %v11385_v41 }
 0x9a0   : > { %9152 = vmatprep.mubr.msk.f32.mxu0 %vm320_vm0, %v11387_v7  ;;  %v7294_v42 = vpop.permute.xlu1 %7293 }
 0x9a3   : > { %9153 = vmatmul.mubr.msk.f32.gmra.mrb[116].mxu0 %vm320_vm0, %v11389_v29 }
 0x9a4   : > { %9155 = vmatprep.mubr.msk.f32.mxu0 %vm320_vm0, %v11391_v5 }
 0x9a7   : > { %9156 = vmatmul.mubr.msk.f32.gmra.mrb[118].mxu0 %vm320_vm0, %v11393_v47 }
 0xa5e   : > { %v9136_v10 = vpop.f32.mrb[104].mxu0 }
 0xa5f   : > { %v7250_v33 = vadd.f32 %v9136_v10, %v12075_v31  ;;  %v7170_v37 = vpop.f32.mrb[105].mxu0 }
 0xa60   : > { %v7249_v50 = vadd.f32 %v7170_v37, %v12075_v31 }
 0xa61   : > { %v11449_v41 = vadd.f32 %v7250_v33, %v10443_v20 }
 0xa62   : > { %v11452_v7 = vadd.f32 %v7249_v50, %v10448_v8  ;;  %v9139_v29 = vpop.f32.mrb[106].mxu0 }
 0xa63   : > { %v7330_v47 = vadd.f32 %v7284_v13, %v11449_v41  ;;  %v7252_v5 = vadd.f32 %v9139_v29, %v12075_v31  ;;  %v7180_v35 = vpop.f32.mrb[107].mxu0 }
 0xa64   : > { %v7329_v43 = vadd.f32 %v7282_v60, %v11452_v7  ;;  %v7251_v58 = vadd.f32 %v7180_v35, %v12075_v31  ;;  %v7298_v35 = vpop.permute.xlu1 %7297 }
 0xa65   : > { %v8341_v2 = vmul.f32 -1.442695, %v7330_v47  ;;  %v11459_v15 = vadd.f32 %v7252_v5, %v10459_v12  ;;  %v7300_v47 = vpop.permute.xlu0 %7299 }
 0xa66   : > { %v8340_v20 = vmul.f32 -1.442695, %v7329_v43  ;;  %v11462_v16 = vadd.f32 %v7251_v58, %v10465_v44  ;;  %v9142_v8 = vpop.f32.mrb[108].mxu0 }
 0xa67   : > { %9471 = vpow2.f32 %v8341_v2  ;;  %v7332_v28 = vadd.f32 %v7288_v0, %v11459_v15  ;;  %v7254_v3 = vadd.f32 %v9142_v8, %v12075_v31  ;;  %v7190_v36 = vpop.f32.mrb[109].mxu0 }
 0xa68   : > { %9473 = vpow2.f32 %v8340_v20  ;;  %v7331_v13 = vadd.f32 %v7286_v32, %v11462_v16  ;;  %v7253_v60 = vadd.f32 %v7190_v36, %v12075_v31 }
 0xa69   : > { %v8343_v12 = vmul.f32 -1.442695, %v7332_v28  ;;  %v11469_v10 = vadd.f32 %v7254_v3, %v10477_v24 }
 0xa6a   : > { %v8342_v33 = vmul.f32 -1.442695, %v7331_v13  ;;  %v11472_v44 = vadd.f32 %v7253_v60, %v10483_v61  ;;  %v9145_v37 = vpop.f32.mrb[110].mxu0 }
 0xa6b   : > { %9475 = vpow2.f32 %v8343_v12  ;;  %v7334_v0 = vadd.f32 %v7292_v38, %v11469_v10  ;;  %v7256_v50 = vadd.f32 %v9145_v37, %v12075_v31  ;;  %v7200_v29 = vpop.f32.mrb[111].mxu0  ;;  %v7302_v37 = vpop.permute.xlu1 %7301 }
 0xa6c   : > { %9477 = vpow2.f32 %v8342_v33  ;;  %v7333_v32 = vadd.f32 %v7290_v49, %v11472_v44  ;;  %v7255_v5 = vadd.f32 %v7200_v29, %v12075_v31 }
 0xa6d   : > { %v8345_v24 = vmul.f32 -1.442695, %v7334_v0  ;;  %v11479_v43 = vadd.f32 %v7256_v50, %v10495_v14 }
 0xa6e   : > { %v8344_v61 = vmul.f32 -1.442695, %v7333_v32  ;;  %v11482_v58 = vadd.f32 %v7255_v5, %v10501_v34  ;;  %v9148_v2 = vpop.f32.mrb[112].mxu0  ;;  %v7304_v34 = vpop.permute.xlu0 %7303 }
 0xa6f   : > { %9479 = vpow2.f32 %v8345_v24  ;;  %v7336_v38 = vadd.f32 %v7296_v6, %v11479_v43  ;;  %v7258_v20 = vadd.f32 %v9148_v2, %v12075_v31  ;;  %v7210_v8 = vpop.f32.mrb[113].mxu0 }
 0xa70   : > { %9481 = vpow2.f32 %v8344_v61  ;;  %v7335_v49 = vadd.f32 %v7294_v42, %v11482_v58  ;;  %v7257_v28 = vadd.f32 %v7210_v8, %v12075_v31 }
 0xa71   : > { %v9472_v3 = vpop.eup %9471  ;;  %v8347_v36 = vmul.f32 -1.442695, %v7336_v38  ;;  %v11489_v14 = vadd.f32 %v7258_v20, %v10514_v19 }
 0xa72   : > { %v9474_v13 = vpop.eup %9473  ;;  %v7394_v60 = vadd.f32 1.0, %v9472_v3  ;;  %v8346_v12 = vmul.f32 -1.442695, %v7335_v49  ;;  %v11492_v33 = vadd.f32 %v7257_v28, %v10520_v23  ;;  %v9151_v6 = vpop.f32.mrb[114].mxu0 }
 0xa73   : > { %v7393_v0 = vadd.f32 1.0, %v9474_v13  ;;  %9483 = vpow2.f32 %v8347_v36  ;;  %v7338_v42 = vadd.f32 %v7300_v47, %v11489_v14  ;;  %v7260_v50 = vadd.f32 %v9151_v6, %v12075_v31  ;;  %v7220_v29 = vpop.f32.mrb[115].mxu0  ;;  %v7308_v3 = vpop.permute.xlu0 %7307 }
 0xa74   : > { %9485 = vrcp.f32 %v7394_v60  ;;  %v7337_v19 = vadd.f32 %v7298_v35, %v11492_v33  ;;  %v7259_v32 = vadd.f32 %v7220_v29, %v12075_v31  ;;  %v7306_v60 = vpop.permute.xlu1 %7305 }
 0xa75   : > { %v9476_v5 = vpop.eup %9475  ;;  %9487 = vrcp.f32 %v7393_v0  ;;  %v8349_v24 = vmul.f32 -1.442695, %v7338_v42  ;;  %v11499_v23 = vadd.f32 %v7260_v50, %v12020_v9 }
 0xa76   : > { %v9478_v61 = vpop.eup %9477  ;;  %v7396_v2 = vadd.f32 1.0, %v9476_v5  ;;  %9489 = vpow2.f32 %v8346_v12  ;;  %v8348_v38 = vmul.f32 -1.442695, %v7337_v19  ;;  %v11502_v47 = vadd.f32 %v7259_v32, %v12021_v59  ;;  %v9154_v20 = vpop.f32.mrb[116].mxu0 }
 0xa77   : > { %v7395_v8 = vadd.f32 1.0, %v9478_v61  ;;  %9491 = vpow2.f32 %v8349_v24  ;;  %v7340_v35 = vadd.f32 %v7304_v34, %v11499_v23  ;;  %v7262_v49 = vadd.f32 %v9154_v20, %v12075_v31  ;;  %v7230_v28 = vpop.f32.mrb[117].mxu0 }
 0xa78   : > { %9493 = vrcp.f32 %v7396_v2  ;;  %v7339_v9 = vadd.f32 %v7302_v37, %v11502_v47  ;;  %v7261_v36 = vadd.f32 %v7230_v28, %v12075_v31  ;;  %v4467_v5 = vadd.f32 %v11068_v11, %v9986_v26 }
 0xa79   : > { %v9480_v13 = vpop.eup %9479  ;;  %9495 = vrcp.f32 %v7395_v8  ;;  %v8351_v12 = vmul.f32 -1.442695, %v7340_v35  ;;  %v11509_v59 = vadd.f32 %v7262_v49, %v10550_v22  ;;  %v7312_v8 = vpop.permute.xlu0 %7311 }
 0xa7a   : > { %v9482_v6 = vpop.eup %9481  ;;  %v7398_v0 = vadd.f32 1.0, %v9480_v13  ;;  %9497 = vpow2.f32 %v8348_v38  ;;  %v8350_v34 = vmul.f32 -1.442695, %v7339_v9  ;;  %v11512_v42 = vadd.f32 %v7261_v36, %v10560_v27  ;;  %v9157_v50 = vpop.f32.mrb[118].mxu0 }
 0xa7b   : > { %v7397_v29 = vadd.f32 1.0, %v9482_v6  ;;  %9499 = vpow2.f32 %v8351_v12  ;;  %v7342_v37 = vadd.f32 %v7308_v3, %v11509_v59  ;;  %v7264_v19 = vadd.f32 %v9157_v50, %v12075_v31  ;;  %v7240_v32 = vpop.f32.mrb[119].mxu0 }
 0xa7c   : > { %9501 = vrcp.f32 %v7398_v0  ;;  %v7341_v22 = vadd.f32 %v7306_v60, %v11512_v42  ;;  %v7263_v24 = vadd.f32 %v7240_v32, %v12075_v31  ;;  %v4473_v27 = vadd.f32 %v11079_v54, %v9986_v26  ;;  %v7310_v31 = vpop.permute.xlu1 %7309 }
 0xa7d   : > { %v9484_v61 = vpop.eup %9483  ;;  %9503 = vrcp.f32 %v7397_v29  ;;  %v8353_v2 = vmul.f32 -1.442695, %v7342_v37  ;;  %v11523_v38 = vadd.f32 %v7264_v19, %v10568_v56  ;;  %v4485_v60 = vadd.f32 %v11105_v1, %v9986_v26 }
 0xa7e   : > { %v11525_v20 = vpop.eup %9485  ;;  %v7400_v35 = vadd.f32 1.0, %v9484_v61  ;;  %9505 = vpow2.f32 %v8350_v34  ;;  %v8352_v11 = vmul.f32 -1.442695, %v7341_v22  ;;  %v11528_v49 = vadd.f32 %v7263_v24, %v10578_v18 }
 0xa7f   : > { %v11530_v28 = vpop.eup %9487  ;;  %9507 = vpow2.f32 %v8353_v2  ;;  %v7344_v54 = vadd.f32 %v7312_v8, %v11523_v38  ;;  %v7442_v3 = vmul.f32 %v11525_v20, %v4473_v27  ;;  %v4479_v0 = vadd.f32 %v11092_v21, %v9986_v26 }
 0xa80   : > { %v9490_v9 = vpop.eup %9489  ;;  %9509 = vrcp.f32 %v7400_v35  ;;  %v7343_v56 = vadd.f32 %v7310_v31, %v11528_v49  ;;  %v7441_v36 = vmul.f32 %v11530_v28, %v4467_v5  ;;  %v4497_v5 = vadd.f32 %v11131_v17, %v9986_v26 }
 0xa81   : > { %v9492_v13 = vpop.eup %9491  ;;  %v7399_v18 = vadd.f32 1.0, %v9490_v9  ;;  %9511 = vpow2.f32 %v8352_v11  ;;  %v8355_v12 = vmul.f32 -1.442695, %v7344_v54  ;;  %7475 = vrot.lane.b32.xlu0 %v7442_v3, %s9671_s7  ;;  %v4491_v24 = vadd.f32 %v11118_v62, %v9986_v26 }
 0xa82   : > { %v11539_v6 = vpop.eup %9493  ;;  %v7402_v34 = vadd.f32 1.0, %v9492_v13  ;;  %v8354_v50 = vmul.f32 -1.442695, %v7343_v56  ;;  %7473 = vrot.lane.b32.xlu1 %v7441_v36, %s9671_s7  ;;  %v4509_v11 = vadd.f32 %v11157_v55, %v9986_v26  ;;  %v4503_v56 = vadd.f32 %v11144_v52, %v9986_v26 }
 0xa83   : > { %v11544_v29 = vpop.eup %9495  ;;  %9513 = vrcp.f32 %v7399_v18  ;;  %v7444_v37 = vmul.f32 %v11539_v6, %v4485_v60  ;;  %v4521_v55 = vadd.f32 %v11183_v63, %v9986_v26  ;;  %v4515_v52 = vadd.f32 %v11170_v46, %v9986_v26 }
 0xa84   : > { %v9498_v1 = vpop.eup %9497  ;;  %9515 = vrcp.f32 %v7402_v34  ;;  %v7443_v19 = vmul.f32 %v11544_v29, %v4479_v0  ;;  %v4533_v63 = vadd.f32 %v11207_v45, %v9986_v26  ;;  %v4527_v46 = vadd.f32 %v11196_v40, %v9986_v26 }
 0xa85   : > { %v9500_v32 = vpop.eup %9499  ;;  %v7401_v22 = vadd.f32 1.0, %v9498_v1  ;;  %9517 = vpow2.f32 %v8355_v12  ;;  %7479 = vrot.lane.b32.xlu0 %v7444_v37, %s9671_s7  ;;  %v4545_v45 = vadd.f32 %v11225_v53, %v9986_v26  ;;  %v4557_v53 = vadd.f32 %v11243_v30, %v9986_v26 }
 0xa86   : > { %v11551_v21 = vpop.eup %9501  ;;  %v7404_v61 = vadd.f32 1.0, %v9500_v32  ;;  %9519 = vpow2.f32 %v8354_v50  ;;  %7477 = vrot.lane.b32.xlu1 %v7443_v19, %s9671_s7 }
 0xa87   : > { %v11556_v27 = vpop.eup %9503  ;;  %9521 = vrcp.f32 %v7401_v22  ;;  %v7446_v2 = vmul.f32 %v11551_v21, %v4497_v5 }
 0xa88   : > { %v9506_v8 = vpop.eup %9505  ;;  %9523 = vrcp.f32 %v7404_v61  ;;  %v7445_v17 = vmul.f32 %v11556_v27, %v4491_v24 }
 0xa89   : > { %v9508_v35 = vpop.eup %9507  ;;  %v7403_v31 = vadd.f32 1.0, %v9506_v8  ;;  %7483 = vrot.lane.b32.xlu0 %v7446_v2, %s9671_s7  ;;  %v4539_v2 = vadd.f32 %v11216_v4, %v9986_v26 }
 0xa8a   : > { %v11563_v62 = vpop.eup %9509  ;;  %v7406_v54 = vadd.f32 1.0, %v9508_v35  ;;  %7481 = vrot.lane.b32.xlu1 %v7445_v17, %s9671_s7 }
 0xa8b   : > { %v9512_v3 = vpop.eup %9511  ;;  %9525 = vrcp.f32 %v7403_v31  ;;  %v7448_v9 = vmul.f32 %v11563_v62, %v4509_v11  ;;  %v4551_v11 = vadd.f32 %v11234_v39, %v9986_v26 }
 0xa8c   : > { %9527 = vrcp.f32 %v7406_v54  ;;  %v7405_v36 = vadd.f32 1.0, %v9512_v3 }
 0xa8d   : > { %v11569_v13 = vpop.eup %9513  ;;  %7487 = vrot.lane.b32.xlu0 %v7448_v9, %s9671_s7 }
 0xa8e   : > { %v11574_v60 = vpop.eup %9515  ;;  %9529 = vrcp.f32 %v7405_v36  ;;  %v7447_v18 = vmul.f32 %v11569_v13, %v4503_v56 }
 0xa8f   : > { %v9518_v12 = vpop.eup %9517  ;;  %v7450_v0 = vmul.f32 %v11574_v60, %v4521_v55 }
 0xa90   : > { %v9520_v34 = vpop.eup %9519  ;;  %v7408_v50 = vadd.f32 1.0, %v9518_v12  ;;  %7485 = vrot.lane.b32.xlu1 %v7447_v18, %s9671_s7 }
 0xa91   : > { %v11581_v37 = vpop.eup %9521  ;;  %v7407_v1 = vadd.f32 1.0, %v9520_v34  ;;  %7491 = vrot.lane.b32.xlu0 %v7450_v0, %s9671_s7 }
 0xa92   : > { %v11586_v19 = vpop.eup %9523  ;;  %9531 = vrcp.f32 %v7408_v50  ;;  %v7449_v32 = vmul.f32 %v11581_v37, %v4515_v52 }
 0xa93   : > { %9533 = vrcp.f32 %v7407_v1  ;;  %v7452_v5 = vmul.f32 %v11586_v19, %v4533_v63 }
 0xa94   : > { %7489 = vrot.lane.b32.xlu1 %v7449_v32, %s9671_s7 }
 0xa95   : > { %v11593_v22 = vpop.eup %9525  ;;  %7495 = vrot.lane.b32.xlu0 %v7452_v5, %s9671_s7 }
 0xa96   : > { %v11598_v24 = vpop.eup %9527  ;;  %v7451_v61 = vmul.f32 %v11593_v22, %v4527_v46 }
 0xa97   : > { %v7454_v8 = vmul.f32 %v11598_v24, %v4545_v45 }
 0xa98   : > { %v11604_v17 = vpop.eup %9529  ;;  %7493 = vrot.lane.b32.xlu1 %v7451_v61, %s9671_s7 }
 0xa99   : > { %7499 = vrot.lane.b32.xlu0 %v7454_v8, %s9671_s7  ;;  %v7453_v40 = vmul.f32 %v11604_v17, %v4539_v2 }
 0xa9c   : > { %v11611_v35 = vpop.eup %9531  ;;  %7497 = vrot.lane.b32.xlu1 %v7453_v40, %s9671_s7 }
 0xa9d   : > { %v11616_v4 = vpop.eup %9533  ;;  %v7456_v31 = vmul.f32 %v11611_v35, %v4557_v53 }
 0xa9e   : > { %v7455_v54 = vmul.f32 %v11616_v4, %v4551_v11 }
 0xa9f   : > { %7503 = vrot.lane.b32.xlu0 %v7456_v31, %s9671_s7 }
 0xaa0   : > { %7501 = vrot.lane.b32.xlu1 %v7455_v54, %s9671_s7 }
 0xaf3   : > { %v7476_v3 = vpop.permute.xlu0 %7475 }
 0xaf4   : > { %v7522_v30 = vadd.f32 %v7476_v3, %v11449_v41  ;;  %v7474_v9 = vpop.permute.xlu1 %7473 }
 0xaf5   : > { %v7521_v56 = vadd.f32 %v7474_v9, %v11452_v7 }
 0xaf6   : > { %9535 = vtanh.f32 %v7522_v30 }
 0xaf7   : > { %9537 = vtanh.f32 %v7521_v56  ;;  %v7480_v26 = vpop.permute.xlu0 %7479 }
 0xaf8   : > { %v7524_v39 = vadd.f32 %v7480_v26, %v11459_v15  ;;  %v7478_v36 = vpop.permute.xlu1 %7477 }
 0xaf9   : > { %v7523_v55 = vadd.f32 %v7478_v36, %v11462_v16 }
 0xafa   : > { %9539 = vtanh.f32 %v7524_v39 }
 0xafb   : > { %9541 = vtanh.f32 %v7523_v55  ;;  %v7484_v18 = vpop.permute.xlu0 %7483 }
 0xafc   : > { %v7526_v12 = vadd.f32 %v7484_v18, %v11469_v10  ;;  %v7482_v0 = vpop.permute.xlu1 %7481 }
 0xafd   : > { %v7525_v34 = vadd.f32 %v7482_v0, %v11472_v44 }
 0xafe   : > { %9543 = vtanh.f32 %v7526_v12 }
 0xaff   : > { %9545 = vtanh.f32 %v7525_v34  ;;  %v7488_v41 = vpop.permute.xlu0 %7487 }
 0xb00   : > { %v11628_v7 = vpop.eup %9535  ;;  %v7528_v52 = vadd.f32 %v7488_v41, %v11479_v43 }
 0xb01   : > { %v11631_v50 = vpop.eup %9537  ;;  %7571 = vrot.lane.b32.xlu0 %v11628_v7, %s9671_s7 }
 0xb02   : > { %9547 = vtanh.f32 %v7528_v52  ;;  %v7486_v15 = vpop.permute.xlu1 %7485  ;;  %7569 = vrot.lane.b32.xlu1 %v11631_v50, %s9671_s7  ;;  %v12076_v52 = vld [vmem:[#allocation34_spill] sm:$0xff] }
 0xb03   : > { %v7527_v16 = vadd.f32 %v7486_v15, %v11482_v58  ;;  %v7492_v10 = vpop.permute.xlu0 %7491 }
 0xb04   : > { %v11638_v44 = vpop.eup %9539  ;;  %v7530_v63 = vadd.f32 %v7492_v10, %v11489_v14 }
 0xb05   : > { %v11641_v1 = vpop.eup %9541  ;;  %9549 = vtanh.f32 %v7527_v16  ;;  %7575 = vrot.lane.b32.xlu0 %v11638_v44, %s9671_s7  ;;  %v12077_v16 = vld [vmem:[#allocation32_spill] sm:$0xff] }
 0xb06   : > { %9551 = vtanh.f32 %v7530_v63  ;;  %v7490_v43 = vpop.permute.xlu1 %7489  ;;  %7573 = vrot.lane.b32.xlu1 %v11641_v1, %s9671_s7  ;;  %v12078_v63 = vld [vmem:[#allocation38_spill] sm:$0xff] }
 0xb07   : > { %v7529_v32 = vadd.f32 %v7490_v43, %v11492_v33  ;;  %v7496_v5 = vpop.permute.xlu0 %7495 }
 0xb08   : > { %v11648_v58 = vpop.eup %9543  ;;  %v7532_v46 = vadd.f32 %v7496_v5, %v11499_v23 }
 0xb09   : > { %v11651_v45 = vpop.eup %9545  ;;  %9553 = vtanh.f32 %v7529_v32  ;;  %7579 = vrot.lane.b32.xlu0 %v11648_v58, %s9671_s7 }
 0xb0a   : > { %9555 = vtanh.f32 %v7532_v46  ;;  %v7494_v14 = vpop.permute.xlu1 %7493  ;;  %7577 = vrot.lane.b32.xlu1 %v11651_v45, %s9671_s7  ;;  %v12080_v46 = vld [vmem:[#allocation42_spill] sm:$0xff] }
 0xb0b   : > { %v7531_v61 = vadd.f32 %v7494_v14, %v11502_v47  ;;  %v7500_v2 = vpop.permute.xlu0 %7499 }
 0xb0c   : > { %v11658_v33 = vpop.eup %9547  ;;  %v7534_v8 = vadd.f32 %v7500_v2, %v11509_v59  ;;  %v12081_v2 = vld [vmem:[#allocation40_spill] sm:$0xff] }
 0xb0d   : > { %9557 = vtanh.f32 %v7531_v61  ;;  %7583 = vrot.lane.b32.xlu0 %v11658_v33, %s9671_s7 }
 0xb0e   : > { %9559 = vtanh.f32 %v7534_v8  ;;  %v7498_v23 = vpop.permute.xlu1 %7497 }
 0xb0f   : > { %v11663_v40 = vpop.eup %9549  ;;  %v7533_v53 = vadd.f32 %v7498_v23, %v11512_v42 }
 0xb10   : > { %v11666_v11 = vpop.eup %9551  ;;  %7581 = vrot.lane.b32.xlu1 %v11663_v40, %s9671_s7 }
 0xb11   : > { %9561 = vtanh.f32 %v7533_v53  ;;  %v7504_v47 = vpop.permute.xlu0 %7503  ;;  %7587 = vrot.lane.b32.xlu0 %v11666_v11, %s9671_s7  ;;  %v12082_v53 = vld [vmem:[#allocation46_spill] sm:$0xff] }
 0xb12   : > { %v7536_v59 = vadd.f32 %v7504_v47, %v11523_v38  ;;  %v7502_v31 = vpop.permute.xlu1 %7501 }
 0xb13   : > { %v11673_v54 = vpop.eup %9553  ;;  %v7535_v3 = vadd.f32 %v7502_v31, %v11528_v49  ;;  %v12083_v31 = vld [vmem:[#allocation44_spill] sm:$0xff] }
 0xb14   : > { %v11676_v30 = vpop.eup %9555  ;;  %9563 = vtanh.f32 %v7536_v59  ;;  %7585 = vrot.lane.b32.xlu1 %v11673_v54, %s9671_s7 }
 0xb15   : > { %9565 = vtanh.f32 %v7535_v3  ;;  %7591 = vrot.lane.b32.xlu0 %v11676_v30, %s9671_s7 }
 0xb17   : > { %v11682_v42 = vpop.eup %9557 }
 0xb18   : > { %v11684_v9 = vpop.eup %9559  ;;  %7589 = vrot.lane.b32.xlu1 %v11682_v42, %s9671_s7 }
 0xb19   : > { %7595 = vrot.lane.b32.xlu0 %v11684_v9, %s9671_s7 }
 0xb1b   : > { %v11690_v38 = vpop.eup %9561 }
 0xb1c   : > { %7593 = vrot.lane.b32.xlu1 %v11690_v38, %s9671_s7 }
 0xb1e   : > { %v11694_v49 = vpop.eup %9563 }
 0xb1f   : > { %v11696_v56 = vpop.eup %9565  ;;  %7599 = vrot.lane.b32.xlu0 %v11694_v49, %s9671_s7 }
 0xb20   : > { %7597 = vrot.lane.b32.xlu1 %v11696_v56, %s9671_s7 }
 0xb73   : > { %v7572_v26 = vpop.permute.xlu0 %7571 }
 0xb74   : > { %v7618_v39 = vsub.f32 %v10947_v48, %v7572_v26  ;;  %v7570_v36 = vpop.permute.xlu1 %7569 }
 0xb75   : > { %v7617_v55 = vsub.f32 %v10939_v51, %v7570_v36 }
 0xb76   : > { %7651 = vrot.lane.b32.xlu0 %v7618_v39, %s9672_s29  ;;  %v12084_v39 = vld [vmem:[#allocation50_spill] sm:$0xff] }
 0xb77   : > { %v7576_v18 = vpop.permute.xlu0 %7575  ;;  %7649 = vrot.lane.b32.xlu1 %v7617_v55, %s9672_s29 }
 0xb78   : > { %v7620_v12 = vsub.f32 %v10963_v25, %v7576_v18  ;;  %v7574_v0 = vpop.permute.xlu1 %7573  ;;  %v12085_v18 = vld [vmem:[#allocation48_spill] sm:$0xff] }
 0xb79   : > { %v7619_v34 = vsub.f32 %v10955_v57, %v7574_v0  ;;  %v12079_v57 = vld [vmem:[#allocation36_spill] sm:$0xff] }
 0xb7a   : > { %7655 = vrot.lane.b32.xlu0 %v7620_v12, %s9672_s29 }
 0xb7b   : > { %v7580_v41 = vpop.permute.xlu0 %7579  ;;  %7653 = vrot.lane.b32.xlu1 %v7619_v34, %s9672_s29  ;;  %v12086_v34 = vld [vmem:[#allocation54_spill] sm:$0xff] }
 0xb7c   : > { %v7622_v48 = vsub.f32 %v12076_v52, %v7580_v41  ;;  %v7578_v15 = vpop.permute.xlu1 %7577 }
 0xb7d   : > { %v7621_v51 = vsub.f32 %v12077_v16, %v7578_v15 }
 0xb7e   : > { %7659 = vrot.lane.b32.xlu0 %v7622_v48, %s9672_s29  ;;  %v12087_v48 = vld [vmem:[#allocation52_spill] sm:$0xff] }
 0xb7f   : > { %v7584_v10 = vpop.permute.xlu0 %7583  ;;  %7657 = vrot.lane.b32.xlu1 %v7621_v51, %s9672_s29 }
 0xb80   : > { %v7624_v25 = vsub.f32 %v12078_v63, %v7584_v10 }
 0xb82   : > { %v7582_v43 = vpop.permute.xlu1 %7581  ;;  %7663 = vrot.lane.b32.xlu0 %v7624_v25, %s9672_s29 }
 0xb83   : > { %v7623_v32 = vsub.f32 %v12079_v57, %v7582_v43  ;;  %v7588_v5 = vpop.permute.xlu0 %7587 }
 0xb84   : > { %v7626_v14 = vsub.f32 %v12080_v46, %v7588_v5 }
 0xb85   : > { %7661 = vrot.lane.b32.xlu1 %v7623_v32, %s9672_s29 }
 0xb86   : > { %v7586_v61 = vpop.permute.xlu1 %7585  ;;  %7667 = vrot.lane.b32.xlu0 %v7626_v14, %s9672_s29 }
 0xb87   : > { %v7625_v8 = vsub.f32 %v12081_v2, %v7586_v61  ;;  %v7592_v23 = vpop.permute.xlu0 %7591 }
 0xb88   : > { %v7628_v47 = vsub.f32 %v12082_v53, %v7592_v23 }
 0xb89   : > { %7665 = vrot.lane.b32.xlu1 %v7625_v8, %s9672_s29 }
 0xb8a   : > { %v7590_v59 = vpop.permute.xlu1 %7589  ;;  %7671 = vrot.lane.b32.xlu0 %v7628_v47, %s9672_s29 }
 0xb8b   : > { %v7627_v3 = vsub.f32 %v12083_v31, %v7590_v59  ;;  %v7596_v26 = vpop.permute.xlu0 %7595 }
 0xb8c   : > { %v7630_v36 = vsub.f32 %v12084_v39, %v7596_v26 }
 0xb8d   : > { %7669 = vrot.lane.b32.xlu1 %v7627_v3, %s9672_s29 }
 0xb8e   : > { %v7594_v55 = vpop.permute.xlu1 %7593  ;;  %7675 = vrot.lane.b32.xlu0 %v7630_v36, %s9672_s29 }
 0xb8f   : > { %v7629_v12 = vsub.f32 %v12085_v18, %v7594_v55 }
 0xb91   : > { %v7600_v0 = vpop.permute.xlu0 %7599  ;;  %7673 = vrot.lane.b32.xlu1 %v7629_v12, %s9672_s29 }
 0xb92   : > { %v7632_v41 = vsub.f32 %v12086_v34, %v7600_v0  ;;  %v7598_v52 = vpop.permute.xlu1 %7597 }
 0xb93   : > { %v7631_v15 = vsub.f32 %v12087_v48, %v7598_v52 }
 0xb94   : > { %7679 = vrot.lane.b32.xlu0 %v7632_v41, %s9672_s29 }
 0xb95   : > { %7677 = vrot.lane.b32.xlu1 %v7631_v15, %s9672_s29 }
 0xbe8   : > { %v7652_v16 = vpop.permute.xlu0 %7651 }
 0xbe9   : > { %v7698_v51 = vmul.f32 %v11525_v20, %v7652_v16  ;;  %v7650_v10 = vpop.permute.xlu1 %7649 }
 0xbea   : > { %v7697_v63 = vmul.f32 %v11530_v28, %v7650_v10 }
 0xbeb   : > { %7731 = vrot.lane.b32.xlu0 %v7698_v51, %s9672_s29 }
 0xbec   : > { %v7656_v25 = vpop.permute.xlu0 %7655  ;;  %7729 = vrot.lane.b32.xlu1 %v7697_v63, %s9672_s29 }
 0xbed   : > { %v7700_v43 = vmul.f32 %v11539_v6, %v7656_v25  ;;  %v7654_v57 = vpop.permute.xlu1 %7653 }
 0xbee   : > { %v7699_v32 = vmul.f32 %v11544_v29, %v7654_v57 }
 0xbef   : > { %7735 = vrot.lane.b32.xlu0 %v7700_v43, %s9672_s29 }
 0xbf0   : > { %v7660_v5 = vpop.permute.xlu0 %7659  ;;  %7733 = vrot.lane.b32.xlu1 %v7699_v32, %s9672_s29 }
 0xbf1   : > { %v7702_v20 = vmul.f32 %v11551_v21, %v7660_v5  ;;  %v7658_v46 = vpop.permute.xlu1 %7657 }
 0xbf2   : > { %v7701_v28 = vmul.f32 %v11556_v27, %v7658_v46 }
 0xbf3   : > { %7739 = vrot.lane.b32.xlu0 %v7702_v20, %s9672_s29 }
 0xbf4   : > { %v7664_v14 = vpop.permute.xlu0 %7663  ;;  %7737 = vrot.lane.b32.xlu1 %v7701_v28, %s9672_s29 }
 0xbf5   : > { %v7704_v6 = vmul.f32 %v11563_v62, %v7664_v14 }
 0xbf7   : > { %v7662_v61 = vpop.permute.xlu1 %7661  ;;  %7743 = vrot.lane.b32.xlu0 %v7704_v6, %s9672_s29 }
 0xbf8   : > { %v7703_v29 = vmul.f32 %v11569_v13, %v7662_v61  ;;  %v7668_v2 = vpop.permute.xlu0 %7667 }
 0xbf9   : > { %v7706_v8 = vmul.f32 %v11574_v60, %v7668_v2 }
 0xbfa   : > { %7741 = vrot.lane.b32.xlu1 %v7703_v29, %s9672_s29 }
 0xbfb   : > { %v7666_v21 = vpop.permute.xlu1 %7665  ;;  %7747 = vrot.lane.b32.xlu0 %v7706_v8, %s9672_s29  ;;  %v12088_v8 = vld [vmem:[#allocation31_spill] sm:$0xff] }
 0xbfc   : > { %v7705_v27 = vmul.f32 %v11581_v37, %v7666_v21  ;;  %v7672_v23 = vpop.permute.xlu0 %7671 }
 0xbfd   : > { %v7708_v53 = vmul.f32 %v11586_v19, %v7672_v23  ;;  %v12089_v23 = vld [vmem:[#allocation30_spill] sm:$0xff] }
 0xbfe   : > { %7745 = vrot.lane.b32.xlu1 %v7705_v27, %s9672_s29 }
 0xbff   : > { %v7670_v62 = vpop.permute.xlu1 %7669  ;;  %7751 = vrot.lane.b32.xlu0 %v7708_v53, %s9672_s29 }
 0xc00   : > { %v7707_v13 = vmul.f32 %v11593_v22, %v7670_v62  ;;  %v7676_v47 = vpop.permute.xlu0 %7675 }
 0xc01   : > { %v7710_v60 = vmul.f32 %v11598_v24, %v7676_v47 }
 0xc02   : > { %7749 = vrot.lane.b32.xlu1 %v7707_v13, %s9672_s29  ;;  %v12090_v13 = vld [vmem:[#allocation5_spill] sm:$0xff] }
 0xc03   : > { %v7674_v59 = vpop.permute.xlu1 %7673  ;;  %7755 = vrot.lane.b32.xlu0 %v7710_v60, %s9672_s29 }
 0xc04   : > { %v7709_v37 = vmul.f32 %v11604_v17, %v7674_v59  ;;  %v12091_v59 = vld [vmem:[#allocation8_spill] sm:$0xff] }
 0xc06   : > { %v7680_v31 = vpop.permute.xlu0 %7679  ;;  %7753 = vrot.lane.b32.xlu1 %v7709_v37, %s9672_s29 }
 0xc07   : > { %v7712_v19 = vmul.f32 %v11611_v35, %v7680_v31  ;;  %v7678_v3 = vpop.permute.xlu1 %7677 }
 0xc08   : > { %v7711_v26 = vmul.f32 %v11616_v4, %v7678_v3 }
 0xc09   : > { %7759 = vrot.lane.b32.xlu0 %v7712_v19, %s9672_s29  ;;  %v12092_v19 = vld [vmem:[#allocation33_spill] sm:$0xff] }
 0xc0a   : > { %7757 = vrot.lane.b32.xlu1 %v7711_v26, %s9672_s29 }
 0xc5d   : > { %v7732_v22 = vpop.permute.xlu0 %7731 }
 0xc5e   : > { %v7778_v24 = vadd.f32 %v11628_v7, %v7732_v22  ;;  %v7730_v39 = vpop.permute.xlu1 %7729  ;;  %v12093_v22 = vld [vmem:[#allocation9_spill] sm:$0xff] }
 0xc5f   : > { %v7777_v36 = vadd.f32 %v11631_v50, %v7730_v39 }
 0xc60   : > { %7811 = vrot.lane.b32.xlu0 %v7778_v24, %s9671_s7 }
 0xc61   : > { %v7736_v17 = vpop.permute.xlu0 %7735  ;;  %7809 = vrot.lane.b32.xlu1 %v7777_v36, %s9671_s7  ;;  %v12094_v36 = vld [vmem:[#allocation37_spill] sm:$0xff] }
 0xc62   : > { %v7780_v35 = vadd.f32 %v11638_v44, %v7736_v17  ;;  %v7734_v55 = vpop.permute.xlu1 %7733 }
 0xc63   : > { %v7779_v4 = vadd.f32 %v11641_v1, %v7734_v55  ;;  %v12095_v55 = vld [vmem:[#allocation35_spill] sm:$0xff] }
 0xc64   : > { %7815 = vrot.lane.b32.xlu0 %v7780_v35, %s9671_s7 }
 0xc65   : > { %v7740_v18 = vpop.permute.xlu0 %7739  ;;  %7813 = vrot.lane.b32.xlu1 %v7779_v4, %s9671_s7 }
 0xc66   : > { %v7782_v7 = vadd.f32 %v11648_v58, %v7740_v18  ;;  %v7738_v12 = vpop.permute.xlu1 %7737 }
 0xc67   : > { %v7781_v50 = vadd.f32 %v11651_v45, %v7738_v12 }
 0xc68   : > { %7819 = vrot.lane.b32.xlu0 %v7782_v7, %s9671_s7  ;;  %v12096_v7 = vld [vmem:[#allocation41_spill] sm:$0xff] }
 0xc69   : > { %v7744_v0 = vpop.permute.xlu0 %7743  ;;  %7817 = vrot.lane.b32.xlu1 %v7781_v50, %s9671_s7 }
 0xc6a   : > { %v7784_v44 = vadd.f32 %v11658_v33, %v7744_v0  ;;  %v12097_v0 = vld [vmem:[#allocation39_spill] sm:$0xff] }
 0xc6c   : > { %v7742_v34 = vpop.permute.xlu1 %7741  ;;  %7823 = vrot.lane.b32.xlu0 %v7784_v44, %s9671_s7 }
 0xc6d   : > { %v7783_v1 = vadd.f32 %v11663_v40, %v7742_v34  ;;  %v7748_v41 = vpop.permute.xlu0 %7747 }
 0xc6e   : > { %v7786_v52 = vadd.f32 %v11666_v11, %v7748_v41 }
 0xc6f   : > { %7821 = vrot.lane.b32.xlu1 %v7783_v1, %s9671_s7  ;;  %v12098_v1 = vld [vmem:[#allocation45_spill] sm:$0xff] }
 0xc70   : > { %v7746_v58 = vpop.permute.xlu1 %7745  ;;  %7827 = vrot.lane.b32.xlu0 %v7786_v52, %s9671_s7 }
 0xc71   : > { %v7785_v45 = vadd.f32 %v11673_v54, %v7746_v58  ;;  %v7752_v48 = vpop.permute.xlu0 %7751  ;;  %v12099_v58 = vld [vmem:[#allocation43_spill] sm:$0xff] }
 0xc72   : > { %v7788_v15 = vadd.f32 %v11676_v30, %v7752_v48 }
 0xc73   : > { %7825 = vrot.lane.b32.xlu1 %v7785_v45, %s9671_s7 }
 0xc74   : > { %v7750_v33 = vpop.permute.xlu1 %7749  ;;  %7831 = vrot.lane.b32.xlu0 %v7788_v15, %s9671_s7  ;;  %v12100_v15 = vld [vmem:[#allocation49_spill] sm:$0xff] }
 0xc75   : > { %v7787_v40 = vadd.f32 %v11682_v42, %v7750_v33  ;;  %v7756_v16 = vpop.permute.xlu0 %7755 }
 0xc76   : > { %v7790_v11 = vadd.f32 %v11684_v9, %v7756_v16  ;;  %v12101_v16 = vld [vmem:[#allocation47_spill] sm:$0xff] }
 0xc77   : > { %7829 = vrot.lane.b32.xlu1 %v7787_v40, %s9671_s7 }
 0xc78   : > { %v7754_v51 = vpop.permute.xlu1 %7753  ;;  %7835 = vrot.lane.b32.xlu0 %v7790_v11, %s9671_s7 }
 0xc79   : > { %v7789_v54 = vadd.f32 %v11690_v38, %v7754_v51 }
 0xc7b   : > { %v7760_v10 = vpop.permute.xlu0 %7759  ;;  %7833 = vrot.lane.b32.xlu1 %v7789_v54, %s9671_s7  ;;  %v12102_v54 = vld [vmem:[#allocation53_spill] sm:$0xff] }
 0xc7c   : > { %v7792_v30 = vadd.f32 %v11694_v49, %v7760_v10  ;;  %v7758_v63 = vpop.permute.xlu1 %7757 }
 0xc7d   : > { %v7791_v25 = vadd.f32 %v11696_v56, %v7758_v63  ;;  %v12103_v63 = vld [vmem:[#allocation51_spill] sm:$0xff] }
 0xc7e   : > { %7839 = vrot.lane.b32.xlu0 %v7792_v30, %s9671_s7 }
 0xc7f   : > { %7837 = vrot.lane.b32.xlu1 %v7791_v25, %s9671_s7  ;;  %s11819_s7 = scalar_lea.vmem [#allocation2], %s8126_s8 }
 0xc80   : > { %s8048_s20 = sshll.u32 %s11819_s7, 4  ;;  %s11869_s20 = int_to_ptr.vmem [resolvable:$true] %s8048_s20 }
 0xc81   : > { %s9603_s29 = scalar_lea.vmem %s11869_s20, 2048  ;;  %p9610_p0 = scmp.lt.s32.totalorder %s11869_s20, %s9608_s30 }
 0xc82   : > { %p9604_p11 = scmp.ne.s32.totalorder %s11869_s20, %s9603_s29  ;;  %p9611_p1 = scmp.lt.s32.totalorder %s9609_s6, %s9603_s29 }
 0xc84   : > { %p9605_p12 = pnand %p9604_p11, %p9739_p5  ;;  %p9612_p2 = por %p9611_p1, %p9610_p0 }
 0xc86   : > { %p9606_p13 = pneg %p9605_p12 }
 0xc88   : > { %p9613_p3 = pnand %p9612_p2, %p9606_p13 }
 0xcd2   : > { %v7812_v42 = vpop.permute.xlu0 %7811 }
 0xcd3   : > { %v7810_v9 = vpop.permute.xlu1 %7809 }
 0xcd4   : > { %9166 = vmatprep.mubr.msk.f32.mxu1 %vm320_vm0, %v7810_v9 }
 0xcd5   : > { %9167 = vmatmul.mubr.msk.f32.vlgmr.msra.gmra.mrb[136].mxu1 %vm320_vm0, %v7812_v42 }
 0xcd6   : > { %v7816_v43 = vpop.permute.xlu0 %7815 }
 0xcd7   : > { %v7814_v38 = vpop.permute.xlu1 %7813 }
 0xcd8   : > { %9169 = vmatprep.mubr.msk.f32.mxu1 %vm320_vm0, %v7814_v38 }
 0xcd9   : > { %9170 = vmatmul.mubr.msk.f32.gmra.mrb[138].mxu1 %vm320_vm0, %v7816_v43 }
 0xcda   : > { %v7820_v49 = vpop.permute.xlu0 %7819 }
 0xcdb   : > { %v7818_v57 = vpop.permute.xlu1 %7817 }
 0xcdc   : > { %9172 = vmatprep.mubr.msk.f32.mxu1 %vm320_vm0, %v7818_v57 }
 0xcdd   : > { %9173 = vmatmul.mubr.msk.f32.gmra.mrb[140].mxu1 %vm320_vm0, %v7820_v49 }
 0xcde   : > { %v7824_v56 = vpop.permute.xlu0 %7823 }
 0xce1   : > { %v7822_v32 = vpop.permute.xlu1 %7821 }
 0xce2   : > { %9175 = vmatprep.mubr.msk.f32.mxu1 %vm320_vm0, %v7822_v32  ;;  %v7828_v5 = vpop.permute.xlu0 %7827 }
 0xce3   : > { %9176 = vmatmul.mubr.msk.f32.gmra.mrb[142].mxu1 %vm320_vm0, %v7824_v56 }
 0xce5   : > { %v7826_v20 = vpop.permute.xlu1 %7825 }
 0xce6   : > { %9178 = vmatprep.mubr.msk.f32.mxu1 %vm320_vm0, %v7826_v20  ;;  %v7832_v46 = vpop.permute.xlu0 %7831 }
 0xce7   : > { %9179 = vmatmul.mubr.msk.f32.gmra.mrb[144].mxu1 %vm320_vm0, %v7828_v5 }
 0xce9   : > { %v7830_v28 = vpop.permute.xlu1 %7829 }
 0xcea   : > { %9181 = vmatprep.mubr.msk.f32.mxu1 %vm320_vm0, %v7830_v28  ;;  %v7836_v14 = vpop.permute.xlu0 %7835 }
 0xceb   : > { %9182 = vmatmul.mubr.msk.f32.gmra.mrb[146].mxu1 %vm320_vm0, %v7832_v46 }
 0xced   : > { %v7834_v6 = vpop.permute.xlu1 %7833 }
 0xcee   : > { %9184 = vmatprep.mubr.msk.f32.mxu1 %vm320_vm0, %v7834_v6 }
 0xcef   : > { %9185 = vmatmul.mubr.msk.f32.gmra.mrb[148].mxu1 %vm320_vm0, %v7836_v14 }
 0xcf0   : > { %v7840_v29 = vpop.permute.xlu0 %7839 }
 0xcf1   : > { %v7838_v61 = vpop.permute.xlu1 %7837 }
 0xcf2   : > { %9187 = vmatprep.mubr.msk.f32.mxu1 %vm320_vm0, %v7838_v61 }
 0xcf3   : > { %9188 = vmatmul.mubr.msk.f32.gmra.mrb[150].mxu1 %vm320_vm0, %v7840_v29 }
 0xda8   : > { %v9168_v2 = vpop.f32.mrb[136].mxu1 }
 0xda9   : > { %v7945_v21 = vadd.f32 %v9168_v2, %v12088_v8  ;;  %v7939_v27 = vpop.f32.mrb[137].mxu1 }
 0xdaa   : > { %v7940_v53 = vadd.f32 %v7939_v27, %v12089_v23 }
 0xdab   : > { %8019 = vst.msk [vmem:[%s11819_s7 + $0x8] sm:$0xff] %vm320_vm0, %v7945_v21 }
 0xdac   : > { %8018 = vst.msk [vmem:[%s11819_s7] sm:$0xff] %vm320_vm0, %v7940_v53  ;;  %v9171_v62 = vpop.f32.mrb[138].mxu1 }
 0xdad   : > { %v7955_v47 = vadd.f32 %v9171_v62, %v12090_v13  ;;  %v7949_v60 = vpop.f32.mrb[139].mxu1 }
 0xdae   : > { %v7950_v37 = vadd.f32 %v7949_v60, %v12091_v59 }
 0xdaf   : > { %8021 = vst.msk [vmem:[%s11819_s7 + $0x18] sm:$0xff] %vm320_vm0, %v7955_v47 }
 0xdb0   : > { %8020 = vst.msk [vmem:[%s11819_s7 + $0x10] sm:$0xff] %vm320_vm0, %v7950_v37  ;;  %v9174_v31 = vpop.f32.mrb[140].mxu1 }
 0xdb1   : > { %v7965_v3 = vadd.f32 %v9174_v31, %v12092_v19  ;;  %v7959_v26 = vpop.f32.mrb[141].mxu1 }
 0xdb2   : > { %v7960_v24 = vadd.f32 %v7959_v26, %v12093_v22 }
 0xdb3   : > { %8023 = vst.msk [vmem:[%s11819_s7 + $0x28] sm:$0xff] %vm320_vm0, %v7965_v3 }
 0xdb4   : > { %8022 = vst.msk [vmem:[%s11819_s7 + $0x20] sm:$0xff] %vm320_vm0, %v7960_v24 }
 0xdb6   : > { %v9177_v39 = vpop.f32.mrb[142].mxu1 }
 0xdb7   : > { %v7975_v17 = vadd.f32 %v9177_v39, %v12094_v36  ;;  %v7969_v35 = vpop.f32.mrb[143].mxu1 }
 0xdb8   : > { %v7970_v4 = vadd.f32 %v7969_v35, %v12095_v55 }
 0xdb9   : > { %8025 = vst.msk [vmem:[%s11819_s7 + $0x38] sm:$0xff] %vm320_vm0, %v7975_v17 }
 0xdba   : > { %8024 = vst.msk [vmem:[%s11819_s7 + $0x30] sm:$0xff] %vm320_vm0, %v7970_v4  ;;  %v9180_v18 = vpop.f32.mrb[144].mxu1 }
 0xdbb   : > { %v7985_v12 = vadd.f32 %v9180_v18, %v12096_v7  ;;  %v7979_v50 = vpop.f32.mrb[145].mxu1 }
 0xdbc   : > { %v7980_v44 = vadd.f32 %v7979_v50, %v12097_v0 }
 0xdbd   : > { %8027 = vst.msk [vmem:[%s11819_s7 + $0x48] sm:$0xff] %vm320_vm0, %v7985_v12 }
 0xdbe   : > { %8026 = vst.msk [vmem:[%s11819_s7 + $0x40] sm:$0xff] %vm320_vm0, %v7980_v44  ;;  %v9183_v34 = vpop.f32.mrb[146].mxu1 }
 0xdbf   : > { %v7995_v41 = vadd.f32 %v9183_v34, %v12098_v1  ;;  %v7989_v52 = vpop.f32.mrb[147].mxu1 }
 0xdc0   : > { %v7990_v45 = vadd.f32 %v7989_v52, %v12099_v58 }
 0xdc1   : > { %8029 = vst.msk [vmem:[%s11819_s7 + $0x58] sm:$0xff] %vm320_vm0, %v7995_v41 }
 0xdc2   : > { %8028 = vst.msk [vmem:[%s11819_s7 + $0x50] sm:$0xff] %vm320_vm0, %v7990_v45  ;;  %v9186_v48 = vpop.f32.mrb[148].mxu1 }
 0xdc3   : > { %v8005_v33 = vadd.f32 %v9186_v48, %v12100_v15  ;;  %v7999_v40 = vpop.f32.mrb[149].mxu1 }
 0xdc4   : > { %v8000_v11 = vadd.f32 %v7999_v40, %v12101_v16 }
 0xdc5   : > { %8031 = vst.msk [vmem:[%s11819_s7 + $0x68] sm:$0xff] %vm320_vm0, %v8005_v33 }
 0xdc6   : > { %8030 = vst.msk [vmem:[%s11819_s7 + $0x60] sm:$0xff] %vm320_vm0, %v8000_v11  ;;  %v9189_v51 = vpop.f32.mrb[150].mxu1 }
 0xdc7   : > { %v8015_v10 = vadd.f32 %v9189_v51, %v12102_v54  ;;  %v8009_v30 = vpop.f32.mrb[151].mxu1 }
 0xdc8   : > { %v8010_v25 = vadd.f32 %v8009_v30, %v12103_v63 }
 0xdc9   : > { %8033 = vst.msk [vmem:[%s11819_s7 + $0x78] sm:$0xff] %vm320_vm0, %v8015_v10 }
 0xdca   : > { %8032 = vst.msk [vmem:[%s11819_s7 + $0x70] sm:$0xff] %vm320_vm0, %v8010_v25 }
 0xdcb   : > { %9616 = shalt.err (!%p9613_p3)
}
 0xdcc   : > { %s9617_s9 = scalar_lea.hbm %s11867_s28, 2048  ;;  %s9621_s12 = scalar_lea.hbm %s11923_s4, 4096 }
 0xdcd   : > { %p9618_p4 = scmp.ne.s32.totalorder %s11867_s28, %s9617_s9  ;;  %p9622_p9 = scmp.lt.u32.totalorder %s11867_s28, %s11923_s4 }
 0xdce   : > { %p9623_p10 = scmp.lt.u32.totalorder %s9621_s12, %s9617_s9  ;;  %p9625_p12 = scmp.lt.u32.totalorder %s9617_s9, %s11867_s28 }
 0xdcf   : > { %p9619_p7 = pnand %p9618_p4, %p9739_p5 }
 0xdd0   : > { %p9624_p11 = por %p9623_p10, %p9622_p9 }
 0xdd1   : > { %p9620_p8 = pneg %p9619_p7 }
 0xdd2   : > { %p9626_p13 = por %p9625_p12, %p9624_p11 }
 0xdd4   : > { %p9627_p0 = pnand %p9626_p13, %p9620_p8 }
 0xdd6   : > { %9630 = shalt.err (!%p9627_p0)
}
 0xdd7   : > { %s9674_s8 = smov 128   ;;  %s9675_s7 = smov 8  }
 0xdd8   : > { %9298 = dma.vmem_to_hbm [thread:$0]  (%p9739_p5), %s11869_s20, 2048, %s11867_s28, %s11878_s19, %s9674_s8, %s9674_s8, %s9675_s7  }
 0xdd9 PF: > { %p9304_p1 = scmp.ge.s32.totalorder %s9665_s18, 2  ;;  %s8063_s14 = sand.u32 1, %s9653_s15  }
 0xdda   : > { %s8064_s22 = scalar_lea.sflag [#allocation3], %s8063_s14 }
 0xddb   : > { %p9301_p2 = pnand %p9304_p1, %p9743_p6 }
 0xddd   : > { %9648 = dma.done.wait (!%p9301_p2), %s8064_s22, 2048  }
 0xdde   : > { %9650 = vsyncadd (!%p9301_p2), %s8064_s22, 4294965248  ;;  %p14_p3 = scmp.ge.s32.totalorder %s9726_s21, 4   ;;  %s12104_s15 = smov %s9657_s16 }
 0xddf   : > { %s12105_s16 = smov %s9661_s17  ;;  %s12106_s17 = smov %s9737_s24 }
 0xde0   : > { %s12107_s18 = smov %s9726_s21  ;;  %16 = sbr.rel (!%p14_p3) target bundleno = 3 (0x3), region = 74 }
 0xde7   :  { %8069 = vsyncpa [#allocation3], 1 }
 0xde8   :  { %8071 = vsyncpa [#allocation3 + $0x1], 1 }

</bundles_post_ra>
